<compile_context>
chip_gen: v5e
topology: v5e:2x2
jax: 0.10.0
libtpu: 0.0.40
codegen_flags: <defaults>
</compile_context>

<pallas_src>
import functools

import jax
import jax.numpy as jnp
from jax import lax
from jax.experimental import pallas as pl
from jax.experimental.pallas import tpu as pltpu

_LANES = 128
_SUBLANES = 8
_TILE = _SUBLANES * _LANES      # 1024 samples per (8,128) tile
_ROWS = 26                      # 9 pred x, 9 pred y, 4 tgt x, 4 tgt y
_NPRED = 9
_NQUAD = 4
_NALL = _NPRED + _NQUAD         # 13 candidate points for the enclosing hull
_MAX_TILES_PER_STEP = 4         # tiles batched per grid step (amortise step overhead)


def _convex_giou_loss_kernel(coords_ref, loss_ref,
                             allx_ref, ally_ref, edx_ref, edy_ref, edk_ref,
                             *, tiles_per_step):
    """Per-sample convex-GIoU loss for `tiles_per_step` (8,128) tiles of samples.

    coords_ref: (tiles_per_step*26, 8, 128); per tile the 26 rows are
                [pred x0..x8, pred y0..y8, tgt x0..x3, tgt y0..y3].
    loss_ref:   (tiles_per_step, 8, 128) per-sample losses.
    Scratch: allx/ally hold hull verts (0..8, padded with start) + CCW quad (9..12);
             edx/edy/edk hold the 9 hull half-plane constants.
    """

    def per_tile(b):
        base = b * _ROWS

        def ld(r):                             # fresh vld each use (vld slots idle)
            return coords_ref[base + r]

        # ---- 1. start vertex: lowest-y (tie lowest-x) predicted point -------
        def lexmin_body(j, carry):
            sx, sy = carry
            xj, yj = ld(j), ld(_NPRED + j)
            better = (yj < sy) | ((yj == sy) & (xj < sx))
            return jnp.where(better, xj, sx), jnp.where(better, yj, sy)

        sx, sy = lax.fori_loop(1, _NPRED, lexmin_body, (ld(0), ld(_NPRED)))
        allx_ref[0] = sx
        ally_ref[0] = sy

        # ---- 2. gift-wrapping (CCW) hull of the 9 pred points ---------------
        # Vertices go to allx/ally[0..8] (unused slots padded with the start
        # vertex); the shoelace area is accumulated on the fly.
        def march_body(k, carry):
            cx, cy, live, acc = carry          # live: 1.0 until the hull closes
            nx, ny = cx, cy
            ndx = jnp.zeros_like(cx)
            ndy = jnp.zeros_like(cx)
            dd = jnp.zeros_like(cx)
            for j in range(_NPRED):            # unrolled candidate scan
                xj, yj = ld(j), ld(_NPRED + j)
                dx = xj - cx
                dy = yj - cy
                c = ndx * dy - ndy * dx
                dn = dx * dx + dy * dy
                repl = (c < 0.0) | ((c == 0.0) & (dn > dd))
                nx = jnp.where(repl, xj, nx)   # exact coords: needed for termination
                ny = jnp.where(repl, yj, ny)
                ndx = jnp.where(repl, dx, ndx)
                ndy = jnp.where(repl, dy, ndy)
                dd = jnp.where(repl, dn, dd)
            vx = jnp.where(live > 0.0, nx, sx)
            vy = jnp.where(live > 0.0, ny, sy)
            allx_ref[k + 1] = vx
            ally_ref[k + 1] = vy
            acc = acc + (cx * vy - vx * cy)
            live = jnp.where((nx == sx) & (ny == sy), 0.0, live)
            return vx, vy, live, acc

        hx8, hy8, _, acc_p = lax.fori_loop(
            0, _NPRED - 1, march_body,
            (sx, sy, jnp.ones_like(sx), jnp.zeros_like(sx)))
        area_p = 0.5 * jnp.abs(acc_p + (hx8 * sy - sx * hy8))   # closing edge

        # ---- 3. target quad: area, CCW re-orientation, store to slots 9..12 -
        tx = [ld(18 + i) for i in range(_NQUAD)]
        ty = [ld(22 + i) for i in range(_NQUAD)]
        q2 = ((tx[0] * ty[1] - tx[1] * ty[0]) + (tx[1] * ty[2] - tx[2] * ty[1])
              + (tx[2] * ty[3] - tx[3] * ty[2]) + (tx[3] * ty[0] - tx[0] * ty[3]))
        area_t = 0.5 * jnp.abs(q2)
        flip = q2 < 0.0
        qx = [tx[0], jnp.where(flip, tx[3], tx[1]), tx[2], jnp.where(flip, tx[1], tx[3])]
        qy = [ty[0], jnp.where(flip, ty[3], ty[1]), ty[2], jnp.where(flip, ty[1], ty[3])]
        for i in range(_NQUAD):
            allx_ref[_NPRED + i] = qx[i]
            ally_ref[_NPRED + i] = qy[i]

        # quad half-plane constants, hoisted across the 9 hull-edge clips:
        # inside(p) for CCW quad edge e  <=>  qex*py - qey*px - qk >= 0
        qex, qey, qk = [], [], []
        for e in range(_NQUAD):
            en = (e + 1) % _NQUAD
            ex = qx[en] - qx[e]
            ey = qy[en] - qy[e]
            qex.append(ex)
            qey.append(ey)
            qk.append(ex * qy[e] - ey * qx[e])

        # ---- 4a. hull edges clipped to the quad (boundary counts as inside) -
        def clip_hull_edges(i, inter2):
            nxt = jnp.where(i == _NPRED - 1, 0, i + 1)
            ax, ay = allx_ref[i], ally_ref[i]
            bx, by = allx_ref[nxt], ally_ref[nxt]
            t0 = jnp.zeros_like(ax)
            t1 = jnp.ones_like(ax)
            ok = ax >= ax                                   # all-true mask
            for e in range(_NQUAD):                         # unrolled (4 edges)
                sa = qex[e] * ay - qey[e] * ax - qk[e]
                sb = qex[e] * by - qey[e] * bx - qk[e]
                a_in = sa >= 0.0
                b_in = sb >= 0.0
                # t only consumed when entering/leaving (=> sa-sb != 0); EUP recip
                t = sa * pl.reciprocal(sa - sb, approx=True)
                t0 = jnp.where(b_in & (~a_in), jnp.maximum(t0, t), t0)
                t1 = jnp.where(a_in & (~b_in), jnp.minimum(t1, t), t1)
                ok = ok & (a_in | b_in)
            ok = ok & (t0 <= t1)
            dx, dy = bx - ax, by - ay
            pax, pay = ax + t0 * dx, ay + t0 * dy
            pbx, pby = ax + t1 * dx, ay + t1 * dy
            return inter2 + jnp.where(ok, pax * pby - pbx * pay, 0.0)

        inter2 = lax.fori_loop(0, _NPRED, clip_hull_edges, jnp.zeros_like(sx))

        # ---- 4b. hull half-plane constants (degenerate padded edges disabled
        #          by biasing k so every point reads as strictly inside) -------
        def edge_const_body(e, carry):
            nxt = jnp.where(e == _NPRED - 1, 0, e + 1)
            ux, uy = allx_ref[e], ally_ref[e]
            ex = allx_ref[nxt] - ux
            ey = ally_ref[nxt] - uy
            deg = (ex == 0.0) & (ey == 0.0)
            edx_ref[e] = ex
            edy_ref[e] = ey
            edk_ref[e] = ex * uy - ey * ux - jnp.where(deg, 1.0, 0.0)
            return carry

        lax.fori_loop(0, _NPRED, edge_const_body, 0)

        # quad edges clipped to the hull interior (strict inside: shared
        # boundary is counted only once, by the 4a pass).
        def clip_quad_edges(s, inter2_):
            cur = _NPRED + s
            nxt = jnp.where(s == _NQUAD - 1, _NPRED, cur + 1)
            ax, ay = allx_ref[cur], ally_ref[cur]
            bx, by = allx_ref[nxt], ally_ref[nxt]

            def edge_body(e, carry):
                t0, t1, okf = carry
                ex, ey, kp = edx_ref[e], edy_ref[e], edk_ref[e]
                sa = ex * ay - ey * ax - kp
                sb = ex * by - ey * bx - kp
                a_in = sa > 0.0
                b_in = sb > 0.0
                t = sa * pl.reciprocal(sa - sb, approx=True)
                t0 = jnp.where(b_in & (~a_in), jnp.maximum(t0, t), t0)
                t1 = jnp.where(a_in & (~b_in), jnp.minimum(t1, t), t1)
                okf = jnp.where(a_in | b_in, okf, 0.0)
                return t0, t1, okf

            t0, t1, okf = lax.fori_loop(
                0, _NPRED, edge_body,
                (jnp.zeros_like(ax), jnp.ones_like(ax), jnp.ones_like(ax)))
            ok = (okf > 0.0) & (t0 <= t1)
            dx, dy = bx - ax, by - ay
            pax, pay = ax + t0 * dx, ay + t0 * dy
            pbx, pby = ax + t1 * dx, ay + t1 * dy
            return inter2_ + jnp.where(ok, pax * pby - pbx * pay, 0.0)

        inter2 = lax.fori_loop(0, _NQUAD, clip_quad_edges, inter2)
        area_i = jnp.maximum(0.5 * inter2, 0.0)

        # ---- 5. smallest enclosing convex hull: hull(pred) verts + quad ------
        # lex-min of the combined set = lex-min(hull start, lex-min(quad)).
        ssx, ssy = sx, sy
        for i in range(_NQUAD):
            better = (qy[i] < ssy) | ((qy[i] == ssy) & (qx[i] < ssx))
            ssx = jnp.where(better, qx[i], ssx)
            ssy = jnp.where(better, qy[i], ssy)

        def enclose_body(k, carry):
            cx, cy, live, acc = carry
            nx, ny = cx, cy
            ndx = jnp.zeros_like(cx)
            ndy = jnp.zeros_like(cx)
            dd = jnp.zeros_like(cx)
            for j in range(_NALL):             # unrolled candidate scan (13 pts)
                xj, yj = allx_ref[j], ally_ref[j]
                dx = xj - cx
                dy = yj - cy
                c = ndx * dy - ndy * dx
                dn = dx * dx + dy * dy
                repl = (c < 0.0) | ((c == 0.0) & (dn > dd))
                nx = jnp.where(repl, xj, nx)
                ny = jnp.where(repl, yj, ny)
                ndx = jnp.where(repl, dx, ndx)
                ndy = jnp.where(repl, dy, ndy)
                dd = jnp.where(repl, dn, dd)
            acc = acc + live * (cx * ny - nx * cy)
            live = jnp.where((nx == ssx) & (ny == ssy), 0.0, live)
            return nx, ny, live, acc

        _, _, _, acc_c = lax.fori_loop(
            0, _NALL, enclose_body,
            (ssx, ssy, jnp.ones_like(ssx), jnp.zeros_like(ssx)))
        area_c = 0.5 * jnp.abs(acc_c)

        # ---- 6. GIoU and loss (2 exact divides / tile: negligible) ----------
        eps = 1e-6
        union = area_p + area_t - area_i
        iou = area_i / jnp.maximum(union, eps)
        enclose = jnp.maximum(area_c, eps)
        giou = iou - (enclose - union) / enclose
        loss_ref[b] = 1.0 - giou

    if tiles_per_step == 1:
        per_tile(0)
    else:
        def tile_body(b, carry):
            per_tile(b)
            return carry
        lax.fori_loop(0, tiles_per_step, tile_body, 0)


def _build_coords(pred, target, nblk_padded):
    """Pack pred/target into one contiguous (nblk*26, 8, 128) f32 slab."""
    n = pred.shape[0]
    npad = nblk_padded * _TILE
    pts = pred.reshape(n, _NPRED, 2).astype(jnp.float32)
    tgt = target.reshape(n, _NQUAD, 2).astype(jnp.float32)
    coords = jnp.concatenate(
        [pts[:, :, 0], pts[:, :, 1], tgt[:, :, 0], tgt[:, :, 1]], axis=1)   # (n, 26)
    coords = jnp.pad(coords, ((0, npad - n), (0, 0)))
    coords = coords.reshape(nblk_padded, _SUBLANES, _LANES, _ROWS)
    coords = coords.transpose(0, 3, 1, 2).reshape(nblk_padded * _ROWS, _SUBLANES, _LANES)
    return coords


@jax.jit
def _convex_giou_loss_pallas(pred, target):
    """pred: (N, 18), target: (N, 8) -> per-sample loss (N,)."""
    n = pred.shape[0]
    nblk = max(1, -(-n // _TILE))
    tb = min(_MAX_TILES_PER_STEP, nblk)
    nsteps = -(-nblk // tb)
    nblk_padded = nsteps * tb

    coords = _build_coords(pred, target, nblk_padded)
    kernel = functools.partial(_convex_giou_loss_kernel, tiles_per_step=tb)

    losses = pl.pallas_call(
        kernel,
        out_shape=jax.ShapeDtypeStruct((nblk_padded, _SUBLANES, _LANES), jnp.float32),
        grid=(nsteps,),
        in_specs=[pl.BlockSpec((tb * _ROWS, _SUBLANES, _LANES), lambda i: (i, 0, 0))],
        out_specs=pl.BlockSpec((tb, _SUBLANES, _LANES), lambda i: (i, 0, 0)),
        scratch_shapes=[
            pltpu.VMEM((_NALL, _SUBLANES, _LANES), jnp.float32),    # hull+quad x
            pltpu.VMEM((_NALL, _SUBLANES, _LANES), jnp.float32),    # hull+quad y
            pltpu.VMEM((_NPRED, _SUBLANES, _LANES), jnp.float32),   # hull edge ex
            pltpu.VMEM((_NPRED, _SUBLANES, _LANES), jnp.float32),   # hull edge ey
            pltpu.VMEM((_NPRED, _SUBLANES, _LANES), jnp.float32),   # hull edge k'
        ],
        compiler_params=pltpu.CompilerParams(
            dimension_semantics=("parallel",)),   # no cross-step state -> megacore-friendly
    )(coords)
    return losses.reshape(nblk_padded * _TILE)[:n]


class ConvexGIoULoss:
    """Forward-only JAX/Pallas port of mmdet's ConvexGIoULoss (no learnable parameters)."""

    def __init__(self, reduction='mean', loss_weight=1.0):
        self.reduction = reduction
        self.loss_weight = loss_weight

    def __call__(self, pred, target, weight=None, avg_factor=None, reduction_override=None):
        if weight is not None and not bool(jnp.any(weight > 0)):
            return (pred * weight[..., None]).sum()
        assert reduction_override in (None, 'none', 'mean', 'sum')
        reduction = reduction_override if reduction_override else self.reduction

        loss_elem = _convex_giou_loss_pallas(pred, target)
        if weight is not None:
            loss_elem = loss_elem * weight

        if reduction == 'sum':
            loss = jnp.sum(loss_elem)
        elif reduction == 'mean':
            loss = jnp.mean(loss_elem)
        else:
            loss = loss_elem
        return self.loss_weight * loss


if __name__ == "__main__":
    key = jax.random.PRNGKey(0)
    n = 200
    k1, k2, k3 = jax.random.split(key, 3)

    # Target quads: axis-aligned boxes (convex, CCW corner order), coords ~ [5, 95].
    cxy = jax.random.uniform(k1, (n, 2), minval=20.0, maxval=80.0)
    wh = jax.random.uniform(k2, (n, 2), minval=5.0, maxval=15.0)
    corners = jnp.stack([
        jnp.stack([cxy[:, 0] - wh[:, 0], cxy[:, 1] - wh[:, 1]], -1),
        jnp.stack([cxy[:, 0] + wh[:, 0], cxy[:, 1] - wh[:, 1]], -1),
        jnp.stack([cxy[:, 0] + wh[:, 0], cxy[:, 1] + wh[:, 1]], -1),
        jnp.stack([cxy[:, 0] - wh[:, 0], cxy[:, 1] + wh[:, 1]], -1),
    ], axis=1)                                            # (n, 4, 2)
    target = corners.reshape(n, 8).astype(jnp.float32)

    # Predicted point sets: 9 points scattered around each target center.
    noise = jax.random.normal(k3, (n, 9, 2)) * 8.0
    pred = (cxy[:, None, :] + noise).reshape(n, 18).astype(jnp.float32)

    # Sanity element 0: pred points exactly on target box (+ interior dups) -> loss ~ 0.
    pts0 = jnp.concatenate([corners[0], jnp.tile(cxy[0][None, :], (5, 1))], axis=0)
    pred = pred.at[0].set(pts0.reshape(18))

    loss_mod = ConvexGIoULoss(reduction='mean', loss_weight=1.0)
    loss = loss_mod(pred, target)
    loss = jax.block_until_ready(loss)

    per_elem = _convex_giou_loss_pallas(pred, target)
    per_elem = jax.block_until_ready(per_elem)

    assert bool(jnp.isfinite(loss)), f"loss not finite: {loss}"
    assert bool(jnp.all(jnp.isfinite(per_elem))), "per-element losses not finite"
    assert abs(float(per_elem[0])) < 1e-3, f"identity case loss too large: {per_elem[0]}"
    print("KERNEL_OK")
</pallas_src>

<mosaic_0001>
module attributes {stable_mosaic.version = 11 : i64} {
  func.func @_convex_giou_loss_kernel(%arg0: i32, %arg1: memref<26x8x128xf32, #tpu.memory_space<vmem>>, %arg2: memref<1x8x128xf32, #tpu.memory_space<vmem>>, %arg3: memref<13x8x128xf32, #tpu.memory_space<vmem>>, %arg4: memref<13x8x128xf32, #tpu.memory_space<vmem>>, %arg5: memref<9x8x128xf32, #tpu.memory_space<vmem>>, %arg6: memref<9x8x128xf32, #tpu.memory_space<vmem>>, %arg7: memref<9x8x128xf32, #tpu.memory_space<vmem>>) attributes {dimension_semantics = [#tpu.dimension_semantics<parallel>], iteration_bounds = array<i64: 1>, scalar_prefetch = 0 : i64, scratch_operands = 5 : i64, tpu.core_type = #tpu.core_type<tc>, window_params = [{transform_indices = @transform_0, window_bounds = array<i64: 26, 8, 128>}, {transform_indices = @transform_1, window_bounds = array<i64: 1, 8, 128>}]} {
    %c0 = arith.constant 0 : index
    %c0_0 = arith.constant 0 : index
    %c0_1 = arith.constant 0 : index
    %0 = vector.load %arg1[%c0, %c0_0, %c0_1] : memref<26x8x128xf32, #tpu.memory_space<vmem>>, vector<1x8x128xf32>
    %1 = vector.shape_cast %0 : vector<1x8x128xf32> to vector<8x128xf32>
    %c9 = arith.constant 9 : index
    %c0_2 = arith.constant 0 : index
    %c0_3 = arith.constant 0 : index
    %2 = vector.load %arg1[%c9, %c0_2, %c0_3] : memref<26x8x128xf32, #tpu.memory_space<vmem>>, vector<1x8x128xf32>
    %3 = vector.shape_cast %2 : vector<1x8x128xf32> to vector<8x128xf32>
    %c1_i32 = arith.constant 1 : i32
    %c8_i32 = arith.constant 8 : i32
    %4 = arith.addi %c1_i32, %c8_i32 : i32
    %c1_i32_4 = arith.constant 1 : i32
    %5:2 = scf.for %arg8 = %c1_i32 to %4 step %c1_i32_4 iter_args(%arg9 = %1, %arg10 = %3) -> (vector<8x128xf32>, vector<8x128xf32>)  : i32 {
      %c0_i32_80 = arith.constant 0 : i32
      %167 = arith.addi %c0_i32_80, %arg8 : i32
      %168 = arith.index_cast %167 : i32 to index
      %c0_81 = arith.constant 0 : index
      %c0_82 = arith.constant 0 : index
      %169 = vector.load %arg1[%168, %c0_81, %c0_82] : memref<26x8x128xf32, #tpu.memory_space<vmem>>, vector<1x8x128xf32>
      %170 = vector.shape_cast %169 : vector<1x8x128xf32> to vector<8x128xf32>
      %c9_i32_83 = arith.constant 9 : i32
      %171 = arith.addi %c9_i32_83, %arg8 : i32
      %c0_i32_84 = arith.constant 0 : i32
      %172 = arith.addi %c0_i32_84, %171 : i32
      %173 = arith.index_cast %172 : i32 to index
      %c0_85 = arith.constant 0 : index
      %c0_86 = arith.constant 0 : index
      %174 = vector.load %arg1[%173, %c0_85, %c0_86] : memref<26x8x128xf32, #tpu.memory_space<vmem>>, vector<1x8x128xf32>
      %175 = vector.shape_cast %174 : vector<1x8x128xf32> to vector<8x128xf32>
      %176 = arith.cmpf olt, %175, %arg10 : vector<8x128xf32>
      %177 = arith.cmpf oeq, %175, %arg10 : vector<8x128xf32>
      %178 = arith.cmpf olt, %170, %arg9 : vector<8x128xf32>
      %179 = arith.andi %177, %178 : vector<8x128xi1>
      %180 = arith.ori %176, %179 : vector<8x128xi1>
      %181 = arith.select %180, %170, %arg9 : vector<8x128xi1>, vector<8x128xf32>
      %182 = arith.select %180, %175, %arg10 : vector<8x128xi1>, vector<8x128xf32>
      scf.yield %181, %182 : vector<8x128xf32>, vector<8x128xf32>
    }
    %c8_i32_5 = arith.constant 8 : i32
    %c0_6 = arith.constant 0 : index
    %c0_7 = arith.constant 0 : index
    %c0_8 = arith.constant 0 : index
    %6 = vector.load %arg3[%c0_6, %c0_7, %c0_8] : memref<13x8x128xf32, #tpu.memory_space<vmem>>, vector<1x8x128xf32>
    %7 = vector.shape_cast %6 : vector<1x8x128xf32> to vector<8x128xf32>
    %8 = vector.shape_cast %5#0 : vector<8x128xf32> to vector<1x8x128xf32>
    tpu.vector_store %arg3[%c0_6, %c0_7, %c0_8], %8 {strides = array<i32>} : memref<13x8x128xf32, #tpu.memory_space<vmem>>, vector<1x8x128xf32>,
    %c0_9 = arith.constant 0 : index
    %c0_10 = arith.constant 0 : index
    %c0_11 = arith.constant 0 : index
    %9 = vector.load %arg4[%c0_9, %c0_10, %c0_11] : memref<13x8x128xf32, #tpu.memory_space<vmem>>, vector<1x8x128xf32>
    %10 = vector.shape_cast %9 : vector<1x8x128xf32> to vector<8x128xf32>
    %11 = vector.shape_cast %5#1 : vector<8x128xf32> to vector<1x8x128xf32>
    tpu.vector_store %arg4[%c0_9, %c0_10, %c0_11], %11 {strides = array<i32>} : memref<13x8x128xf32, #tpu.memory_space<vmem>>, vector<1x8x128xf32>,
    %cst = arith.constant 1.000000e+00 : f32
    %12 = vector.broadcast %cst : f32 to vector<8x128xf32>
    %cst_12 = arith.constant 0.000000e+00 : f32
    %13 = vector.broadcast %cst_12 : f32 to vector<8x128xf32>
    %c0_i32 = arith.constant 0 : i32
    %c8_i32_13 = arith.constant 8 : i32
    %14 = arith.addi %c0_i32, %c8_i32_13 : i32
    %c1_i32_14 = arith.constant 1 : i32
    %15:4 = scf.for %arg8 = %c0_i32 to %14 step %c1_i32_14 iter_args(%arg9 = %5#0, %arg10 = %5#1, %arg11 = %12, %arg12 = %13) -> (vector<8x128xf32>, vector<8x128xf32>, vector<8x128xf32>, vector<8x128xf32>)  : i32 {
      %cst_80 = arith.constant 0.000000e+00 : f32
      %167 = vector.broadcast %cst_80 : f32 to vector<8x128xf32>
      %cst_81 = arith.constant 0.000000e+00 : f32
      %168 = vector.broadcast %cst_81 : f32 to vector<8x128xf32>
      %cst_82 = arith.constant 0.000000e+00 : f32
      %169 = vector.broadcast %cst_82 : f32 to vector<8x128xf32>
      %c0_83 = arith.constant 0 : index
      %c0_84 = arith.constant 0 : index
      %c0_85 = arith.constant 0 : index
      %170 = vector.load %arg1[%c0_83, %c0_84, %c0_85] : memref<26x8x128xf32, #tpu.memory_space<vmem>>, vector<1x8x128xf32>
      %171 = vector.shape_cast %170 : vector<1x8x128xf32> to vector<8x128xf32>
      %c9_86 = arith.constant 9 : index
      %c0_87 = arith.constant 0 : index
      %c0_88 = arith.constant 0 : index
      %172 = vector.load %arg1[%c9_86, %c0_87, %c0_88] : memref<26x8x128xf32, #tpu.memory_space<vmem>>, vector<1x8x128xf32>
      %173 = vector.shape_cast %172 : vector<1x8x128xf32> to vector<8x128xf32>
      %174 = arith.subf %171, %arg9 : vector<8x128xf32>
      %175 = arith.subf %173, %arg10 : vector<8x128xf32>
      %176 = arith.mulf %167, %175 : vector<8x128xf32>
      %177 = arith.mulf %168, %174 : vector<8x128xf32>
      %178 = arith.subf %176, %177 : vector<8x128xf32>
      %179 = arith.mulf %174, %174 : vector<8x128xf32>
      %180 = arith.mulf %175, %175 : vector<8x128xf32>
      %181 = arith.addf %179, %180 : vector<8x128xf32>
      %cst_89 = arith.constant 0.000000e+00 : f32
      %182 = vector.broadcast %cst_89 : f32 to vector<8x128xf32>
      %183 = arith.cmpf olt, %178, %182 : vector<8x128xf32>
      %cst_90 = arith.constant 0.000000e+00 : f32
      %184 = vector.broadcast %cst_90 : f32 to vector<8x128xf32>
      %185 = arith.cmpf oeq, %178, %184 : vector<8x128xf32>
      %186 = arith.cmpf ogt, %181, %169 : vector<8x128xf32>
      %187 = arith.andi %185, %186 : vector<8x128xi1>
      %188 = arith.ori %183, %187 : vector<8x128xi1>
      %189 = arith.select %188, %171, %arg9 : vector<8x128xi1>, vector<8x128xf32>
      %190 = arith.select %188, %173, %arg10 : vector<8x128xi1>, vector<8x128xf32>
      %191 = arith.select %188, %174, %167 : vector<8x128xi1>, vector<8x128xf32>
      %192 = arith.select %188, %175, %168 : vector<8x128xi1>, vector<8x128xf32>
      %193 = arith.select %188, %181, %169 : vector<8x128xi1>, vector<8x128xf32>
      %c1 = arith.constant 1 : index
      %c0_91 = arith.constant 0 : index
      %c0_92 = arith.constant 0 : index
      %194 = vector.load %arg1[%c1, %c0_91, %c0_92] : memref<26x8x128xf32, #tpu.memory_space<vmem>>, vector<1x8x128xf32>
      %195 = vector.shape_cast %194 : vector<1x8x128xf32> to vector<8x128xf32>
      %c10_93 = arith.constant 10 : index
      %c0_94 = arith.constant 0 : index
      %c0_95 = arith.constant 0 : index
      %196 = vector.load %arg1[%c10_93, %c0_94, %c0_95] : memref<26x8x128xf32, #tpu.memory_space<vmem>>, vector<1x8x128xf32>
      %197 = vector.shape_cast %196 : vector<1x8x128xf32> to vector<8x128xf32>
      %198 = arith.subf %195, %arg9 : vector<8x128xf32>
      %199 = arith.subf %197, %arg10 : vector<8x128xf32>
      %200 = arith.mulf %191, %199 : vector<8x128xf32>
      %201 = arith.mulf %192, %198 : vector<8x128xf32>
      %202 = arith.subf %200, %201 : vector<8x128xf32>
      %203 = arith.mulf %198, %198 : vector<8x128xf32>
      %204 = arith.mulf %199, %199 : vector<8x128xf32>
      %205 = arith.addf %203, %204 : vector<8x128xf32>
      %cst_96 = arith.constant 0.000000e+00 : f32
      %206 = vector.broadcast %cst_96 : f32 to vector<8x128xf32>
      %207 = arith.cmpf olt, %202, %206 : vector<8x128xf32>
      %cst_97 = arith.constant 0.000000e+00 : f32
      %208 = vector.broadcast %cst_97 : f32 to vector<8x128xf32>
      %209 = arith.cmpf oeq, %202, %208 : vector<8x128xf32>
      %210 = arith.cmpf ogt, %205, %193 : vector<8x128xf32>
      %211 = arith.andi %209, %210 : vector<8x128xi1>
      %212 = arith.ori %207, %211 : vector<8x128xi1>
      %213 = arith.select %212, %195, %189 : vector<8x128xi1>, vector<8x128xf32>
      %214 = arith.select %212, %197, %190 : vector<8x128xi1>, vector<8x128xf32>
      %215 = arith.select %212, %198, %191 : vector<8x128xi1>, vector<8x128xf32>
      %216 = arith.select %212, %199, %192 : vector<8x128xi1>, vector<8x128xf32>
      %217 = arith.select %212, %205, %193 : vector<8x128xi1>, vector<8x128xf32>
      %c2 = arith.constant 2 : index
      %c0_98 = arith.constant 0 : index
      %c0_99 = arith.constant 0 : index
      %218 = vector.load %arg1[%c2, %c0_98, %c0_99] : memref<26x8x128xf32, #tpu.memory_space<vmem>>, vector<1x8x128xf32>
      %219 = vector.shape_cast %218 : vector<1x8x128xf32> to vector<8x128xf32>
      %c11_100 = arith.constant 11 : index
      %c0_101 = arith.constant 0 : index
      %c0_102 = arith.constant 0 : index
      %220 = vector.load %arg1[%c11_100, %c0_101, %c0_102] : memref<26x8x128xf32, #tpu.memory_space<vmem>>, vector<1x8x128xf32>
      %221 = vector.shape_cast %220 : vector<1x8x128xf32> to vector<8x128xf32>
      %222 = arith.subf %219, %arg9 : vector<8x128xf32>
      %223 = arith.subf %221, %arg10 : vector<8x128xf32>
      %224 = arith.mulf %215, %223 : vector<8x128xf32>
      %225 = arith.mulf %216, %222 : vector<8x128xf32>
      %226 = arith.subf %224, %225 : vector<8x128xf32>
      %227 = arith.mulf %222, %222 : vector<8x128xf32>
      %228 = arith.mulf %223, %223 : vector<8x128xf32>
      %229 = arith.addf %227, %228 : vector<8x128xf32>
      %cst_103 = arith.constant 0.000000e+00 : f32
      %230 = vector.broadcast %cst_103 : f32 to vector<8x128xf32>
      %231 = arith.cmpf olt, %226, %230 : vector<8x128xf32>
      %cst_104 = arith.constant 0.000000e+00 : f32
      %232 = vector.broadcast %cst_104 : f32 to vector<8x128xf32>
      %233 = arith.cmpf oeq, %226, %232 : vector<8x128xf32>
      %234 = arith.cmpf ogt, %229, %217 : vector<8x128xf32>
      %235 = arith.andi %233, %234 : vector<8x128xi1>
      %236 = arith.ori %231, %235 : vector<8x128xi1>
      %237 = arith.select %236, %219, %213 : vector<8x128xi1>, vector<8x128xf32>
      %238 = arith.select %236, %221, %214 : vector<8x128xi1>, vector<8x128xf32>
      %239 = arith.select %236, %222, %215 : vector<8x128xi1>, vector<8x128xf32>
      %240 = arith.select %236, %223, %216 : vector<8x128xi1>, vector<8x128xf32>
      %241 = arith.select %236, %229, %217 : vector<8x128xi1>, vector<8x128xf32>
      %c3 = arith.constant 3 : index
      %c0_105 = arith.constant 0 : index
      %c0_106 = arith.constant 0 : index
      %242 = vector.load %arg1[%c3, %c0_105, %c0_106] : memref<26x8x128xf32, #tpu.memory_space<vmem>>, vector<1x8x128xf32>
      %243 = vector.shape_cast %242 : vector<1x8x128xf32> to vector<8x128xf32>
      %c12_107 = arith.constant 12 : index
      %c0_108 = arith.constant 0 : index
      %c0_109 = arith.constant 0 : index
      %244 = vector.load %arg1[%c12_107, %c0_108, %c0_109] : memref<26x8x128xf32, #tpu.memory_space<vmem>>, vector<1x8x128xf32>
      %245 = vector.shape_cast %244 : vector<1x8x128xf32> to vector<8x128xf32>
      %246 = arith.subf %243, %arg9 : vector<8x128xf32>
      %247 = arith.subf %245, %arg10 : vector<8x128xf32>
      %248 = arith.mulf %239, %247 : vector<8x128xf32>
      %249 = arith.mulf %240, %246 : vector<8x128xf32>
      %250 = arith.subf %248, %249 : vector<8x128xf32>
      %251 = arith.mulf %246, %246 : vector<8x128xf32>
      %252 = arith.mulf %247, %247 : vector<8x128xf32>
      %253 = arith.addf %251, %252 : vector<8x128xf32>
      %cst_110 = arith.constant 0.000000e+00 : f32
      %254 = vector.broadcast %cst_110 : f32 to vector<8x128xf32>
      %255 = arith.cmpf olt, %250, %254 : vector<8x128xf32>
      %cst_111 = arith.constant 0.000000e+00 : f32
      %256 = vector.broadcast %cst_111 : f32 to vector<8x128xf32>
      %257 = arith.cmpf oeq, %250, %256 : vector<8x128xf32>
      %258 = arith.cmpf ogt, %253, %241 : vector<8x128xf32>
      %259 = arith.andi %257, %258 : vector<8x128xi1>
      %260 = arith.ori %255, %259 : vector<8x128xi1>
      %261 = arith.select %260, %243, %237 : vector<8x128xi1>, vector<8x128xf32>
      %262 = arith.select %260, %245, %238 : vector<8x128xi1>, vector<8x128xf32>
      %263 = arith.select %260, %246, %239 : vector<8x128xi1>, vector<8x128xf32>
      %264 = arith.select %260, %247, %240 : vector<8x128xi1>, vector<8x128xf32>
      %265 = arith.select %260, %253, %241 : vector<8x128xi1>, vector<8x128xf32>
      %c4 = arith.constant 4 : index
      %c0_112 = arith.constant 0 : index
      %c0_113 = arith.constant 0 : index
      %266 = vector.load %arg1[%c4, %c0_112, %c0_113] : memref<26x8x128xf32, #tpu.memory_space<vmem>>, vector<1x8x128xf32>
      %267 = vector.shape_cast %266 : vector<1x8x128xf32> to vector<8x128xf32>
      %c13 = arith.constant 13 : index
      %c0_114 = arith.constant 0 : index
      %c0_115 = arith.constant 0 : index
      %268 = vector.load %arg1[%c13, %c0_114, %c0_115] : memref<26x8x128xf32, #tpu.memory_space<vmem>>, vector<1x8x128xf32>
      %269 = vector.shape_cast %268 : vector<1x8x128xf32> to vector<8x128xf32>
      %270 = arith.subf %267, %arg9 : vector<8x128xf32>
      %271 = arith.subf %269, %arg10 : vector<8x128xf32>
      %272 = arith.mulf %263, %271 : vector<8x128xf32>
      %273 = arith.mulf %264, %270 : vector<8x128xf32>
      %274 = arith.subf %272, %273 : vector<8x128xf32>
      %275 = arith.mulf %270, %270 : vector<8x128xf32>
      %276 = arith.mulf %271, %271 : vector<8x128xf32>
      %277 = arith.addf %275, %276 : vector<8x128xf32>
      %cst_116 = arith.constant 0.000000e+00 : f32
      %278 = vector.broadcast %cst_116 : f32 to vector<8x128xf32>
      %279 = arith.cmpf olt, %274, %278 : vector<8x128xf32>
      %cst_117 = arith.constant 0.000000e+00 : f32
      %280 = vector.broadcast %cst_117 : f32 to vector<8x128xf32>
      %281 = arith.cmpf oeq, %274, %280 : vector<8x128xf32>
      %282 = arith.cmpf ogt, %277, %265 : vector<8x128xf32>
      %283 = arith.andi %281, %282 : vector<8x128xi1>
      %284 = arith.ori %279, %283 : vector<8x128xi1>
      %285 = arith.select %284, %267, %261 : vector<8x128xi1>, vector<8x128xf32>
      %286 = arith.select %284, %269, %262 : vector<8x128xi1>, vector<8x128xf32>
      %287 = arith.select %284, %270, %263 : vector<8x128xi1>, vector<8x128xf32>
      %288 = arith.select %284, %271, %264 : vector<8x128xi1>, vector<8x128xf32>
      %289 = arith.select %284, %277, %265 : vector<8x128xi1>, vector<8x128xf32>
      %c5 = arith.constant 5 : index
      %c0_118 = arith.constant 0 : index
      %c0_119 = arith.constant 0 : index
      %290 = vector.load %arg1[%c5, %c0_118, %c0_119] : memref<26x8x128xf32, #tpu.memory_space<vmem>>, vector<1x8x128xf32>
      %291 = vector.shape_cast %290 : vector<1x8x128xf32> to vector<8x128xf32>
      %c14 = arith.constant 14 : index
      %c0_120 = arith.constant 0 : index
      %c0_121 = arith.constant 0 : index
      %292 = vector.load %arg1[%c14, %c0_120, %c0_121] : memref<26x8x128xf32, #tpu.memory_space<vmem>>, vector<1x8x128xf32>
      %293 = vector.shape_cast %292 : vector<1x8x128xf32> to vector<8x128xf32>
      %294 = arith.subf %291, %arg9 : vector<8x128xf32>
      %295 = arith.subf %293, %arg10 : vector<8x128xf32>
      %296 = arith.mulf %287, %295 : vector<8x128xf32>
      %297 = arith.mulf %288, %294 : vector<8x128xf32>
      %298 = arith.subf %296, %297 : vector<8x128xf32>
      %299 = arith.mulf %294, %294 : vector<8x128xf32>
      %300 = arith.mulf %295, %295 : vector<8x128xf32>
      %301 = arith.addf %299, %300 : vector<8x128xf32>
      %cst_122 = arith.constant 0.000000e+00 : f32
      %302 = vector.broadcast %cst_122 : f32 to vector<8x128xf32>
      %303 = arith.cmpf olt, %298, %302 : vector<8x128xf32>
      %cst_123 = arith.constant 0.000000e+00 : f32
      %304 = vector.broadcast %cst_123 : f32 to vector<8x128xf32>
      %305 = arith.cmpf oeq, %298, %304 : vector<8x128xf32>
      %306 = arith.cmpf ogt, %301, %289 : vector<8x128xf32>
      %307 = arith.andi %305, %306 : vector<8x128xi1>
      %308 = arith.ori %303, %307 : vector<8x128xi1>
      %309 = arith.select %308, %291, %285 : vector<8x128xi1>, vector<8x128xf32>
      %310 = arith.select %308, %293, %286 : vector<8x128xi1>, vector<8x128xf32>
      %311 = arith.select %308, %294, %287 : vector<8x128xi1>, vector<8x128xf32>
      %312 = arith.select %308, %295, %288 : vector<8x128xi1>, vector<8x128xf32>
      %313 = arith.select %308, %301, %289 : vector<8x128xi1>, vector<8x128xf32>
      %c6 = arith.constant 6 : index
      %c0_124 = arith.constant 0 : index
      %c0_125 = arith.constant 0 : index
      %314 = vector.load %arg1[%c6, %c0_124, %c0_125] : memref<26x8x128xf32, #tpu.memory_space<vmem>>, vector<1x8x128xf32>
      %315 = vector.shape_cast %314 : vector<1x8x128xf32> to vector<8x128xf32>
      %c15 = arith.constant 15 : index
      %c0_126 = arith.constant 0 : index
      %c0_127 = arith.constant 0 : index
      %316 = vector.load %arg1[%c15, %c0_126, %c0_127] : memref<26x8x128xf32, #tpu.memory_space<vmem>>, vector<1x8x128xf32>
      %317 = vector.shape_cast %316 : vector<1x8x128xf32> to vector<8x128xf32>
      %318 = arith.subf %315, %arg9 : vector<8x128xf32>
      %319 = arith.subf %317, %arg10 : vector<8x128xf32>
      %320 = arith.mulf %311, %319 : vector<8x128xf32>
      %321 = arith.mulf %312, %318 : vector<8x128xf32>
      %322 = arith.subf %320, %321 : vector<8x128xf32>
      %323 = arith.mulf %318, %318 : vector<8x128xf32>
      %324 = arith.mulf %319, %319 : vector<8x128xf32>
      %325 = arith.addf %323, %324 : vector<8x128xf32>
      %cst_128 = arith.constant 0.000000e+00 : f32
      %326 = vector.broadcast %cst_128 : f32 to vector<8x128xf32>
      %327 = arith.cmpf olt, %322, %326 : vector<8x128xf32>
      %cst_129 = arith.constant 0.000000e+00 : f32
      %328 = vector.broadcast %cst_129 : f32 to vector<8x128xf32>
      %329 = arith.cmpf oeq, %322, %328 : vector<8x128xf32>
      %330 = arith.cmpf ogt, %325, %313 : vector<8x128xf32>
      %331 = arith.andi %329, %330 : vector<8x128xi1>
      %332 = arith.ori %327, %331 : vector<8x128xi1>
      %333 = arith.select %332, %315, %309 : vector<8x128xi1>, vector<8x128xf32>
      %334 = arith.select %332, %317, %310 : vector<8x128xi1>, vector<8x128xf32>
      %335 = arith.select %332, %318, %311 : vector<8x128xi1>, vector<8x128xf32>
      %336 = arith.select %332, %319, %312 : vector<8x128xi1>, vector<8x128xf32>
      %337 = arith.select %332, %325, %313 : vector<8x128xi1>, vector<8x128xf32>
      %c7 = arith.constant 7 : index
      %c0_130 = arith.constant 0 : index
      %c0_131 = arith.constant 0 : index
      %338 = vector.load %arg1[%c7, %c0_130, %c0_131] : memref<26x8x128xf32, #tpu.memory_space<vmem>>, vector<1x8x128xf32>
      %339 = vector.shape_cast %338 : vector<1x8x128xf32> to vector<8x128xf32>
      %c16 = arith.constant 16 : index
      %c0_132 = arith.constant 0 : index
      %c0_133 = arith.constant 0 : index
      %340 = vector.load %arg1[%c16, %c0_132, %c0_133] : memref<26x8x128xf32, #tpu.memory_space<vmem>>, vector<1x8x128xf32>
      %341 = vector.shape_cast %340 : vector<1x8x128xf32> to vector<8x128xf32>
      %342 = arith.subf %339, %arg9 : vector<8x128xf32>
      %343 = arith.subf %341, %arg10 : vector<8x128xf32>
      %344 = arith.mulf %335, %343 : vector<8x128xf32>
      %345 = arith.mulf %336, %342 : vector<8x128xf32>
      %346 = arith.subf %344, %345 : vector<8x128xf32>
      %347 = arith.mulf %342, %342 : vector<8x128xf32>
      %348 = arith.mulf %343, %343 : vector<8x128xf32>
      %349 = arith.addf %347, %348 : vector<8x128xf32>
      %cst_134 = arith.constant 0.000000e+00 : f32
      %350 = vector.broadcast %cst_134 : f32 to vector<8x128xf32>
      %351 = arith.cmpf olt, %346, %350 : vector<8x128xf32>
      %cst_135 = arith.constant 0.000000e+00 : f32
      %352 = vector.broadcast %cst_135 : f32 to vector<8x128xf32>
      %353 = arith.cmpf oeq, %346, %352 : vector<8x128xf32>
      %354 = arith.cmpf ogt, %349, %337 : vector<8x128xf32>
      %355 = arith.andi %353, %354 : vector<8x128xi1>
      %356 = arith.ori %351, %355 : vector<8x128xi1>
      %357 = arith.select %356, %339, %333 : vector<8x128xi1>, vector<8x128xf32>
      %358 = arith.select %356, %341, %334 : vector<8x128xi1>, vector<8x128xf32>
      %359 = arith.select %356, %342, %335 : vector<8x128xi1>, vector<8x128xf32>
      %360 = arith.select %356, %343, %336 : vector<8x128xi1>, vector<8x128xf32>
      %361 = arith.select %356, %349, %337 : vector<8x128xi1>, vector<8x128xf32>
      %c8 = arith.constant 8 : index
      %c0_136 = arith.constant 0 : index
      %c0_137 = arith.constant 0 : index
      %362 = vector.load %arg1[%c8, %c0_136, %c0_137] : memref<26x8x128xf32, #tpu.memory_space<vmem>>, vector<1x8x128xf32>
      %363 = vector.shape_cast %362 : vector<1x8x128xf32> to vector<8x128xf32>
      %c17 = arith.constant 17 : index
      %c0_138 = arith.constant 0 : index
      %c0_139 = arith.constant 0 : index
      %364 = vector.load %arg1[%c17, %c0_138, %c0_139] : memref<26x8x128xf32, #tpu.memory_space<vmem>>, vector<1x8x128xf32>
      %365 = vector.shape_cast %364 : vector<1x8x128xf32> to vector<8x128xf32>
      %366 = arith.subf %363, %arg9 : vector<8x128xf32>
      %367 = arith.subf %365, %arg10 : vector<8x128xf32>
      %368 = arith.mulf %359, %367 : vector<8x128xf32>
      %369 = arith.mulf %360, %366 : vector<8x128xf32>
      %370 = arith.subf %368, %369 : vector<8x128xf32>
      %371 = arith.mulf %366, %366 : vector<8x128xf32>
      %372 = arith.mulf %367, %367 : vector<8x128xf32>
      %373 = arith.addf %371, %372 : vector<8x128xf32>
      %cst_140 = arith.constant 0.000000e+00 : f32
      %374 = vector.broadcast %cst_140 : f32 to vector<8x128xf32>
      %375 = arith.cmpf olt, %370, %374 : vector<8x128xf32>
      %cst_141 = arith.constant 0.000000e+00 : f32
      %376 = vector.broadcast %cst_141 : f32 to vector<8x128xf32>
      %377 = arith.cmpf oeq, %370, %376 : vector<8x128xf32>
      %378 = arith.cmpf ogt, %373, %361 : vector<8x128xf32>
      %379 = arith.andi %377, %378 : vector<8x128xi1>
      %380 = arith.ori %375, %379 : vector<8x128xi1>
      %381 = arith.select %380, %363, %357 : vector<8x128xi1>, vector<8x128xf32>
      %382 = arith.select %380, %365, %358 : vector<8x128xi1>, vector<8x128xf32>
      %cst_142 = arith.constant 0.000000e+00 : f32
      %383 = vector.broadcast %cst_142 : f32 to vector<8x128xf32>
      %384 = arith.cmpf ogt, %arg11, %383 : vector<8x128xf32>
      %385 = arith.select %384, %381, %5#0 : vector<8x128xi1>, vector<8x128xf32>
      %cst_143 = arith.constant 0.000000e+00 : f32
      %386 = vector.broadcast %cst_143 : f32 to vector<8x128xf32>
      %387 = arith.cmpf ogt, %arg11, %386 : vector<8x128xf32>
      %388 = arith.select %387, %382, %5#1 : vector<8x128xi1>, vector<8x128xf32>
      %c1_i32_144 = arith.constant 1 : i32
      %389 = arith.addi %arg8, %c1_i32_144 : i32
      %390 = arith.index_cast %389 : i32 to index
      %c0_145 = arith.constant 0 : index
      %c0_146 = arith.constant 0 : index
      %391 = vector.load %arg3[%390, %c0_145, %c0_146] : memref<13x8x128xf32, #tpu.memory_space<vmem>>, vector<1x8x128xf32>
      %392 = vector.shape_cast %391 : vector<1x8x128xf32> to vector<8x128xf32>
      %393 = vector.shape_cast %385 : vector<8x128xf32> to vector<1x8x128xf32>
      tpu.vector_store %arg3[%390, %c0_145, %c0_146], %393 {strides = array<i32>} : memref<13x8x128xf32, #tpu.memory_space<vmem>>, vector<1x8x128xf32>,
      %c1_i32_147 = arith.constant 1 : i32
      %394 = arith.addi %arg8, %c1_i32_147 : i32
      %395 = arith.index_cast %394 : i32 to index
      %c0_148 = arith.constant 0 : index
      %c0_149 = arith.constant 0 : index
      %396 = vector.load %arg4[%395, %c0_148, %c0_149] : memref<13x8x128xf32, #tpu.memory_space<vmem>>, vector<1x8x128xf32>
      %397 = vector.shape_cast %396 : vector<1x8x128xf32> to vector<8x128xf32>
      %398 = vector.shape_cast %388 : vector<8x128xf32> to vector<1x8x128xf32>
      tpu.vector_store %arg4[%395, %c0_148, %c0_149], %398 {strides = array<i32>} : memref<13x8x128xf32, #tpu.memory_space<vmem>>, vector<1x8x128xf32>,
      %399 = arith.mulf %arg9, %388 : vector<8x128xf32>
      %400 = arith.mulf %385, %arg10 : vector<8x128xf32>
      %401 = arith.subf %399, %400 : vector<8x128xf32>
      %402 = arith.addf %arg12, %401 : vector<8x128xf32>
      %403 = arith.cmpf oeq, %381, %5#0 : vector<8x128xf32>
      %404 = arith.cmpf oeq, %382, %5#1 : vector<8x128xf32>
      %405 = arith.andi %403, %404 : vector<8x128xi1>
      %cst_150 = arith.constant 0.000000e+00 : f32
      %406 = vector.broadcast %cst_150 : f32 to vector<8x128xf32>
      %407 = arith.select %405, %406, %arg11 : vector<8x128xi1>, vector<8x128xf32>
      scf.yield %385, %388, %407, %402 : vector<8x128xf32>, vector<8x128xf32>, vector<8x128xf32>, vector<8x128xf32>
    }
    %c8_i32_15 = arith.constant 8 : i32
    %16 = arith.mulf %15#0, %5#1 : vector<8x128xf32>
    %17 = arith.mulf %5#0, %15#1 : vector<8x128xf32>
    %18 = arith.subf %16, %17 : vector<8x128xf32>
    %19 = arith.addf %15#3, %18 : vector<8x128xf32>
    %20 = math.absf %19 : vector<8x128xf32>
    %cst_16 = arith.constant 5.000000e-01 : f32
    %21 = vector.broadcast %cst_16 : f32 to vector<8x128xf32>
    %22 = arith.mulf %21, %20 : vector<8x128xf32>
    %c18 = arith.constant 18 : index
    %c0_17 = arith.constant 0 : index
    %c0_18 = arith.constant 0 : index
    %23 = vector.load %arg1[%c18, %c0_17, %c0_18] : memref<26x8x128xf32, #tpu.memory_space<vmem>>, vector<1x8x128xf32>
    %24 = vector.shape_cast %23 : vector<1x8x128xf32> to vector<8x128xf32>
    %c19 = arith.constant 19 : index
    %c0_19 = arith.constant 0 : index
    %c0_20 = arith.constant 0 : index
    %25 = vector.load %arg1[%c19, %c0_19, %c0_20] : memref<26x8x128xf32, #tpu.memory_space<vmem>>, vector<1x8x128xf32>
    %26 = vector.shape_cast %25 : vector<1x8x128xf32> to vector<8x128xf32>
    %c20 = arith.constant 20 : index
    %c0_21 = arith.constant 0 : index
    %c0_22 = arith.constant 0 : index
    %27 = vector.load %arg1[%c20, %c0_21, %c0_22] : memref<26x8x128xf32, #tpu.memory_space<vmem>>, vector<1x8x128xf32>
    %28 = vector.shape_cast %27 : vector<1x8x128xf32> to vector<8x128xf32>
    %c21 = arith.constant 21 : index
    %c0_23 = arith.constant 0 : index
    %c0_24 = arith.constant 0 : index
    %29 = vector.load %arg1[%c21, %c0_23, %c0_24] : memref<26x8x128xf32, #tpu.memory_space<vmem>>, vector<1x8x128xf32>
    %30 = vector.shape_cast %29 : vector<1x8x128xf32> to vector<8x128xf32>
    %c22 = arith.constant 22 : index
    %c0_25 = arith.constant 0 : index
    %c0_26 = arith.constant 0 : index
    %31 = vector.load %arg1[%c22, %c0_25, %c0_26] : memref<26x8x128xf32, #tpu.memory_space<vmem>>, vector<1x8x128xf32>
    %32 = vector.shape_cast %31 : vector<1x8x128xf32> to vector<8x128xf32>
    %c23 = arith.constant 23 : index
    %c0_27 = arith.constant 0 : index
    %c0_28 = arith.constant 0 : index
    %33 = vector.load %arg1[%c23, %c0_27, %c0_28] : memref<26x8x128xf32, #tpu.memory_space<vmem>>, vector<1x8x128xf32>
    %34 = vector.shape_cast %33 : vector<1x8x128xf32> to vector<8x128xf32>
    %c24 = arith.constant 24 : index
    %c0_29 = arith.constant 0 : index
    %c0_30 = arith.constant 0 : index
    %35 = vector.load %arg1[%c24, %c0_29, %c0_30] : memref<26x8x128xf32, #tpu.memory_space<vmem>>, vector<1x8x128xf32>
    %36 = vector.shape_cast %35 : vector<1x8x128xf32> to vector<8x128xf32>
    %c25 = arith.constant 25 : index
    %c0_31 = arith.constant 0 : index
    %c0_32 = arith.constant 0 : index
    %37 = vector.load %arg1[%c25, %c0_31, %c0_32] : memref<26x8x128xf32, #tpu.memory_space<vmem>>, vector<1x8x128xf32>
    %38 = vector.shape_cast %37 : vector<1x8x128xf32> to vector<8x128xf32>
    %39 = arith.mulf %24, %34 : vector<8x128xf32>
    %40 = arith.mulf %26, %32 : vector<8x128xf32>
    %41 = arith.subf %39, %40 : vector<8x128xf32>
    %42 = arith.mulf %26, %36 : vector<8x128xf32>
    %43 = arith.mulf %28, %34 : vector<8x128xf32>
    %44 = arith.subf %42, %43 : vector<8x128xf32>
    %45 = arith.addf %41, %44 : vector<8x128xf32>
    %46 = arith.mulf %28, %38 : vector<8x128xf32>
    %47 = arith.mulf %30, %36 : vector<8x128xf32>
    %48 = arith.subf %46, %47 : vector<8x128xf32>
    %49 = arith.addf %45, %48 : vector<8x128xf32>
    %50 = arith.mulf %30, %32 : vector<8x128xf32>
    %51 = arith.mulf %24, %38 : vector<8x128xf32>
    %52 = arith.subf %50, %51 : vector<8x128xf32>
    %53 = arith.addf %49, %52 : vector<8x128xf32>
    %54 = math.absf %53 : vector<8x128xf32>
    %cst_33 = arith.constant 5.000000e-01 : f32
    %55 = vector.broadcast %cst_33 : f32 to vector<8x128xf32>
    %56 = arith.mulf %55, %54 : vector<8x128xf32>
    %cst_34 = arith.constant 0.000000e+00 : f32
    %57 = vector.broadcast %cst_34 : f32 to vector<8x128xf32>
    %58 = arith.cmpf olt, %53, %57 : vector<8x128xf32>
    %59 = arith.select %58, %30, %26 : vector<8x128xi1>, vector<8x128xf32>
    %60 = arith.select %58, %26, %30 : vector<8x128xi1>, vector<8x128xf32>
    %61 = arith.select %58, %38, %34 : vector<8x128xi1>, vector<8x128xf32>
    %62 = arith.select %58, %34, %38 : vector<8x128xi1>, vector<8x128xf32>
    %c9_35 = arith.constant 9 : index
    %c0_36 = arith.constant 0 : index
    %c0_37 = arith.constant 0 : index
    %63 = vector.load %arg3[%c9_35, %c0_36, %c0_37] : memref<13x8x128xf32, #tpu.memory_space<vmem>>, vector<1x8x128xf32>
    %64 = vector.shape_cast %63 : vector<1x8x128xf32> to vector<8x128xf32>
    %65 = vector.shape_cast %24 : vector<8x128xf32> to vector<1x8x128xf32>
    tpu.vector_store %arg3[%c9_35, %c0_36, %c0_37], %65 {strides = array<i32>} : memref<13x8x128xf32, #tpu.memory_space<vmem>>, vector<1x8x128xf32>,
    %c9_38 = arith.constant 9 : index
    %c0_39 = arith.constant 0 : index
    %c0_40 = arith.constant 0 : index
    %66 = vector.load %arg4[%c9_38, %c0_39, %c0_40] : memref<13x8x128xf32, #tpu.memory_space<vmem>>, vector<1x8x128xf32>
    %67 = vector.shape_cast %66 : vector<1x8x128xf32> to vector<8x128xf32>
    %68 = vector.shape_cast %32 : vector<8x128xf32> to vector<1x8x128xf32>
    tpu.vector_store %arg4[%c9_38, %c0_39, %c0_40], %68 {strides = array<i32>} : memref<13x8x128xf32, #tpu.memory_space<vmem>>, vector<1x8x128xf32>,
    %c10 = arith.constant 10 : index
    %c0_41 = arith.constant 0 : index
    %c0_42 = arith.constant 0 : index
    %69 = vector.load %arg3[%c10, %c0_41, %c0_42] : memref<13x8x128xf32, #tpu.memory_space<vmem>>, vector<1x8x128xf32>
    %70 = vector.shape_cast %69 : vector<1x8x128xf32> to vector<8x128xf32>
    %71 = vector.shape_cast %59 : vector<8x128xf32> to vector<1x8x128xf32>
    tpu.vector_store %arg3[%c10, %c0_41, %c0_42], %71 {strides = array<i32>} : memref<13x8x128xf32, #tpu.memory_space<vmem>>, vector<1x8x128xf32>,
    %c10_43 = arith.constant 10 : index
    %c0_44 = arith.constant 0 : index
    %c0_45 = arith.constant 0 : index
    %72 = vector.load %arg4[%c10_43, %c0_44, %c0_45] : memref<13x8x128xf32, #tpu.memory_space<vmem>>, vector<1x8x128xf32>
    %73 = vector.shape_cast %72 : vector<1x8x128xf32> to vector<8x128xf32>
    %74 = vector.shape_cast %61 : vector<8x128xf32> to vector<1x8x128xf32>
    tpu.vector_store %arg4[%c10_43, %c0_44, %c0_45], %74 {strides = array<i32>} : memref<13x8x128xf32, #tpu.memory_space<vmem>>, vector<1x8x128xf32>,
    %c11 = arith.constant 11 : index
    %c0_46 = arith.constant 0 : index
    %c0_47 = arith.constant 0 : index
    %75 = vector.load %arg3[%c11, %c0_46, %c0_47] : memref<13x8x128xf32, #tpu.memory_space<vmem>>, vector<1x8x128xf32>
    %76 = vector.shape_cast %75 : vector<1x8x128xf32> to vector<8x128xf32>
    %77 = vector.shape_cast %28 : vector<8x128xf32> to vector<1x8x128xf32>
    tpu.vector_store %arg3[%c11, %c0_46, %c0_47], %77 {strides = array<i32>} : memref<13x8x128xf32, #tpu.memory_space<vmem>>, vector<1x8x128xf32>,
    %c11_48 = arith.constant 11 : index
    %c0_49 = arith.constant 0 : index
    %c0_50 = arith.constant 0 : index
    %78 = vector.load %arg4[%c11_48, %c0_49, %c0_50] : memref<13x8x128xf32, #tpu.memory_space<vmem>>, vector<1x8x128xf32>
    %79 = vector.shape_cast %78 : vector<1x8x128xf32> to vector<8x128xf32>
    %80 = vector.shape_cast %36 : vector<8x128xf32> to vector<1x8x128xf32>
    tpu.vector_store %arg4[%c11_48, %c0_49, %c0_50], %80 {strides = array<i32>} : memref<13x8x128xf32, #tpu.memory_space<vmem>>, vector<1x8x128xf32>,
    %c12 = arith.constant 12 : index
    %c0_51 = arith.constant 0 : index
    %c0_52 = arith.constant 0 : index
    %81 = vector.load %arg3[%c12, %c0_51, %c0_52] : memref<13x8x128xf32, #tpu.memory_space<vmem>>, vector<1x8x128xf32>
    %82 = vector.shape_cast %81 : vector<1x8x128xf32> to vector<8x128xf32>
    %83 = vector.shape_cast %60 : vector<8x128xf32> to vector<1x8x128xf32>
    tpu.vector_store %arg3[%c12, %c0_51, %c0_52], %83 {strides = array<i32>} : memref<13x8x128xf32, #tpu.memory_space<vmem>>, vector<1x8x128xf32>,
    %c12_53 = arith.constant 12 : index
    %c0_54 = arith.constant 0 : index
    %c0_55 = arith.constant 0 : index
    %84 = vector.load %arg4[%c12_53, %c0_54, %c0_55] : memref<13x8x128xf32, #tpu.memory_space<vmem>>, vector<1x8x128xf32>
    %85 = vector.shape_cast %84 : vector<1x8x128xf32> to vector<8x128xf32>
    %86 = vector.shape_cast %62 : vector<8x128xf32> to vector<1x8x128xf32>
    tpu.vector_store %arg4[%c12_53, %c0_54, %c0_55], %86 {strides = array<i32>} : memref<13x8x128xf32, #tpu.memory_space<vmem>>, vector<1x8x128xf32>,
    %87 = arith.subf %59, %24 : vector<8x128xf32>
    %88 = arith.subf %61, %32 : vector<8x128xf32>
    %89 = arith.mulf %87, %32 : vector<8x128xf32>
    %90 = arith.mulf %88, %24 : vector<8x128xf32>
    %91 = arith.subf %89, %90 : vector<8x128xf32>
    %92 = arith.subf %28, %59 : vector<8x128xf32>
    %93 = arith.subf %36, %61 : vector<8x128xf32>
    %94 = arith.mulf %92, %61 : vector<8x128xf32>
    %95 = arith.mulf %93, %59 : vector<8x128xf32>
    %96 = arith.subf %94, %95 : vector<8x128xf32>
    %97 = arith.subf %60, %28 : vector<8x128xf32>
    %98 = arith.subf %62, %36 : vector<8x128xf32>
    %99 = arith.mulf %97, %36 : vector<8x128xf32>
    %100 = arith.mulf %98, %28 : vector<8x128xf32>
    %101 = arith.subf %99, %100 : vector<8x128xf32>
    %102 = arith.subf %24, %60 : vector<8x128xf32>
    %103 = arith.subf %32, %62 : vector<8x128xf32>
    %104 = arith.mulf %102, %62 : vector<8x128xf32>
    %105 = arith.mulf %103, %60 : vector<8x128xf32>
    %106 = arith.subf %104, %105 : vector<8x128xf32>
    %cst_56 = arith.constant 0.000000e+00 : f32
    %107 = vector.broadcast %cst_56 : f32 to vector<8x128xf32>
    %c0_i32_57 = arith.constant 0 : i32
    %c9_i32 = arith.constant 9 : i32
    %108 = arith.addi %c0_i32_57, %c9_i32 : i32
    %c1_i32_58 = arith.constant 1 : i32
    %109 = scf.for %arg8 = %c0_i32_57 to %108 step %c1_i32_58 iter_args(%arg9 = %107) -> (vector<8x128xf32>)  : i32 {
      %c8_i32_80 = arith.constant 8 : i32
      %167 = arith.cmpi eq, %arg8, %c8_i32_80 : i32
      %c1_i32_81 = arith.constant 1 : i32
      %168 = arith.addi %arg8, %c1_i32_81 : i32
      %c0_i32_82 = arith.constant 0 : i32
      %169 = arith.select %167, %c0_i32_82, %168 : i32
      %170 = arith.index_cast %arg8 : i32 to index
      %c0_83 = arith.constant 0 : index
      %c0_84 = arith.constant 0 : index
      %171 = vector.load %arg3[%170, %c0_83, %c0_84] : memref<13x8x128xf32, #tpu.memory_space<vmem>>, vector<1x8x128xf32>
      %172 = vector.shape_cast %171 : vector<1x8x128xf32> to vector<8x128xf32>
      %173 = arith.index_cast %arg8 : i32 to index
      %c0_85 = arith.constant 0 : index
      %c0_86 = arith.constant 0 : index
      %174 = vector.load %arg4[%173, %c0_85, %c0_86] : memref<13x8x128xf32, #tpu.memory_space<vmem>>, vector<1x8x128xf32>
      %175 = vector.shape_cast %174 : vector<1x8x128xf32> to vector<8x128xf32>
      %176 = arith.index_cast %169 : i32 to index
      %c0_87 = arith.constant 0 : index
      %c0_88 = arith.constant 0 : index
      %177 = vector.load %arg3[%176, %c0_87, %c0_88] : memref<13x8x128xf32, #tpu.memory_space<vmem>>, vector<1x8x128xf32>
      %178 = vector.shape_cast %177 : vector<1x8x128xf32> to vector<8x128xf32>
      %179 = arith.index_cast %169 : i32 to index
      %c0_89 = arith.constant 0 : index
      %c0_90 = arith.constant 0 : index
      %180 = vector.load %arg4[%179, %c0_89, %c0_90] : memref<13x8x128xf32, #tpu.memory_space<vmem>>, vector<1x8x128xf32>
      %181 = vector.shape_cast %180 : vector<1x8x128xf32> to vector<8x128xf32>
      %cst_91 = arith.constant 0.000000e+00 : f32
      %182 = vector.broadcast %cst_91 : f32 to vector<8x128xf32>
      %cst_92 = arith.constant 1.000000e+00 : f32
      %183 = vector.broadcast %cst_92 : f32 to vector<8x128xf32>
      %184 = arith.cmpf oge, %172, %172 : vector<8x128xf32>
      %185 = arith.mulf %87, %175 : vector<8x128xf32>
      %186 = arith.mulf %88, %172 : vector<8x128xf32>
      %187 = arith.subf %185, %186 : vector<8x128xf32>
      %188 = arith.subf %187, %91 : vector<8x128xf32>
      %189 = arith.mulf %87, %181 : vector<8x128xf32>
      %190 = arith.mulf %88, %178 : vector<8x128xf32>
      %191 = arith.subf %189, %190 : vector<8x128xf32>
      %192 = arith.subf %191, %91 : vector<8x128xf32>
      %cst_93 = arith.constant 0.000000e+00 : f32
      %193 = vector.broadcast %cst_93 : f32 to vector<8x128xf32>
      %194 = arith.cmpf oge, %188, %193 : vector<8x128xf32>
      %cst_94 = arith.constant 0.000000e+00 : f32
      %195 = vector.broadcast %cst_94 : f32 to vector<8x128xf32>
      %196 = arith.cmpf oge, %192, %195 : vector<8x128xf32>
      %197 = arith.subf %188, %192 : vector<8x128xf32>
      %198 = tpu.reciprocal %197 {approx = true} : vector<8x128xf32> -> vector<8x128xf32>
      %199 = arith.mulf %188, %198 : vector<8x128xf32>
      %cst_95 = arith.constant dense<true> : vector<8x128xi1>
      %200 = arith.xori %194, %cst_95 : vector<8x128xi1>
      %201 = arith.andi %196, %200 : vector<8x128xi1>
      %202 = arith.maximumf %182, %199 : vector<8x128xf32>
      %203 = arith.select %201, %202, %182 : vector<8x128xi1>, vector<8x128xf32>
      %cst_96 = arith.constant dense<true> : vector<8x128xi1>
      %204 = arith.xori %196, %cst_96 : vector<8x128xi1>
      %205 = arith.andi %194, %204 : vector<8x128xi1>
      %206 = arith.minimumf %183, %199 : vector<8x128xf32>
      %207 = arith.select %205, %206, %183 : vector<8x128xi1>, vector<8x128xf32>
      %208 = arith.ori %194, %196 : vector<8x128xi1>
      %209 = arith.andi %184, %208 : vector<8x128xi1>
      %210 = arith.mulf %92, %175 : vector<8x128xf32>
      %211 = arith.mulf %93, %172 : vector<8x128xf32>
      %212 = arith.subf %210, %211 : vector<8x128xf32>
      %213 = arith.subf %212, %96 : vector<8x128xf32>
      %214 = arith.mulf %92, %181 : vector<8x128xf32>
      %215 = arith.mulf %93, %178 : vector<8x128xf32>
      %216 = arith.subf %214, %215 : vector<8x128xf32>
      %217 = arith.subf %216, %96 : vector<8x128xf32>
      %cst_97 = arith.constant 0.000000e+00 : f32
      %218 = vector.broadcast %cst_97 : f32 to vector<8x128xf32>
      %219 = arith.cmpf oge, %213, %218 : vector<8x128xf32>
      %cst_98 = arith.constant 0.000000e+00 : f32
      %220 = vector.broadcast %cst_98 : f32 to vector<8x128xf32>
      %221 = arith.cmpf oge, %217, %220 : vector<8x128xf32>
      %222 = arith.subf %213, %217 : vector<8x128xf32>
      %223 = tpu.reciprocal %222 {approx = true} : vector<8x128xf32> -> vector<8x128xf32>
      %224 = arith.mulf %213, %223 : vector<8x128xf32>
      %cst_99 = arith.constant dense<true> : vector<8x128xi1>
      %225 = arith.xori %219, %cst_99 : vector<8x128xi1>
      %226 = arith.andi %221, %225 : vector<8x128xi1>
      %227 = arith.maximumf %203, %224 : vector<8x128xf32>
      %228 = arith.select %226, %227, %203 : vector<8x128xi1>, vector<8x128xf32>
      %cst_100 = arith.constant dense<true> : vector<8x128xi1>
      %229 = arith.xori %221, %cst_100 : vector<8x128xi1>
      %230 = arith.andi %219, %229 : vector<8x128xi1>
      %231 = arith.minimumf %207, %224 : vector<8x128xf32>
      %232 = arith.select %230, %231, %207 : vector<8x128xi1>, vector<8x128xf32>
      %233 = arith.ori %219, %221 : vector<8x128xi1>
      %234 = arith.andi %209, %233 : vector<8x128xi1>
      %235 = arith.mulf %97, %175 : vector<8x128xf32>
      %236 = arith.mulf %98, %172 : vector<8x128xf32>
      %237 = arith.subf %235, %236 : vector<8x128xf32>
      %238 = arith.subf %237, %101 : vector<8x128xf32>
      %239 = arith.mulf %97, %181 : vector<8x128xf32>
      %240 = arith.mulf %98, %178 : vector<8x128xf32>
      %241 = arith.subf %239, %240 : vector<8x128xf32>
      %242 = arith.subf %241, %101 : vector<8x128xf32>
      %cst_101 = arith.constant 0.000000e+00 : f32
      %243 = vector.broadcast %cst_101 : f32 to vector<8x128xf32>
      %244 = arith.cmpf oge, %238, %243 : vector<8x128xf32>
      %cst_102 = arith.constant 0.000000e+00 : f32
      %245 = vector.broadcast %cst_102 : f32 to vector<8x128xf32>
      %246 = arith.cmpf oge, %242, %245 : vector<8x128xf32>
      %247 = arith.subf %238, %242 : vector<8x128xf32>
      %248 = tpu.reciprocal %247 {approx = true} : vector<8x128xf32> -> vector<8x128xf32>
      %249 = arith.mulf %238, %248 : vector<8x128xf32>
      %cst_103 = arith.constant dense<true> : vector<8x128xi1>
      %250 = arith.xori %244, %cst_103 : vector<8x128xi1>
      %251 = arith.andi %246, %250 : vector<8x128xi1>
      %252 = arith.maximumf %228, %249 : vector<8x128xf32>
      %253 = arith.select %251, %252, %228 : vector<8x128xi1>, vector<8x128xf32>
      %cst_104 = arith.constant dense<true> : vector<8x128xi1>
      %254 = arith.xori %246, %cst_104 : vector<8x128xi1>
      %255 = arith.andi %244, %254 : vector<8x128xi1>
      %256 = arith.minimumf %232, %249 : vector<8x128xf32>
      %257 = arith.select %255, %256, %232 : vector<8x128xi1>, vector<8x128xf32>
      %258 = arith.ori %244, %246 : vector<8x128xi1>
      %259 = arith.andi %234, %258 : vector<8x128xi1>
      %260 = arith.mulf %102, %175 : vector<8x128xf32>
      %261 = arith.mulf %103, %172 : vector<8x128xf32>
      %262 = arith.subf %260, %261 : vector<8x128xf32>
      %263 = arith.subf %262, %106 : vector<8x128xf32>
      %264 = arith.mulf %102, %181 : vector<8x128xf32>
      %265 = arith.mulf %103, %178 : vector<8x128xf32>
      %266 = arith.subf %264, %265 : vector<8x128xf32>
      %267 = arith.subf %266, %106 : vector<8x128xf32>
      %cst_105 = arith.constant 0.000000e+00 : f32
      %268 = vector.broadcast %cst_105 : f32 to vector<8x128xf32>
      %269 = arith.cmpf oge, %263, %268 : vector<8x128xf32>
      %cst_106 = arith.constant 0.000000e+00 : f32
      %270 = vector.broadcast %cst_106 : f32 to vector<8x128xf32>
      %271 = arith.cmpf oge, %267, %270 : vector<8x128xf32>
      %272 = arith.subf %263, %267 : vector<8x128xf32>
      %273 = tpu.reciprocal %272 {approx = true} : vector<8x128xf32> -> vector<8x128xf32>
      %274 = arith.mulf %263, %273 : vector<8x128xf32>
      %cst_107 = arith.constant dense<true> : vector<8x128xi1>
      %275 = arith.xori %269, %cst_107 : vector<8x128xi1>
      %276 = arith.andi %271, %275 : vector<8x128xi1>
      %277 = arith.maximumf %253, %274 : vector<8x128xf32>
      %278 = arith.select %276, %277, %253 : vector<8x128xi1>, vector<8x128xf32>
      %cst_108 = arith.constant dense<true> : vector<8x128xi1>
      %279 = arith.xori %271, %cst_108 : vector<8x128xi1>
      %280 = arith.andi %269, %279 : vector<8x128xi1>
      %281 = arith.minimumf %257, %274 : vector<8x128xf32>
      %282 = arith.select %280, %281, %257 : vector<8x128xi1>, vector<8x128xf32>
      %283 = arith.ori %269, %271 : vector<8x128xi1>
      %284 = arith.andi %259, %283 : vector<8x128xi1>
      %285 = arith.cmpf ole, %278, %282 : vector<8x128xf32>
      %286 = arith.andi %284, %285 : vector<8x128xi1>
      %287 = arith.subf %178, %172 : vector<8x128xf32>
      %288 = arith.subf %181, %175 : vector<8x128xf32>
      %289 = arith.mulf %278, %287 : vector<8x128xf32>
      %290 = arith.addf %172, %289 : vector<8x128xf32>
      %291 = arith.mulf %278, %288 : vector<8x128xf32>
      %292 = arith.addf %175, %291 : vector<8x128xf32>
      %293 = arith.mulf %282, %287 : vector<8x128xf32>
      %294 = arith.addf %172, %293 : vector<8x128xf32>
      %295 = arith.mulf %282, %288 : vector<8x128xf32>
      %296 = arith.addf %175, %295 : vector<8x128xf32>
      %297 = arith.mulf %290, %296 : vector<8x128xf32>
      %298 = arith.mulf %294, %292 : vector<8x128xf32>
      %299 = arith.subf %297, %298 : vector<8x128xf32>
      %cst_109 = arith.constant 0.000000e+00 : f32
      %300 = vector.broadcast %cst_109 : f32 to vector<8x128xf32>
      %301 = arith.select %286, %299, %300 : vector<8x128xi1>, vector<8x128xf32>
      %302 = arith.addf %arg9, %301 : vector<8x128xf32>
      scf.yield %302 : vector<8x128xf32>
    }
    %c9_i32_59 = arith.constant 9 : i32
    %c0_i32_60 = arith.constant 0 : i32
    %c9_i32_61 = arith.constant 9 : i32
    %110 = arith.addi %c0_i32_60, %c9_i32_61 : i32
    %c1_i32_62 = arith.constant 1 : i32
    scf.for %arg8 = %c0_i32_60 to %110 step %c1_i32_62  : i32 {
      %c8_i32_80 = arith.constant 8 : i32
      %167 = arith.cmpi eq, %arg8, %c8_i32_80 : i32
      %c1_i32_81 = arith.constant 1 : i32
      %168 = arith.addi %arg8, %c1_i32_81 : i32
      %c0_i32_82 = arith.constant 0 : i32
      %169 = arith.select %167, %c0_i32_82, %168 : i32
      %170 = arith.index_cast %arg8 : i32 to index
      %c0_83 = arith.constant 0 : index
      %c0_84 = arith.constant 0 : index
      %171 = vector.load %arg3[%170, %c0_83, %c0_84] : memref<13x8x128xf32, #tpu.memory_space<vmem>>, vector<1x8x128xf32>
      %172 = vector.shape_cast %171 : vector<1x8x128xf32> to vector<8x128xf32>
      %173 = arith.index_cast %arg8 : i32 to index
      %c0_85 = arith.constant 0 : index
      %c0_86 = arith.constant 0 : index
      %174 = vector.load %arg4[%173, %c0_85, %c0_86] : memref<13x8x128xf32, #tpu.memory_space<vmem>>, vector<1x8x128xf32>
      %175 = vector.shape_cast %174 : vector<1x8x128xf32> to vector<8x128xf32>
      %176 = arith.index_cast %169 : i32 to index
      %c0_87 = arith.constant 0 : index
      %c0_88 = arith.constant 0 : index
      %177 = vector.load %arg3[%176, %c0_87, %c0_88] : memref<13x8x128xf32, #tpu.memory_space<vmem>>, vector<1x8x128xf32>
      %178 = vector.shape_cast %177 : vector<1x8x128xf32> to vector<8x128xf32>
      %179 = arith.subf %178, %172 : vector<8x128xf32>
      %180 = arith.index_cast %169 : i32 to index
      %c0_89 = arith.constant 0 : index
      %c0_90 = arith.constant 0 : index
      %181 = vector.load %arg4[%180, %c0_89, %c0_90] : memref<13x8x128xf32, #tpu.memory_space<vmem>>, vector<1x8x128xf32>
      %182 = vector.shape_cast %181 : vector<1x8x128xf32> to vector<8x128xf32>
      %183 = arith.subf %182, %175 : vector<8x128xf32>
      %cst_91 = arith.constant 0.000000e+00 : f32
      %184 = vector.broadcast %cst_91 : f32 to vector<8x128xf32>
      %185 = arith.cmpf oeq, %179, %184 : vector<8x128xf32>
      %cst_92 = arith.constant 0.000000e+00 : f32
      %186 = vector.broadcast %cst_92 : f32 to vector<8x128xf32>
      %187 = arith.cmpf oeq, %183, %186 : vector<8x128xf32>
      %188 = arith.andi %185, %187 : vector<8x128xi1>
      %189 = arith.index_cast %arg8 : i32 to index
      %c0_93 = arith.constant 0 : index
      %c0_94 = arith.constant 0 : index
      %190 = vector.load %arg5[%189, %c0_93, %c0_94] : memref<9x8x128xf32, #tpu.memory_space<vmem>>, vector<1x8x128xf32>
      %191 = vector.shape_cast %190 : vector<1x8x128xf32> to vector<8x128xf32>
      %192 = vector.shape_cast %179 : vector<8x128xf32> to vector<1x8x128xf32>
      tpu.vector_store %arg5[%189, %c0_93, %c0_94], %192 {strides = array<i32>} : memref<9x8x128xf32, #tpu.memory_space<vmem>>, vector<1x8x128xf32>,
      %193 = arith.index_cast %arg8 : i32 to index
      %c0_95 = arith.constant 0 : index
      %c0_96 = arith.constant 0 : index
      %194 = vector.load %arg6[%193, %c0_95, %c0_96] : memref<9x8x128xf32, #tpu.memory_space<vmem>>, vector<1x8x128xf32>
      %195 = vector.shape_cast %194 : vector<1x8x128xf32> to vector<8x128xf32>
      %196 = vector.shape_cast %183 : vector<8x128xf32> to vector<1x8x128xf32>
      tpu.vector_store %arg6[%193, %c0_95, %c0_96], %196 {strides = array<i32>} : memref<9x8x128xf32, #tpu.memory_space<vmem>>, vector<1x8x128xf32>,
      %197 = arith.mulf %179, %175 : vector<8x128xf32>
      %198 = arith.mulf %183, %172 : vector<8x128xf32>
      %199 = arith.subf %197, %198 : vector<8x128xf32>
      %cst_97 = arith.constant 1.000000e+00 : f32
      %cst_98 = arith.constant 0.000000e+00 : f32
      %200 = vector.broadcast %cst_97 : f32 to vector<8x128xf32>
      %201 = vector.broadcast %cst_98 : f32 to vector<8x128xf32>
      %202 = arith.select %188, %200, %201 : vector<8x128xi1>, vector<8x128xf32>
      %203 = arith.subf %199, %202 : vector<8x128xf32>
      %204 = arith.index_cast %arg8 : i32 to index
      %c0_99 = arith.constant 0 : index
      %c0_100 = arith.constant 0 : index
      %205 = vector.load %arg7[%204, %c0_99, %c0_100] : memref<9x8x128xf32, #tpu.memory_space<vmem>>, vector<1x8x128xf32>
      %206 = vector.shape_cast %205 : vector<1x8x128xf32> to vector<8x128xf32>
      %207 = vector.shape_cast %203 : vector<8x128xf32> to vector<1x8x128xf32>
      tpu.vector_store %arg7[%204, %c0_99, %c0_100], %207 {strides = array<i32>} : memref<9x8x128xf32, #tpu.memory_space<vmem>>, vector<1x8x128xf32>,
    }
    %c9_i32_63 = arith.constant 9 : i32
    %c0_i32_64 = arith.constant 0 : i32
    %c4_i32 = arith.constant 4 : i32
    %111 = arith.addi %c0_i32_64, %c4_i32 : i32
    %c1_i32_65 = arith.constant 1 : i32
    %112 = scf.for %arg8 = %c0_i32_64 to %111 step %c1_i32_65 iter_args(%arg9 = %109) -> (vector<8x128xf32>)  : i32 {
      %c9_i32_80 = arith.constant 9 : i32
      %167 = arith.addi %c9_i32_80, %arg8 : i32
      %c3_i32 = arith.constant 3 : i32
      %168 = arith.cmpi eq, %arg8, %c3_i32 : i32
      %c1_i32_81 = arith.constant 1 : i32
      %169 = arith.addi %167, %c1_i32_81 : i32
      %c9_i32_82 = arith.constant 9 : i32
      %170 = arith.select %168, %c9_i32_82, %169 : i32
      %171 = arith.index_cast %167 : i32 to index
      %c0_83 = arith.constant 0 : index
      %c0_84 = arith.constant 0 : index
      %172 = vector.load %arg3[%171, %c0_83, %c0_84] : memref<13x8x128xf32, #tpu.memory_space<vmem>>, vector<1x8x128xf32>
      %173 = vector.shape_cast %172 : vector<1x8x128xf32> to vector<8x128xf32>
      %174 = arith.index_cast %167 : i32 to index
      %c0_85 = arith.constant 0 : index
      %c0_86 = arith.constant 0 : index
      %175 = vector.load %arg4[%174, %c0_85, %c0_86] : memref<13x8x128xf32, #tpu.memory_space<vmem>>, vector<1x8x128xf32>
      %176 = vector.shape_cast %175 : vector<1x8x128xf32> to vector<8x128xf32>
      %177 = arith.index_cast %170 : i32 to index
      %c0_87 = arith.constant 0 : index
      %c0_88 = arith.constant 0 : index
      %178 = vector.load %arg3[%177, %c0_87, %c0_88] : memref<13x8x128xf32, #tpu.memory_space<vmem>>, vector<1x8x128xf32>
      %179 = vector.shape_cast %178 : vector<1x8x128xf32> to vector<8x128xf32>
      %180 = arith.index_cast %170 : i32 to index
      %c0_89 = arith.constant 0 : index
      %c0_90 = arith.constant 0 : index
      %181 = vector.load %arg4[%180, %c0_89, %c0_90] : memref<13x8x128xf32, #tpu.memory_space<vmem>>, vector<1x8x128xf32>
      %182 = vector.shape_cast %181 : vector<1x8x128xf32> to vector<8x128xf32>
      %cst_91 = arith.constant 0.000000e+00 : f32
      %183 = vector.broadcast %cst_91 : f32 to vector<8x128xf32>
      %cst_92 = arith.constant 1.000000e+00 : f32
      %184 = vector.broadcast %cst_92 : f32 to vector<8x128xf32>
      %cst_93 = arith.constant 1.000000e+00 : f32
      %185 = vector.broadcast %cst_93 : f32 to vector<8x128xf32>
      %c0_i32_94 = arith.constant 0 : i32
      %c9_i32_95 = arith.constant 9 : i32
      %186 = arith.addi %c0_i32_94, %c9_i32_95 : i32
      %c1_i32_96 = arith.constant 1 : i32
      %187:3 = scf.for %arg10 = %c0_i32_94 to %186 step %c1_i32_96 iter_args(%arg11 = %183, %arg12 = %184, %arg13 = %185) -> (vector<8x128xf32>, vector<8x128xf32>, vector<8x128xf32>)  : i32 {
        %208 = arith.index_cast %arg10 : i32 to index
        %c0_100 = arith.constant 0 : index
        %c0_101 = arith.constant 0 : index
        %209 = vector.load %arg5[%208, %c0_100, %c0_101] : memref<9x8x128xf32, #tpu.memory_space<vmem>>, vector<1x8x128xf32>
        %210 = vector.shape_cast %209 : vector<1x8x128xf32> to vector<8x128xf32>
        %211 = arith.index_cast %arg10 : i32 to index
        %c0_102 = arith.constant 0 : index
        %c0_103 = arith.constant 0 : index
        %212 = vector.load %arg6[%211, %c0_102, %c0_103] : memref<9x8x128xf32, #tpu.memory_space<vmem>>, vector<1x8x128xf32>
        %213 = vector.shape_cast %212 : vector<1x8x128xf32> to vector<8x128xf32>
        %214 = arith.index_cast %arg10 : i32 to index
        %c0_104 = arith.constant 0 : index
        %c0_105 = arith.constant 0 : index
        %215 = vector.load %arg7[%214, %c0_104, %c0_105] : memref<9x8x128xf32, #tpu.memory_space<vmem>>, vector<1x8x128xf32>
        %216 = vector.shape_cast %215 : vector<1x8x128xf32> to vector<8x128xf32>
        %217 = arith.mulf %210, %176 : vector<8x128xf32>
        %218 = arith.mulf %213, %173 : vector<8x128xf32>
        %219 = arith.subf %217, %218 : vector<8x128xf32>
        %220 = arith.subf %219, %216 : vector<8x128xf32>
        %221 = arith.mulf %210, %182 : vector<8x128xf32>
        %222 = arith.mulf %213, %179 : vector<8x128xf32>
        %223 = arith.subf %221, %222 : vector<8x128xf32>
        %224 = arith.subf %223, %216 : vector<8x128xf32>
        %cst_106 = arith.constant 0.000000e+00 : f32
        %225 = vector.broadcast %cst_106 : f32 to vector<8x128xf32>
        %226 = arith.cmpf ogt, %220, %225 : vector<8x128xf32>
        %cst_107 = arith.constant 0.000000e+00 : f32
        %227 = vector.broadcast %cst_107 : f32 to vector<8x128xf32>
        %228 = arith.cmpf ogt, %224, %227 : vector<8x128xf32>
        %229 = arith.subf %220, %224 : vector<8x128xf32>
        %230 = tpu.reciprocal %229 {approx = true} : vector<8x128xf32> -> vector<8x128xf32>
        %231 = arith.mulf %220, %230 : vector<8x128xf32>
        %cst_108 = arith.constant dense<true> : vector<8x128xi1>
        %232 = arith.xori %226, %cst_108 : vector<8x128xi1>
        %233 = arith.andi %228, %232 : vector<8x128xi1>
        %234 = arith.maximumf %arg11, %231 : vector<8x128xf32>
        %235 = arith.select %233, %234, %arg11 : vector<8x128xi1>, vector<8x128xf32>
        %cst_109 = arith.constant dense<true> : vector<8x128xi1>
        %236 = arith.xori %228, %cst_109 : vector<8x128xi1>
        %237 = arith.andi %226, %236 : vector<8x128xi1>
        %238 = arith.minimumf %arg12, %231 : vector<8x128xf32>
        %239 = arith.select %237, %238, %arg12 : vector<8x128xi1>, vector<8x128xf32>
        %240 = arith.ori %226, %228 : vector<8x128xi1>
        %cst_110 = arith.constant 0.000000e+00 : f32
        %241 = vector.broadcast %cst_110 : f32 to vector<8x128xf32>
        %242 = arith.select %240, %arg13, %241 : vector<8x128xi1>, vector<8x128xf32>
        scf.yield %235, %239, %242 : vector<8x128xf32>, vector<8x128xf32>, vector<8x128xf32>
      }
      %c9_i32_97 = arith.constant 9 : i32
      %cst_98 = arith.constant 0.000000e+00 : f32
      %188 = vector.broadcast %cst_98 : f32 to vector<8x128xf32>
      %189 = arith.cmpf ogt, %187#2, %188 : vector<8x128xf32>
      %190 = arith.cmpf ole, %187#0, %187#1 : vector<8x128xf32>
      %191 = arith.andi %189, %190 : vector<8x128xi1>
      %192 = arith.subf %179, %173 : vector<8x128xf32>
      %193 = arith.subf %182, %176 : vector<8x128xf32>
      %194 = arith.mulf %187#0, %192 : vector<8x128xf32>
      %195 = arith.addf %173, %194 : vector<8x128xf32>
      %196 = arith.mulf %187#0, %193 : vector<8x128xf32>
      %197 = arith.addf %176, %196 : vector<8x128xf32>
      %198 = arith.mulf %187#1, %192 : vector<8x128xf32>
      %199 = arith.addf %173, %198 : vector<8x128xf32>
      %200 = arith.mulf %187#1, %193 : vector<8x128xf32>
      %201 = arith.addf %176, %200 : vector<8x128xf32>
      %202 = arith.mulf %195, %201 : vector<8x128xf32>
      %203 = arith.mulf %199, %197 : vector<8x128xf32>
      %204 = arith.subf %202, %203 : vector<8x128xf32>
      %cst_99 = arith.constant 0.000000e+00 : f32
      %205 = vector.broadcast %cst_99 : f32 to vector<8x128xf32>
      %206 = arith.select %191, %204, %205 : vector<8x128xi1>, vector<8x128xf32>
      %207 = arith.addf %arg9, %206 : vector<8x128xf32>
      scf.yield %207 : vector<8x128xf32>
    }
    %c4_i32_66 = arith.constant 4 : i32
    %cst_67 = arith.constant 5.000000e-01 : f32
    %113 = vector.broadcast %cst_67 : f32 to vector<8x128xf32>
    %114 = arith.mulf %113, %112 : vector<8x128xf32>
    %cst_68 = arith.constant 0.000000e+00 : f32
    %115 = vector.broadcast %cst_68 : f32 to vector<8x128xf32>
    %116 = arith.maximumf %114, %115 : vector<8x128xf32>
    %117 = arith.cmpf olt, %32, %5#1 : vector<8x128xf32>
    %118 = arith.cmpf oeq, %32, %5#1 : vector<8x128xf32>
    %119 = arith.cmpf olt, %24, %5#0 : vector<8x128xf32>
    %120 = arith.andi %118, %119 : vector<8x128xi1>
    %121 = arith.ori %117, %120 : vector<8x128xi1>
    %122 = arith.select %121, %24, %5#0 : vector<8x128xi1>, vector<8x128xf32>
    %123 = arith.select %121, %32, %5#1 : vector<8x128xi1>, vector<8x128xf32>
    %124 = arith.cmpf olt, %61, %123 : vector<8x128xf32>
    %125 = arith.cmpf oeq, %61, %123 : vector<8x128xf32>
    %126 = arith.cmpf olt, %59, %122 : vector<8x128xf32>
    %127 = arith.andi %125, %126 : vector<8x128xi1>
    %128 = arith.ori %124, %127 : vector<8x128xi1>
    %129 = arith.select %128, %59, %122 : vector<8x128xi1>, vector<8x128xf32>
    %130 = arith.select %128, %61, %123 : vector<8x128xi1>, vector<8x128xf32>
    %131 = arith.cmpf olt, %36, %130 : vector<8x128xf32>
    %132 = arith.cmpf oeq, %36, %130 : vector<8x128xf32>
    %133 = arith.cmpf olt, %28, %129 : vector<8x128xf32>
    %134 = arith.andi %132, %133 : vector<8x128xi1>
    %135 = arith.ori %131, %134 : vector<8x128xi1>
    %136 = arith.select %135, %28, %129 : vector<8x128xi1>, vector<8x128xf32>
    %137 = arith.select %135, %36, %130 : vector<8x128xi1>, vector<8x128xf32>
    %138 = arith.cmpf olt, %62, %137 : vector<8x128xf32>
    %139 = arith.cmpf oeq, %62, %137 : vector<8x128xf32>
    %140 = arith.cmpf olt, %60, %136 : vector<8x128xf32>
    %141 = arith.andi %139, %140 : vector<8x128xi1>
    %142 = arith.ori %138, %141 : vector<8x128xi1>
    %143 = arith.select %142, %60, %136 : vector<8x128xi1>, vector<8x128xf32>
    %144 = arith.select %142, %62, %137 : vector<8x128xi1>, vector<8x128xf32>
    %cst_69 = arith.constant 1.000000e+00 : f32
    %145 = vector.broadcast %cst_69 : f32 to vector<8x128xf32>
    %cst_70 = arith.constant 0.000000e+00 : f32
    %146 = vector.broadcast %cst_70 : f32 to vector<8x128xf32>
    %c0_i32_71 = arith.constant 0 : i32
    %c13_i32 = arith.constant 13 : i32
    %147 = arith.addi %c0_i32_71, %c13_i32 : i32
    %c1_i32_72 = arith.constant 1 : i32
    %148:4 = scf.for %arg8 = %c0_i32_71 to %147 step %c1_i32_72 iter_args(%arg9 = %143, %arg10 = %144, %arg11 = %145, %arg12 = %146) -> (vector<8x128xf32>, vector<8x128xf32>, vector<8x128xf32>, vector<8x128xf32>)  : i32 {
      %cst_80 = arith.constant 0.000000e+00 : f32
      %167 = vector.broadcast %cst_80 : f32 to vector<8x128xf32>
      %cst_81 = arith.constant 0.000000e+00 : f32
      %168 = vector.broadcast %cst_81 : f32 to vector<8x128xf32>
      %cst_82 = arith.constant 0.000000e+00 : f32
      %169 = vector.broadcast %cst_82 : f32 to vector<8x128xf32>
      %c0_83 = arith.constant 0 : index
      %c0_84 = arith.constant 0 : index
      %c0_85 = arith.constant 0 : index
      %170 = vector.load %arg3[%c0_83, %c0_84, %c0_85] : memref<13x8x128xf32, #tpu.memory_space<vmem>>, vector<1x8x128xf32>
      %171 = vector.shape_cast %170 : vector<1x8x128xf32> to vector<8x128xf32>
      %c0_86 = arith.constant 0 : index
      %c0_87 = arith.constant 0 : index
      %c0_88 = arith.constant 0 : index
      %172 = vector.load %arg4[%c0_86, %c0_87, %c0_88] : memref<13x8x128xf32, #tpu.memory_space<vmem>>, vector<1x8x128xf32>
      %173 = vector.shape_cast %172 : vector<1x8x128xf32> to vector<8x128xf32>
      %174 = arith.subf %171, %arg9 : vector<8x128xf32>
      %175 = arith.subf %173, %arg10 : vector<8x128xf32>
      %176 = arith.mulf %167, %175 : vector<8x128xf32>
      %177 = arith.mulf %168, %174 : vector<8x128xf32>
      %178 = arith.subf %176, %177 : vector<8x128xf32>
      %179 = arith.mulf %174, %174 : vector<8x128xf32>
      %180 = arith.mulf %175, %175 : vector<8x128xf32>
      %181 = arith.addf %179, %180 : vector<8x128xf32>
      %cst_89 = arith.constant 0.000000e+00 : f32
      %182 = vector.broadcast %cst_89 : f32 to vector<8x128xf32>
      %183 = arith.cmpf olt, %178, %182 : vector<8x128xf32>
      %cst_90 = arith.constant 0.000000e+00 : f32
      %184 = vector.broadcast %cst_90 : f32 to vector<8x128xf32>
      %185 = arith.cmpf oeq, %178, %184 : vector<8x128xf32>
      %186 = arith.cmpf ogt, %181, %169 : vector<8x128xf32>
      %187 = arith.andi %185, %186 : vector<8x128xi1>
      %188 = arith.ori %183, %187 : vector<8x128xi1>
      %189 = arith.select %188, %171, %arg9 : vector<8x128xi1>, vector<8x128xf32>
      %190 = arith.select %188, %173, %arg10 : vector<8x128xi1>, vector<8x128xf32>
      %191 = arith.select %188, %174, %167 : vector<8x128xi1>, vector<8x128xf32>
      %192 = arith.select %188, %175, %168 : vector<8x128xi1>, vector<8x128xf32>
      %193 = arith.select %188, %181, %169 : vector<8x128xi1>, vector<8x128xf32>
      %c1 = arith.constant 1 : index
      %c0_91 = arith.constant 0 : index
      %c0_92 = arith.constant 0 : index
      %194 = vector.load %arg3[%c1, %c0_91, %c0_92] : memref<13x8x128xf32, #tpu.memory_space<vmem>>, vector<1x8x128xf32>
      %195 = vector.shape_cast %194 : vector<1x8x128xf32> to vector<8x128xf32>
      %c1_93 = arith.constant 1 : index
      %c0_94 = arith.constant 0 : index
      %c0_95 = arith.constant 0 : index
      %196 = vector.load %arg4[%c1_93, %c0_94, %c0_95] : memref<13x8x128xf32, #tpu.memory_space<vmem>>, vector<1x8x128xf32>
      %197 = vector.shape_cast %196 : vector<1x8x128xf32> to vector<8x128xf32>
      %198 = arith.subf %195, %arg9 : vector<8x128xf32>
      %199 = arith.subf %197, %arg10 : vector<8x128xf32>
      %200 = arith.mulf %191, %199 : vector<8x128xf32>
      %201 = arith.mulf %192, %198 : vector<8x128xf32>
      %202 = arith.subf %200, %201 : vector<8x128xf32>
      %203 = arith.mulf %198, %198 : vector<8x128xf32>
      %204 = arith.mulf %199, %199 : vector<8x128xf32>
      %205 = arith.addf %203, %204 : vector<8x128xf32>
      %cst_96 = arith.constant 0.000000e+00 : f32
      %206 = vector.broadcast %cst_96 : f32 to vector<8x128xf32>
      %207 = arith.cmpf olt, %202, %206 : vector<8x128xf32>
      %cst_97 = arith.constant 0.000000e+00 : f32
      %208 = vector.broadcast %cst_97 : f32 to vector<8x128xf32>
      %209 = arith.cmpf oeq, %202, %208 : vector<8x128xf32>
      %210 = arith.cmpf ogt, %205, %193 : vector<8x128xf32>
      %211 = arith.andi %209, %210 : vector<8x128xi1>
      %212 = arith.ori %207, %211 : vector<8x128xi1>
      %213 = arith.select %212, %195, %189 : vector<8x128xi1>, vector<8x128xf32>
      %214 = arith.select %212, %197, %190 : vector<8x128xi1>, vector<8x128xf32>
      %215 = arith.select %212, %198, %191 : vector<8x128xi1>, vector<8x128xf32>
      %216 = arith.select %212, %199, %192 : vector<8x128xi1>, vector<8x128xf32>
      %217 = arith.select %212, %205, %193 : vector<8x128xi1>, vector<8x128xf32>
      %c2 = arith.constant 2 : index
      %c0_98 = arith.constant 0 : index
      %c0_99 = arith.constant 0 : index
      %218 = vector.load %arg3[%c2, %c0_98, %c0_99] : memref<13x8x128xf32, #tpu.memory_space<vmem>>, vector<1x8x128xf32>
      %219 = vector.shape_cast %218 : vector<1x8x128xf32> to vector<8x128xf32>
      %c2_100 = arith.constant 2 : index
      %c0_101 = arith.constant 0 : index
      %c0_102 = arith.constant 0 : index
      %220 = vector.load %arg4[%c2_100, %c0_101, %c0_102] : memref<13x8x128xf32, #tpu.memory_space<vmem>>, vector<1x8x128xf32>
      %221 = vector.shape_cast %220 : vector<1x8x128xf32> to vector<8x128xf32>
      %222 = arith.subf %219, %arg9 : vector<8x128xf32>
      %223 = arith.subf %221, %arg10 : vector<8x128xf32>
      %224 = arith.mulf %215, %223 : vector<8x128xf32>
      %225 = arith.mulf %216, %222 : vector<8x128xf32>
      %226 = arith.subf %224, %225 : vector<8x128xf32>
      %227 = arith.mulf %222, %222 : vector<8x128xf32>
      %228 = arith.mulf %223, %223 : vector<8x128xf32>
      %229 = arith.addf %227, %228 : vector<8x128xf32>
      %cst_103 = arith.constant 0.000000e+00 : f32
      %230 = vector.broadcast %cst_103 : f32 to vector<8x128xf32>
      %231 = arith.cmpf olt, %226, %230 : vector<8x128xf32>
      %cst_104 = arith.constant 0.000000e+00 : f32
      %232 = vector.broadcast %cst_104 : f32 to vector<8x128xf32>
      %233 = arith.cmpf oeq, %226, %232 : vector<8x128xf32>
      %234 = arith.cmpf ogt, %229, %217 : vector<8x128xf32>
      %235 = arith.andi %233, %234 : vector<8x128xi1>
      %236 = arith.ori %231, %235 : vector<8x128xi1>
      %237 = arith.select %236, %219, %213 : vector<8x128xi1>, vector<8x128xf32>
      %238 = arith.select %236, %221, %214 : vector<8x128xi1>, vector<8x128xf32>
      %239 = arith.select %236, %222, %215 : vector<8x128xi1>, vector<8x128xf32>
      %240 = arith.select %236, %223, %216 : vector<8x128xi1>, vector<8x128xf32>
      %241 = arith.select %236, %229, %217 : vector<8x128xi1>, vector<8x128xf32>
      %c3 = arith.constant 3 : index
      %c0_105 = arith.constant 0 : index
      %c0_106 = arith.constant 0 : index
      %242 = vector.load %arg3[%c3, %c0_105, %c0_106] : memref<13x8x128xf32, #tpu.memory_space<vmem>>, vector<1x8x128xf32>
      %243 = vector.shape_cast %242 : vector<1x8x128xf32> to vector<8x128xf32>
      %c3_107 = arith.constant 3 : index
      %c0_108 = arith.constant 0 : index
      %c0_109 = arith.constant 0 : index
      %244 = vector.load %arg4[%c3_107, %c0_108, %c0_109] : memref<13x8x128xf32, #tpu.memory_space<vmem>>, vector<1x8x128xf32>
      %245 = vector.shape_cast %244 : vector<1x8x128xf32> to vector<8x128xf32>
      %246 = arith.subf %243, %arg9 : vector<8x128xf32>
      %247 = arith.subf %245, %arg10 : vector<8x128xf32>
      %248 = arith.mulf %239, %247 : vector<8x128xf32>
      %249 = arith.mulf %240, %246 : vector<8x128xf32>
      %250 = arith.subf %248, %249 : vector<8x128xf32>
      %251 = arith.mulf %246, %246 : vector<8x128xf32>
      %252 = arith.mulf %247, %247 : vector<8x128xf32>
      %253 = arith.addf %251, %252 : vector<8x128xf32>
      %cst_110 = arith.constant 0.000000e+00 : f32
      %254 = vector.broadcast %cst_110 : f32 to vector<8x128xf32>
      %255 = arith.cmpf olt, %250, %254 : vector<8x128xf32>
      %cst_111 = arith.constant 0.000000e+00 : f32
      %256 = vector.broadcast %cst_111 : f32 to vector<8x128xf32>
      %257 = arith.cmpf oeq, %250, %256 : vector<8x128xf32>
      %258 = arith.cmpf ogt, %253, %241 : vector<8x128xf32>
      %259 = arith.andi %257, %258 : vector<8x128xi1>
      %260 = arith.ori %255, %259 : vector<8x128xi1>
      %261 = arith.select %260, %243, %237 : vector<8x128xi1>, vector<8x128xf32>
      %262 = arith.select %260, %245, %238 : vector<8x128xi1>, vector<8x128xf32>
      %263 = arith.select %260, %246, %239 : vector<8x128xi1>, vector<8x128xf32>
      %264 = arith.select %260, %247, %240 : vector<8x128xi1>, vector<8x128xf32>
      %265 = arith.select %260, %253, %241 : vector<8x128xi1>, vector<8x128xf32>
      %c4 = arith.constant 4 : index
      %c0_112 = arith.constant 0 : index
      %c0_113 = arith.constant 0 : index
      %266 = vector.load %arg3[%c4, %c0_112, %c0_113] : memref<13x8x128xf32, #tpu.memory_space<vmem>>, vector<1x8x128xf32>
      %267 = vector.shape_cast %266 : vector<1x8x128xf32> to vector<8x128xf32>
      %c4_114 = arith.constant 4 : index
      %c0_115 = arith.constant 0 : index
      %c0_116 = arith.constant 0 : index
      %268 = vector.load %arg4[%c4_114, %c0_115, %c0_116] : memref<13x8x128xf32, #tpu.memory_space<vmem>>, vector<1x8x128xf32>
      %269 = vector.shape_cast %268 : vector<1x8x128xf32> to vector<8x128xf32>
      %270 = arith.subf %267, %arg9 : vector<8x128xf32>
      %271 = arith.subf %269, %arg10 : vector<8x128xf32>
      %272 = arith.mulf %263, %271 : vector<8x128xf32>
      %273 = arith.mulf %264, %270 : vector<8x128xf32>
      %274 = arith.subf %272, %273 : vector<8x128xf32>
      %275 = arith.mulf %270, %270 : vector<8x128xf32>
      %276 = arith.mulf %271, %271 : vector<8x128xf32>
      %277 = arith.addf %275, %276 : vector<8x128xf32>
      %cst_117 = arith.constant 0.000000e+00 : f32
      %278 = vector.broadcast %cst_117 : f32 to vector<8x128xf32>
      %279 = arith.cmpf olt, %274, %278 : vector<8x128xf32>
      %cst_118 = arith.constant 0.000000e+00 : f32
      %280 = vector.broadcast %cst_118 : f32 to vector<8x128xf32>
      %281 = arith.cmpf oeq, %274, %280 : vector<8x128xf32>
      %282 = arith.cmpf ogt, %277, %265 : vector<8x128xf32>
      %283 = arith.andi %281, %282 : vector<8x128xi1>
      %284 = arith.ori %279, %283 : vector<8x128xi1>
      %285 = arith.select %284, %267, %261 : vector<8x128xi1>, vector<8x128xf32>
      %286 = arith.select %284, %269, %262 : vector<8x128xi1>, vector<8x128xf32>
      %287 = arith.select %284, %270, %263 : vector<8x128xi1>, vector<8x128xf32>
      %288 = arith.select %284, %271, %264 : vector<8x128xi1>, vector<8x128xf32>
      %289 = arith.select %284, %277, %265 : vector<8x128xi1>, vector<8x128xf32>
      %c5 = arith.constant 5 : index
      %c0_119 = arith.constant 0 : index
      %c0_120 = arith.constant 0 : index
      %290 = vector.load %arg3[%c5, %c0_119, %c0_120] : memref<13x8x128xf32, #tpu.memory_space<vmem>>, vector<1x8x128xf32>
      %291 = vector.shape_cast %290 : vector<1x8x128xf32> to vector<8x128xf32>
      %c5_121 = arith.constant 5 : index
      %c0_122 = arith.constant 0 : index
      %c0_123 = arith.constant 0 : index
      %292 = vector.load %arg4[%c5_121, %c0_122, %c0_123] : memref<13x8x128xf32, #tpu.memory_space<vmem>>, vector<1x8x128xf32>
      %293 = vector.shape_cast %292 : vector<1x8x128xf32> to vector<8x128xf32>
      %294 = arith.subf %291, %arg9 : vector<8x128xf32>
      %295 = arith.subf %293, %arg10 : vector<8x128xf32>
      %296 = arith.mulf %287, %295 : vector<8x128xf32>
      %297 = arith.mulf %288, %294 : vector<8x128xf32>
      %298 = arith.subf %296, %297 : vector<8x128xf32>
      %299 = arith.mulf %294, %294 : vector<8x128xf32>
      %300 = arith.mulf %295, %295 : vector<8x128xf32>
      %301 = arith.addf %299, %300 : vector<8x128xf32>
      %cst_124 = arith.constant 0.000000e+00 : f32
      %302 = vector.broadcast %cst_124 : f32 to vector<8x128xf32>
      %303 = arith.cmpf olt, %298, %302 : vector<8x128xf32>
      %cst_125 = arith.constant 0.000000e+00 : f32
      %304 = vector.broadcast %cst_125 : f32 to vector<8x128xf32>
      %305 = arith.cmpf oeq, %298, %304 : vector<8x128xf32>
      %306 = arith.cmpf ogt, %301, %289 : vector<8x128xf32>
      %307 = arith.andi %305, %306 : vector<8x128xi1>
      %308 = arith.ori %303, %307 : vector<8x128xi1>
      %309 = arith.select %308, %291, %285 : vector<8x128xi1>, vector<8x128xf32>
      %310 = arith.select %308, %293, %286 : vector<8x128xi1>, vector<8x128xf32>
      %311 = arith.select %308, %294, %287 : vector<8x128xi1>, vector<8x128xf32>
      %312 = arith.select %308, %295, %288 : vector<8x128xi1>, vector<8x128xf32>
      %313 = arith.select %308, %301, %289 : vector<8x128xi1>, vector<8x128xf32>
      %c6 = arith.constant 6 : index
      %c0_126 = arith.constant 0 : index
      %c0_127 = arith.constant 0 : index
      %314 = vector.load %arg3[%c6, %c0_126, %c0_127] : memref<13x8x128xf32, #tpu.memory_space<vmem>>, vector<1x8x128xf32>
      %315 = vector.shape_cast %314 : vector<1x8x128xf32> to vector<8x128xf32>
      %c6_128 = arith.constant 6 : index
      %c0_129 = arith.constant 0 : index
      %c0_130 = arith.constant 0 : index
      %316 = vector.load %arg4[%c6_128, %c0_129, %c0_130] : memref<13x8x128xf32, #tpu.memory_space<vmem>>, vector<1x8x128xf32>
      %317 = vector.shape_cast %316 : vector<1x8x128xf32> to vector<8x128xf32>
      %318 = arith.subf %315, %arg9 : vector<8x128xf32>
      %319 = arith.subf %317, %arg10 : vector<8x128xf32>
      %320 = arith.mulf %311, %319 : vector<8x128xf32>
      %321 = arith.mulf %312, %318 : vector<8x128xf32>
      %322 = arith.subf %320, %321 : vector<8x128xf32>
      %323 = arith.mulf %318, %318 : vector<8x128xf32>
      %324 = arith.mulf %319, %319 : vector<8x128xf32>
      %325 = arith.addf %323, %324 : vector<8x128xf32>
      %cst_131 = arith.constant 0.000000e+00 : f32
      %326 = vector.broadcast %cst_131 : f32 to vector<8x128xf32>
      %327 = arith.cmpf olt, %322, %326 : vector<8x128xf32>
      %cst_132 = arith.constant 0.000000e+00 : f32
      %328 = vector.broadcast %cst_132 : f32 to vector<8x128xf32>
      %329 = arith.cmpf oeq, %322, %328 : vector<8x128xf32>
      %330 = arith.cmpf ogt, %325, %313 : vector<8x128xf32>
      %331 = arith.andi %329, %330 : vector<8x128xi1>
      %332 = arith.ori %327, %331 : vector<8x128xi1>
      %333 = arith.select %332, %315, %309 : vector<8x128xi1>, vector<8x128xf32>
      %334 = arith.select %332, %317, %310 : vector<8x128xi1>, vector<8x128xf32>
      %335 = arith.select %332, %318, %311 : vector<8x128xi1>, vector<8x128xf32>
      %336 = arith.select %332, %319, %312 : vector<8x128xi1>, vector<8x128xf32>
      %337 = arith.select %332, %325, %313 : vector<8x128xi1>, vector<8x128xf32>
      %c7 = arith.constant 7 : index
      %c0_133 = arith.constant 0 : index
      %c0_134 = arith.constant 0 : index
      %338 = vector.load %arg3[%c7, %c0_133, %c0_134] : memref<13x8x128xf32, #tpu.memory_space<vmem>>, vector<1x8x128xf32>
      %339 = vector.shape_cast %338 : vector<1x8x128xf32> to vector<8x128xf32>
      %c7_135 = arith.constant 7 : index
      %c0_136 = arith.constant 0 : index
      %c0_137 = arith.constant 0 : index
      %340 = vector.load %arg4[%c7_135, %c0_136, %c0_137] : memref<13x8x128xf32, #tpu.memory_space<vmem>>, vector<1x8x128xf32>
      %341 = vector.shape_cast %340 : vector<1x8x128xf32> to vector<8x128xf32>
      %342 = arith.subf %339, %arg9 : vector<8x128xf32>
      %343 = arith.subf %341, %arg10 : vector<8x128xf32>
      %344 = arith.mulf %335, %343 : vector<8x128xf32>
      %345 = arith.mulf %336, %342 : vector<8x128xf32>
      %346 = arith.subf %344, %345 : vector<8x128xf32>
      %347 = arith.mulf %342, %342 : vector<8x128xf32>
      %348 = arith.mulf %343, %343 : vector<8x128xf32>
      %349 = arith.addf %347, %348 : vector<8x128xf32>
      %cst_138 = arith.constant 0.000000e+00 : f32
      %350 = vector.broadcast %cst_138 : f32 to vector<8x128xf32>
      %351 = arith.cmpf olt, %346, %350 : vector<8x128xf32>
      %cst_139 = arith.constant 0.000000e+00 : f32
      %352 = vector.broadcast %cst_139 : f32 to vector<8x128xf32>
      %353 = arith.cmpf oeq, %346, %352 : vector<8x128xf32>
      %354 = arith.cmpf ogt, %349, %337 : vector<8x128xf32>
      %355 = arith.andi %353, %354 : vector<8x128xi1>
      %356 = arith.ori %351, %355 : vector<8x128xi1>
      %357 = arith.select %356, %339, %333 : vector<8x128xi1>, vector<8x128xf32>
      %358 = arith.select %356, %341, %334 : vector<8x128xi1>, vector<8x128xf32>
      %359 = arith.select %356, %342, %335 : vector<8x128xi1>, vector<8x128xf32>
      %360 = arith.select %356, %343, %336 : vector<8x128xi1>, vector<8x128xf32>
      %361 = arith.select %356, %349, %337 : vector<8x128xi1>, vector<8x128xf32>
      %c8 = arith.constant 8 : index
      %c0_140 = arith.constant 0 : index
      %c0_141 = arith.constant 0 : index
      %362 = vector.load %arg3[%c8, %c0_140, %c0_141] : memref<13x8x128xf32, #tpu.memory_space<vmem>>, vector<1x8x128xf32>
      %363 = vector.shape_cast %362 : vector<1x8x128xf32> to vector<8x128xf32>
      %c8_142 = arith.constant 8 : index
      %c0_143 = arith.constant 0 : index
      %c0_144 = arith.constant 0 : index
      %364 = vector.load %arg4[%c8_142, %c0_143, %c0_144] : memref<13x8x128xf32, #tpu.memory_space<vmem>>, vector<1x8x128xf32>
      %365 = vector.shape_cast %364 : vector<1x8x128xf32> to vector<8x128xf32>
      %366 = arith.subf %363, %arg9 : vector<8x128xf32>
      %367 = arith.subf %365, %arg10 : vector<8x128xf32>
      %368 = arith.mulf %359, %367 : vector<8x128xf32>
      %369 = arith.mulf %360, %366 : vector<8x128xf32>
      %370 = arith.subf %368, %369 : vector<8x128xf32>
      %371 = arith.mulf %366, %366 : vector<8x128xf32>
      %372 = arith.mulf %367, %367 : vector<8x128xf32>
      %373 = arith.addf %371, %372 : vector<8x128xf32>
      %cst_145 = arith.constant 0.000000e+00 : f32
      %374 = vector.broadcast %cst_145 : f32 to vector<8x128xf32>
      %375 = arith.cmpf olt, %370, %374 : vector<8x128xf32>
      %cst_146 = arith.constant 0.000000e+00 : f32
      %376 = vector.broadcast %cst_146 : f32 to vector<8x128xf32>
      %377 = arith.cmpf oeq, %370, %376 : vector<8x128xf32>
      %378 = arith.cmpf ogt, %373, %361 : vector<8x128xf32>
      %379 = arith.andi %377, %378 : vector<8x128xi1>
      %380 = arith.ori %375, %379 : vector<8x128xi1>
      %381 = arith.select %380, %363, %357 : vector<8x128xi1>, vector<8x128xf32>
      %382 = arith.select %380, %365, %358 : vector<8x128xi1>, vector<8x128xf32>
      %383 = arith.select %380, %366, %359 : vector<8x128xi1>, vector<8x128xf32>
      %384 = arith.select %380, %367, %360 : vector<8x128xi1>, vector<8x128xf32>
      %385 = arith.select %380, %373, %361 : vector<8x128xi1>, vector<8x128xf32>
      %c9_147 = arith.constant 9 : index
      %c0_148 = arith.constant 0 : index
      %c0_149 = arith.constant 0 : index
      %386 = vector.load %arg3[%c9_147, %c0_148, %c0_149] : memref<13x8x128xf32, #tpu.memory_space<vmem>>, vector<1x8x128xf32>
      %387 = vector.shape_cast %386 : vector<1x8x128xf32> to vector<8x128xf32>
      %c9_150 = arith.constant 9 : index
      %c0_151 = arith.constant 0 : index
      %c0_152 = arith.constant 0 : index
      %388 = vector.load %arg4[%c9_150, %c0_151, %c0_152] : memref<13x8x128xf32, #tpu.memory_space<vmem>>, vector<1x8x128xf32>
      %389 = vector.shape_cast %388 : vector<1x8x128xf32> to vector<8x128xf32>
      %390 = arith.subf %387, %arg9 : vector<8x128xf32>
      %391 = arith.subf %389, %arg10 : vector<8x128xf32>
      %392 = arith.mulf %383, %391 : vector<8x128xf32>
      %393 = arith.mulf %384, %390 : vector<8x128xf32>
      %394 = arith.subf %392, %393 : vector<8x128xf32>
      %395 = arith.mulf %390, %390 : vector<8x128xf32>
      %396 = arith.mulf %391, %391 : vector<8x128xf32>
      %397 = arith.addf %395, %396 : vector<8x128xf32>
      %cst_153 = arith.constant 0.000000e+00 : f32
      %398 = vector.broadcast %cst_153 : f32 to vector<8x128xf32>
      %399 = arith.cmpf olt, %394, %398 : vector<8x128xf32>
      %cst_154 = arith.constant 0.000000e+00 : f32
      %400 = vector.broadcast %cst_154 : f32 to vector<8x128xf32>
      %401 = arith.cmpf oeq, %394, %400 : vector<8x128xf32>
      %402 = arith.cmpf ogt, %397, %385 : vector<8x128xf32>
      %403 = arith.andi %401, %402 : vector<8x128xi1>
      %404 = arith.ori %399, %403 : vector<8x128xi1>
      %405 = arith.select %404, %387, %381 : vector<8x128xi1>, vector<8x128xf32>
      %406 = arith.select %404, %389, %382 : vector<8x128xi1>, vector<8x128xf32>
      %407 = arith.select %404, %390, %383 : vector<8x128xi1>, vector<8x128xf32>
      %408 = arith.select %404, %391, %384 : vector<8x128xi1>, vector<8x128xf32>
      %409 = arith.select %404, %397, %385 : vector<8x128xi1>, vector<8x128xf32>
      %c10_155 = arith.constant 10 : index
      %c0_156 = arith.constant 0 : index
      %c0_157 = arith.constant 0 : index
      %410 = vector.load %arg3[%c10_155, %c0_156, %c0_157] : memref<13x8x128xf32, #tpu.memory_space<vmem>>, vector<1x8x128xf32>
      %411 = vector.shape_cast %410 : vector<1x8x128xf32> to vector<8x128xf32>
      %c10_158 = arith.constant 10 : index
      %c0_159 = arith.constant 0 : index
      %c0_160 = arith.constant 0 : index
      %412 = vector.load %arg4[%c10_158, %c0_159, %c0_160] : memref<13x8x128xf32, #tpu.memory_space<vmem>>, vector<1x8x128xf32>
      %413 = vector.shape_cast %412 : vector<1x8x128xf32> to vector<8x128xf32>
      %414 = arith.subf %411, %arg9 : vector<8x128xf32>
      %415 = arith.subf %413, %arg10 : vector<8x128xf32>
      %416 = arith.mulf %407, %415 : vector<8x128xf32>
      %417 = arith.mulf %408, %414 : vector<8x128xf32>
      %418 = arith.subf %416, %417 : vector<8x128xf32>
      %419 = arith.mulf %414, %414 : vector<8x128xf32>
      %420 = arith.mulf %415, %415 : vector<8x128xf32>
      %421 = arith.addf %419, %420 : vector<8x128xf32>
      %cst_161 = arith.constant 0.000000e+00 : f32
      %422 = vector.broadcast %cst_161 : f32 to vector<8x128xf32>
      %423 = arith.cmpf olt, %418, %422 : vector<8x128xf32>
      %cst_162 = arith.constant 0.000000e+00 : f32
      %424 = vector.broadcast %cst_162 : f32 to vector<8x128xf32>
      %425 = arith.cmpf oeq, %418, %424 : vector<8x128xf32>
      %426 = arith.cmpf ogt, %421, %409 : vector<8x128xf32>
      %427 = arith.andi %425, %426 : vector<8x128xi1>
      %428 = arith.ori %423, %427 : vector<8x128xi1>
      %429 = arith.select %428, %411, %405 : vector<8x128xi1>, vector<8x128xf32>
      %430 = arith.select %428, %413, %406 : vector<8x128xi1>, vector<8x128xf32>
      %431 = arith.select %428, %414, %407 : vector<8x128xi1>, vector<8x128xf32>
      %432 = arith.select %428, %415, %408 : vector<8x128xi1>, vector<8x128xf32>
      %433 = arith.select %428, %421, %409 : vector<8x128xi1>, vector<8x128xf32>
      %c11_163 = arith.constant 11 : index
      %c0_164 = arith.constant 0 : index
      %c0_165 = arith.constant 0 : index
      %434 = vector.load %arg3[%c11_163, %c0_164, %c0_165] : memref<13x8x128xf32, #tpu.memory_space<vmem>>, vector<1x8x128xf32>
      %435 = vector.shape_cast %434 : vector<1x8x128xf32> to vector<8x128xf32>
      %c11_166 = arith.constant 11 : index
      %c0_167 = arith.constant 0 : index
      %c0_168 = arith.constant 0 : index
      %436 = vector.load %arg4[%c11_166, %c0_167, %c0_168] : memref<13x8x128xf32, #tpu.memory_space<vmem>>, vector<1x8x128xf32>
      %437 = vector.shape_cast %436 : vector<1x8x128xf32> to vector<8x128xf32>
      %438 = arith.subf %435, %arg9 : vector<8x128xf32>
      %439 = arith.subf %437, %arg10 : vector<8x128xf32>
      %440 = arith.mulf %431, %439 : vector<8x128xf32>
      %441 = arith.mulf %432, %438 : vector<8x128xf32>
      %442 = arith.subf %440, %441 : vector<8x128xf32>
      %443 = arith.mulf %438, %438 : vector<8x128xf32>
      %444 = arith.mulf %439, %439 : vector<8x128xf32>
      %445 = arith.addf %443, %444 : vector<8x128xf32>
      %cst_169 = arith.constant 0.000000e+00 : f32
      %446 = vector.broadcast %cst_169 : f32 to vector<8x128xf32>
      %447 = arith.cmpf olt, %442, %446 : vector<8x128xf32>
      %cst_170 = arith.constant 0.000000e+00 : f32
      %448 = vector.broadcast %cst_170 : f32 to vector<8x128xf32>
      %449 = arith.cmpf oeq, %442, %448 : vector<8x128xf32>
      %450 = arith.cmpf ogt, %445, %433 : vector<8x128xf32>
      %451 = arith.andi %449, %450 : vector<8x128xi1>
      %452 = arith.ori %447, %451 : vector<8x128xi1>
      %453 = arith.select %452, %435, %429 : vector<8x128xi1>, vector<8x128xf32>
      %454 = arith.select %452, %437, %430 : vector<8x128xi1>, vector<8x128xf32>
      %455 = arith.select %452, %438, %431 : vector<8x128xi1>, vector<8x128xf32>
      %456 = arith.select %452, %439, %432 : vector<8x128xi1>, vector<8x128xf32>
      %457 = arith.select %452, %445, %433 : vector<8x128xi1>, vector<8x128xf32>
      %c12_171 = arith.constant 12 : index
      %c0_172 = arith.constant 0 : index
      %c0_173 = arith.constant 0 : index
      %458 = vector.load %arg3[%c12_171, %c0_172, %c0_173] : memref<13x8x128xf32, #tpu.memory_space<vmem>>, vector<1x8x128xf32>
      %459 = vector.shape_cast %458 : vector<1x8x128xf32> to vector<8x128xf32>
      %c12_174 = arith.constant 12 : index
      %c0_175 = arith.constant 0 : index
      %c0_176 = arith.constant 0 : index
      %460 = vector.load %arg4[%c12_174, %c0_175, %c0_176] : memref<13x8x128xf32, #tpu.memory_space<vmem>>, vector<1x8x128xf32>
      %461 = vector.shape_cast %460 : vector<1x8x128xf32> to vector<8x128xf32>
      %462 = arith.subf %459, %arg9 : vector<8x128xf32>
      %463 = arith.subf %461, %arg10 : vector<8x128xf32>
      %464 = arith.mulf %455, %463 : vector<8x128xf32>
      %465 = arith.mulf %456, %462 : vector<8x128xf32>
      %466 = arith.subf %464, %465 : vector<8x128xf32>
      %467 = arith.mulf %462, %462 : vector<8x128xf32>
      %468 = arith.mulf %463, %463 : vector<8x128xf32>
      %469 = arith.addf %467, %468 : vector<8x128xf32>
      %cst_177 = arith.constant 0.000000e+00 : f32
      %470 = vector.broadcast %cst_177 : f32 to vector<8x128xf32>
      %471 = arith.cmpf olt, %466, %470 : vector<8x128xf32>
      %cst_178 = arith.constant 0.000000e+00 : f32
      %472 = vector.broadcast %cst_178 : f32 to vector<8x128xf32>
      %473 = arith.cmpf oeq, %466, %472 : vector<8x128xf32>
      %474 = arith.cmpf ogt, %469, %457 : vector<8x128xf32>
      %475 = arith.andi %473, %474 : vector<8x128xi1>
      %476 = arith.ori %471, %475 : vector<8x128xi1>
      %477 = arith.select %476, %459, %453 : vector<8x128xi1>, vector<8x128xf32>
      %478 = arith.select %476, %461, %454 : vector<8x128xi1>, vector<8x128xf32>
      %479 = arith.mulf %arg9, %478 : vector<8x128xf32>
      %480 = arith.mulf %477, %arg10 : vector<8x128xf32>
      %481 = arith.subf %479, %480 : vector<8x128xf32>
      %482 = arith.mulf %arg11, %481 : vector<8x128xf32>
      %483 = arith.addf %arg12, %482 : vector<8x128xf32>
      %484 = arith.cmpf oeq, %477, %143 : vector<8x128xf32>
      %485 = arith.cmpf oeq, %478, %144 : vector<8x128xf32>
      %486 = arith.andi %484, %485 : vector<8x128xi1>
      %cst_179 = arith.constant 0.000000e+00 : f32
      %487 = vector.broadcast %cst_179 : f32 to vector<8x128xf32>
      %488 = arith.select %486, %487, %arg11 : vector<8x128xi1>, vector<8x128xf32>
      scf.yield %477, %478, %488, %483 : vector<8x128xf32>, vector<8x128xf32>, vector<8x128xf32>, vector<8x128xf32>
    }
    %149 = math.absf %148#3 : vector<8x128xf32>
    %cst_73 = arith.constant 5.000000e-01 : f32
    %150 = vector.broadcast %cst_73 : f32 to vector<8x128xf32>
    %151 = arith.mulf %150, %149 : vector<8x128xf32>
    %152 = arith.addf %22, %56 : vector<8x128xf32>
    %153 = arith.subf %152, %116 : vector<8x128xf32>
    %cst_74 = arith.constant 9.99999997E-7 : f32
    %154 = vector.broadcast %cst_74 : f32 to vector<8x128xf32>
    %155 = arith.maximumf %153, %154 : vector<8x128xf32>
    %156 = arith.divf %116, %155 : vector<8x128xf32>
    %cst_75 = arith.constant 9.99999997E-7 : f32
    %157 = vector.broadcast %cst_75 : f32 to vector<8x128xf32>
    %158 = arith.maximumf %151, %157 : vector<8x128xf32>
    %159 = arith.subf %158, %153 : vector<8x128xf32>
    %160 = arith.divf %159, %158 : vector<8x128xf32>
    %161 = arith.subf %156, %160 : vector<8x128xf32>
    %cst_76 = arith.constant 1.000000e+00 : f32
    %162 = vector.broadcast %cst_76 : f32 to vector<8x128xf32>
    %163 = arith.subf %162, %161 : vector<8x128xf32>
    %c0_77 = arith.constant 0 : index
    %c0_78 = arith.constant 0 : index
    %c0_79 = arith.constant 0 : index
    %164 = vector.load %arg2[%c0_77, %c0_78, %c0_79] : memref<1x8x128xf32, #tpu.memory_space<vmem>>, vector<1x8x128xf32>
    %165 = vector.shape_cast %164 : vector<1x8x128xf32> to vector<8x128xf32>
    %166 = vector.shape_cast %163 : vector<8x128xf32> to vector<1x8x128xf32>
    tpu.vector_store %arg2[%c0_77, %c0_78, %c0_79], %166 {strides = array<i32>} : memref<1x8x128xf32, #tpu.memory_space<vmem>>, vector<1x8x128xf32>,
    return
  }
  func.func @transform_0(%arg0: i32) -> (i32, i32, i32) {
    %c0_i32 = arith.constant 0 : i32
    %c0_i32_0 = arith.constant 0 : i32
    %c0_i32_1 = arith.constant 0 : i32
    return %arg0, %c0_i32, %c0_i32_0 : i32, i32, i32
  }
  func.func @transform_1(%arg0: i32) -> (i32, i32, i32) {
    %c0_i32 = arith.constant 0 : i32
    %c0_i32_0 = arith.constant 0 : i32
    %c0_i32_1 = arith.constant 0 : i32
    return %arg0, %c0_i32, %c0_i32_0 : i32, i32, i32
  }
}

</mosaic_0001>

<bundles_post_ra>
// kernel: _convex_giou_loss_pallas.1
= control target key start
LH: loop header
LB: loop body
LE: loop exit
PB: predicated region body
PF: predicated region fallthrough
CT: control target
= control target key end

     0   :  { %s1405_s10 = smov 1   ;;  %s2445_s0 = inlined_call_operand.vmem [shape: f32[26,8,128], index: 0, kind: input, shape index: {}]   ;;  %s2446_s1 = inlined_call_operand.vmem [shape: f32[1,8,128], index: 1, kind: output, shape index: {}]  }
   0x1   :  { %v8_v0 = vld [vmem:[%s2445_s0] sm:$0xff]   ;;  %v1073_v1 = vld [vmem:[%s2445_s0 + $0x48] sm:$0xff]  }
   0x2   :  { %v1397_v2 = vmov %v1073_v1   ;;  %v1401_v3 = vmov %v8_v0  }
   0x3 LB: > { %s1074_s11 = sshll.u32 %s1407_s10, 3  ;;  %s16_s10 = sadd.s32 1, %s1407_s10   ;;  %s1407_s10 = sphi %s1405_s10, %s16_s10   ;;  %v1403_v3 = vphi %v1401_v3, %v1402_v3   ;;  %v1399_v2 = vphi %v1397_v2, %v1398_v2  }
   0x4   : > { %s20_s14 = scalar_lea.vmem %s2445_s0, %s1074_s11  ;;  %p13_p0 = scmp.ge.s32.totalorder %s16_s10, 9  }
   0x5   : > { %v21_v4 = vld [vmem:[%s20_s14] sm:$0xff]  ;;  %v1076_v5 = vld [vmem:[%s20_s14 + $0x48] sm:$0xff]  ;;  %v1515_v8 = vmov (%p13_p0), 0.0   ;;  %v1517_v9 = vmov (%p13_p0), 1.0   ;;  %s1525_s15 = smov (%p13_p0), 0  }
   0x6   : > { %vm26_vm0 = vcmp.lt.f32.partialorder %v1076_v5, %v1399_v2  ;;  %vm27_vm1 = vcmp.eq.f32.partialorder %v1076_v5, %v1399_v2  ;;  %vm28_vm2 = vcmp.lt.f32.partialorder %v21_v4, %v1403_v3 }
   0x7   : > { %vm29_vm3 = vmand %vm27_vm1, %vm28_vm2  ;;  %15 = sbr.rel (!%p13_p0) target bundleno = 3 (0x3), region = 144 }
   0x8   : > { %vm30_vm4 = vmor %vm26_vm0, %vm29_vm3 }
   0x9   : > { %v1507_v3 = vsel %vm30_vm4, %v21_v4, %v1403_v3   ;;  %v1509_v2 = vsel %vm30_vm4, %v1076_v5, %v1399_v2  }
   0xa   : > { %v2447_v6 = vmov %v1507_v3  ;;  %v2448_v7 = vmov %v1509_v2 }
   0xb   : > { %v1398_v2 = vmov %v2448_v7   ;;  %v1402_v3 = vmov %v2447_v6   ;;  %33 = vst [vmem:[#allocation2] sm:$0xff] (%p13_p0), %v2447_v6  ;;  %v2449_v10 = vmov (%p13_p0), %v2448_v7  ;;  %v2450_v11 = vmov (%p13_p0), %v2447_v6 }
   0xc   :  { %34 = vst [vmem:[#allocation3] sm:$0xff] %v2448_v7 }
   0xd LB: > { %v1545_v12 = vld [vmem:[%s2445_s0] sm:$0xff]  ;;  %v1550_v13 = vld [vmem:[%s2445_s0 + $0x48] sm:$0xff]  ;;  %v1560_v15 = vld [vmem:[%s2445_s0 + $0x50] sm:$0xff]  ;;  %s1094_s24 = sshll.u32 %s1427_s15, 3  ;;  %s40_s15 = sadd.s32 1, %s1427_s15   ;;  %s1427_s15 = sphi %s1525_s15, %s40_s15   ;;  %v1423_v11 = vphi %v2450_v11, %v2467_v11   ;;  %v1419_v10 = vphi %v2449_v10, %v2466_v10   ;;  %v1415_v9 = vphi %v1517_v9, %v254_v9   ;;  %v1411_v8 = vphi %v1515_v8, %v2465_v8  }
   0xe   : > { %v1555_v14 = vld [vmem:[%s2445_s0 + $0x8] sm:$0xff]  ;;  %v47_v16 = vsub.f32 %v1545_v12, %v1423_v11  ;;  %v48_v17 = vsub.f32 %v1550_v13, %v1419_v10  ;;  %v70_v19 = vsub.f32 %v1560_v15, %v1419_v10  ;;  %v1573_v28 = vld [vmem:[%s2445_s0 + $0x10] sm:$0xff]  ;;  %v1578_v29 = vld [vmem:[%s2445_s0 + $0x58] sm:$0xff]  ;;  %s950_s25 = scalar_lea.vmem [#allocation2], %s1094_s24  ;;  %s953_s26 = scalar_lea.vmem [#allocation3], %s1094_s24 }
   0xf   : > { %v69_v18 = vsub.f32 %v1555_v14, %v1423_v11  ;;  %v91_v32 = vsub.f32 %v1573_v28, %v1423_v11  ;;  %v92_v33 = vsub.f32 %v1578_v29, %v1419_v10  ;;  %v1597_v42 = vld [vmem:[%s2445_s0 + $0x18] sm:$0xff]  ;;  %v1602_v43 = vld [vmem:[%s2445_s0 + $0x60] sm:$0xff]  ;;  %v1626_v57 = vld [vmem:[%s2445_s0 + $0x68] sm:$0xff]  ;;  %p37_p1 = scmp.ge.s32.totalorder %s40_s15, 8  }
  0x10   : > { %v49_v20 = vmul.f32 0.0, %v48_v17  ;;  %v50_v21 = vmul.f32 0.0, %v47_v16  ;;  %v52_v22 = vmul.f32 %v47_v16, %v47_v16  ;;  %v53_v23 = vmul.f32 %v48_v17, %v48_v17  ;;  %v1621_v56 = vld [vmem:[%s2445_s0 + $0x20] sm:$0xff] }
  0x11   : > { %v74_v26 = vmul.f32 %v69_v18, %v69_v18  ;;  %v75_v27 = vmul.f32 %v70_v19, %v70_v19  ;;  %v96_v40 = vmul.f32 %v91_v32, %v91_v32  ;;  %v97_v41 = vmul.f32 %v92_v33, %v92_v33 }
  0x12   : > { %v51_v24 = vsub.f32 %v49_v20, %v50_v21  ;;  %v54_v25 = vadd.f32 %v53_v23, %v52_v22  ;;  %v113_v46 = vsub.f32 %v1597_v42, %v1423_v11  ;;  %v114_v47 = vsub.f32 %v1602_v43, %v1419_v10 }
  0x13   : > { %v76_v31 = vadd.f32 %v75_v27, %v74_v26  ;;  %v98_v45 = vadd.f32 %v97_v41, %v96_v40  ;;  %v135_v60 = vsub.f32 %v1621_v56, %v1423_v11  ;;  %v136_v61 = vsub.f32 %v1626_v57, %v1419_v10 }
  0x14   : > { %vm55_vm5 = vcmp.lt.f32.partialorder %v51_v24, 0.0  ;;  %vm56_vm6 = vcmp.eq.f32.partialorder %v51_v24, 0.0  ;;  %vm57_vm7 = vcmp.gt.f32.partialorder %v54_v25, 0.0  ;;  %v118_v54 = vmul.f32 %v113_v46, %v113_v46 }
  0x15   : > { %vm58_vm8 = vmand %vm56_vm6, %vm57_vm7  ;;  %v119_v55 = vmul.f32 %v114_v47, %v114_v47  ;;  %v140_v4 = vmul.f32 %v135_v60, %v135_v60  ;;  %v141_v5 = vmul.f32 %v136_v61, %v136_v61 }
  0x16   : > { %vm1580_vm9 = vmor %vm55_vm5, %vm58_vm8 }
  0x17   : > { %v62_v34 = vsel %vm1580_vm9, %v47_v16, 0.0  ;;  %v63_v35 = vsel %vm1580_vm9, %v48_v17, 0.0  ;;  %v64_v36 = vsel %vm1580_vm9, %v54_v25, 0.0  ;;  %v120_v59 = vadd.f32 %v119_v55, %v118_v54  ;;  %v1645_v16 = vld [vmem:[%s2445_s0 + $0x28] sm:$0xff]  ;;  %v1650_v17 = vld [vmem:[%s2445_s0 + $0x70] sm:$0xff]  ;;  %v1099_v54 = vld [vmem:[%s2445_s0 + $0x98] sm:$0xff] (%p37_p1) }
  0x18   : > { %v71_v37 = vmul.f32 %v70_v19, %v62_v34  ;;  %v72_v38 = vmul.f32 %v69_v18, %v63_v35  ;;  %vm79_vm10 = vcmp.gt.f32.partialorder %v76_v31, %v64_v36  ;;  %v157_v20 = vsub.f32 %v1645_v16, %v1423_v11 }
  0x19   : > { %v158_v21 = vsub.f32 %v1650_v17, %v1419_v10 }
  0x1a   : > { %v73_v39 = vsub.f32 %v71_v37, %v72_v38 }
  0x1c   : > { %vm77_vm11 = vcmp.lt.f32.partialorder %v73_v39, 0.0  ;;  %vm78_vm12 = vcmp.eq.f32.partialorder %v73_v39, 0.0 }
  0x1d   : > { %vm80_vm13 = vmand %vm78_vm12, %vm79_vm10 }
  0x1e   : > { %vm1604_vm14 = vmor %vm77_vm11, %vm80_vm13 }
  0x1f   : > { %v84_v48 = vsel %vm1604_vm14, %v69_v18, %v62_v34  ;;  %v85_v49 = vsel %vm1604_vm14, %v70_v19, %v63_v35  ;;  %v86_v50 = vsel %vm1604_vm14, %v76_v31, %v64_v36  ;;  %v142_v19 = vadd.f32 %v141_v5, %v140_v4  ;;  %v1674_v34 = vld [vmem:[%s2445_s0 + $0x78] sm:$0xff]  ;;  %v1092_v4 = vld [vmem:[%s2445_s0 + $0x40] sm:$0xff]  ;;  %v1093_v5 = vld [vmem:[%s2445_s0 + $0x88] sm:$0xff] }
  0x20   : > { %v93_v51 = vmul.f32 %v92_v33, %v84_v48  ;;  %v94_v52 = vmul.f32 %v91_v32, %v85_v49  ;;  %vm101_vm15 = vcmp.gt.f32.partialorder %v98_v45, %v86_v50  ;;  %v162_v31 = vmul.f32 %v157_v20, %v157_v20 }
  0x21   : > { %v180_v38 = vsub.f32 %v1674_v34, %v1419_v10 }
  0x22   : > { %v95_v53 = vsub.f32 %v93_v51, %v94_v52  ;;  %v1698_v51 = vld [vmem:[%s2445_s0 + $0x80] sm:$0xff]  ;;  %v60_v52 = vsel %vm1580_vm9, %v1545_v12, %v1423_v11 }
  0x24   : > { %vm99_vm0 = vcmp.lt.f32.partialorder %v95_v53, 0.0  ;;  %vm100_vm1 = vcmp.eq.f32.partialorder %v95_v53, 0.0  ;;  %v61_v53 = vsel %vm1580_vm9, %v1550_v13, %v1419_v10 }
  0x25   : > { %vm102_vm2 = vmand %vm100_vm1, %vm101_vm15 }
  0x26   : > { %vm1628_vm3 = vmor %vm99_vm0, %vm102_vm2 }
  0x27   : > { %v106_v62 = vsel %vm1628_vm3, %v91_v32, %v84_v48  ;;  %v107_v63 = vsel %vm1628_vm3, %v92_v33, %v85_v49  ;;  %v108_v0 = vsel %vm1628_vm3, %v98_v45, %v86_v50  ;;  %v163_v32 = vmul.f32 %v158_v21, %v158_v21  ;;  %v1669_v33 = vld [vmem:[%s2445_s0 + $0x30] sm:$0xff]  ;;  %v1693_v50 = vld [vmem:[%s2445_s0 + $0x38] sm:$0xff] }
  0x28   : > { %v115_v1 = vmul.f32 %v114_v47, %v106_v62  ;;  %v116_v2 = vmul.f32 %v113_v46, %v107_v63  ;;  %vm123_vm4 = vcmp.gt.f32.partialorder %v120_v59, %v108_v0  ;;  %v179_v37 = vsub.f32 %v1669_v33, %v1423_v11 }
  0x29   : > { %v164_v36 = vadd.f32 %v163_v32, %v162_v31  ;;  %v185_v49 = vmul.f32 %v180_v38, %v180_v38 }
  0x2a   : > { %v117_v3 = vsub.f32 %v115_v1, %v116_v2  ;;  %v184_v48 = vmul.f32 %v179_v37, %v179_v37 }
  0x2c   : > { %vm121_vm5 = vcmp.lt.f32.partialorder %v117_v3, 0.0  ;;  %vm122_vm6 = vcmp.eq.f32.partialorder %v117_v3, 0.0  ;;  %v186_v55 = vadd.f32 %v185_v49, %v184_v48 }
  0x2d   : > { %vm124_vm7 = vmand %vm122_vm6, %vm123_vm4 }
  0x2e   : > { %vm1652_vm8 = vmor %vm121_vm5, %vm124_vm7 }
  0x2f   : > { %v128_v22 = vsel %vm1652_vm8, %v113_v46, %v106_v62  ;;  %v129_v23 = vsel %vm1652_vm8, %v114_v47, %v107_v63  ;;  %v130_v24 = vsel %vm1652_vm8, %v120_v59, %v108_v0  ;;  %v201_v59 = vsub.f32 %v1693_v50, %v1423_v11 }
  0x30   : > { %v137_v25 = vmul.f32 %v136_v61, %v128_v22  ;;  %v138_v26 = vmul.f32 %v135_v60, %v129_v23  ;;  %vm145_vm10 = vcmp.gt.f32.partialorder %v142_v19, %v130_v24  ;;  %v82_v63 = vsel %vm1604_vm14, %v1555_v14, %v60_v52  ;;  %v1804_v52 = vld [vmem:[%s2445_s0 + $0x90] sm:$0xff] (%p37_p1) }
  0x31   : > { %v83_v0 = vsel %vm1604_vm14, %v1560_v15, %v61_v53  ;;  %v206_v2 = vmul.f32 %v201_v59, %v201_v59  ;;  %v104_v14 = vsel %vm1628_vm3, %v1573_v28, %v82_v63  ;;  %v1809_v53 = vld [vmem:[%s2445_s0 + $0xb0] sm:$0xff] (%p37_p1) }
  0x32   : > { %v139_v27 = vsub.f32 %v137_v25, %v138_v26  ;;  %v105_v15 = vsel %vm1628_vm3, %v1578_v29, %v83_v0  ;;  %v126_v28 = vsel %vm1652_vm8, %v1597_v42, %v104_v14 }
  0x33   : > { %v127_v58 = vsel %vm1652_vm8, %v1602_v43, %v105_v15 }
  0x34   : > { %vm143_vm11 = vcmp.lt.f32.partialorder %v139_v27, 0.0  ;;  %vm144_vm12 = vcmp.eq.f32.partialorder %v139_v27, 0.0 }
  0x35   : > { %vm146_vm13 = vmand %vm144_vm12, %vm145_vm10 }
  0x36   : > { %vm1676_vm15 = vmor %vm143_vm11, %vm146_vm13 }
  0x37   : > { %v150_v39 = vsel %vm1676_vm15, %v135_v60, %v128_v22  ;;  %v151_v40 = vsel %vm1676_vm15, %v136_v61, %v129_v23  ;;  %v152_v41 = vsel %vm1676_vm15, %v142_v19, %v130_v24  ;;  %v202_v60 = vsub.f32 %v1698_v51, %v1419_v10 }
  0x38   : > { %v159_v45 = vmul.f32 %v158_v21, %v150_v39  ;;  %v160_v46 = vmul.f32 %v157_v20, %v151_v40  ;;  %vm167_vm0 = vcmp.gt.f32.partialorder %v164_v36, %v152_v41  ;;  %v148_v42 = vsel %vm1676_vm15, %v1621_v56, %v126_v28 }
  0x39   : > { %v207_v3 = vmul.f32 %v202_v60, %v202_v60  ;;  %v149_v32 = vsel %vm1676_vm15, %v1626_v57, %v127_v58 }
  0x3a   : > { %v161_v47 = vsub.f32 %v159_v45, %v160_v46 }
  0x3b   : > { %v208_v19 = vadd.f32 %v207_v3, %v206_v2 }
  0x3c   : > { %vm165_vm1 = vcmp.lt.f32.partialorder %v161_v47, 0.0  ;;  %vm166_vm2 = vcmp.eq.f32.partialorder %v161_v47, 0.0 }
  0x3d   : > { %vm168_vm4 = vmand %vm166_vm2, %vm167_vm0 }
  0x3e   : > { %vm1708_vm5 = vmor %vm165_vm1, %vm168_vm4  ;;  %vm238_vm4 = vcmp.gt.f32.partialorder %v1415_v9, 0.0 }
  0x3f   : > { %v172_v12 = vsel %vm1708_vm5, %v157_v20, %v150_v39  ;;  %v173_v61 = vsel %vm1708_vm5, %v158_v21, %v151_v40  ;;  %v174_v13 = vsel %vm1708_vm5, %v164_v36, %v152_v41  ;;  %v223_v20 = vsub.f32 %v1092_v4, %v1423_v11 }
  0x40   : > { %v181_v30 = vmul.f32 %v180_v38, %v172_v12  ;;  %v182_v62 = vmul.f32 %v179_v37, %v173_v61  ;;  %vm189_vm9 = vcmp.gt.f32.partialorder %v186_v55, %v174_v13  ;;  %v224_v21 = vsub.f32 %v1093_v5, %v1419_v10 }
  0x41   : > { %v228_v27 = vmul.f32 %v223_v20, %v223_v20  ;;  %v170_v43 = vsel %vm1708_vm5, %v1645_v16, %v148_v42  ;;  %v171_v18 = vsel %vm1708_vm5, %v1650_v17, %v149_v32 }
  0x42   : > { %v183_v1 = vsub.f32 %v181_v30, %v182_v62  ;;  %v229_v31 = vmul.f32 %v224_v21, %v224_v21 }
  0x44   : > { %vm187_vm6 = vcmp.lt.f32.partialorder %v183_v1, 0.0  ;;  %vm188_vm7 = vcmp.eq.f32.partialorder %v183_v1, 0.0  ;;  %v230_v36 = vadd.f32 %v229_v31, %v228_v27 }
  0x45   : > { %vm190_vm14 = vmand %vm188_vm7, %vm189_vm9 }
  0x46   : > { %vm1740_vm10 = vmor %vm187_vm6, %vm190_vm14 }
  0x47   : > { %v194_v22 = vsel %vm1740_vm10, %v179_v37, %v172_v12  ;;  %v195_v29 = vsel %vm1740_vm10, %v180_v38, %v173_v61  ;;  %v196_v23 = vsel %vm1740_vm10, %v186_v55, %v174_v13  ;;  %v192_v57 = vsel %vm1740_vm10, %v1669_v33, %v170_v43  ;;  %v1105_v12 = vld [vmem:[%s2445_s0 + $0xc8] sm:$0xff] (%p37_p1) }
  0x48   : > { %v203_v24 = vmul.f32 %v202_v60, %v194_v22  ;;  %v204_v25 = vmul.f32 %v201_v59, %v195_v29  ;;  %vm211_vm3 = vcmp.gt.f32.partialorder %v208_v19, %v196_v23  ;;  %v193_v40 = vsel %vm1740_vm10, %v1674_v34, %v171_v18 }
  0x49   :  { %v278_v55 = vmul.f32 (%p37_p1), %v1809_v53, %v1099_v54  ;;  %v289_v1 = vmul.f32 (%p37_p1), %v1105_v12, %v1804_v52 }
  0x4a   : > { %v205_v26 = vsub.f32 %v203_v24, %v204_v25 }
  0x4c   : > { %vm209_vm11 = vcmp.lt.f32.partialorder %v205_v26, 0.0  ;;  %vm210_vm8 = vcmp.eq.f32.partialorder %v205_v26, 0.0 }
  0x4d   : > { %vm212_vm12 = vmand %vm210_vm8, %vm211_vm3 }
  0x4e   : > { %vm213_vm13 = vmor %vm209_vm11, %vm212_vm12 }
  0x4f   : > { %v216_v37 = vsel %vm213_vm13, %v201_v59, %v194_v22  ;;  %v217_v56 = vsel %vm213_vm13, %v202_v60, %v195_v29  ;;  %v218_v38 = vsel %vm213_vm13, %v208_v19, %v196_v23  ;;  %v214_v17 = vsel %vm213_vm13, %v1693_v50, %v192_v57  ;;  %v1831_v60 = vld [vmem:[%s2445_s0 + $0xc0] sm:$0xff] (%p37_p1) }
  0x50   : > { %v225_v39 = vmul.f32 %v224_v21, %v216_v37  ;;  %v226_v35 = vmul.f32 %v223_v20, %v217_v56  ;;  %vm233_vm15 = vcmp.gt.f32.partialorder %v230_v36, %v218_v38  ;;  %v215_v41 = vsel %vm213_vm13, %v1698_v51, %v193_v40 }
  0x51   :  { %v280_v62 = vmul.f32 (%p37_p1), %v1831_v60, %v1099_v54 }
  0x52   : > { %v227_v16 = vsub.f32 %v225_v39, %v226_v35 }
  0x54   : > { %vm231_vm0 = vcmp.lt.f32.partialorder %v227_v16, 0.0  ;;  %vm232_vm1 = vcmp.eq.f32.partialorder %v227_v16, 0.0 }
  0x55   : > { %vm234_vm2 = vmand %vm232_vm1, %vm233_vm15 }
  0x56   : > { %vm235_vm5 = vmor %vm231_vm0, %vm234_vm2 }
  0x57   : > { %v236_v45 = vsel %vm235_vm5, %v1092_v4, %v214_v17  ;;  %v237_v46 = vsel %vm235_vm5, %v1093_v5, %v215_v41 }
  0x58   : > { %v239_v33 = vsel %vm238_vm4, %v236_v45, %v2447_v6   ;;  %v240_v47 = vsel %vm238_vm4, %v237_v46, %v2448_v7   ;;  %vm251_vm9 = vcmp.eq.f32.partialorder %v236_v45, %v2447_v6  ;;  %vm252_vm6 = vcmp.eq.f32.partialorder %v237_v46, %v2448_v7 }
  0x59   : > { %1095 = vst [vmem:[%s950_s25 + $0x8] sm:$0xff] %v239_v33  ;;  %v247_v34 = vmul.f32 %v1423_v11, %v240_v47  ;;  %v248_v48 = vmul.f32 %v1419_v10, %v239_v33  ;;  %vm253_vm7 = vmand %vm251_vm9, %vm252_vm6  ;;  %v2466_v10 = vmov %v240_v47  ;;  %v2467_v11 = vmov %v239_v33 }
  0x5a   : > { %1097 = vst [vmem:[%s953_s26 + $0x8] sm:$0xff] %v240_v47  ;;  %v254_v9 = vsel %vm253_vm7, 0.0, %v1415_v9   ;;  %v255_v11 = vmul.f32 (%p37_p1), %v239_v33, %v2448_v7  ;;  %v256_v51 = vmul.f32 (%p37_p1), %v240_v47, %v2447_v6  ;;  %v1103_v10 = vld [vmem:[%s2445_s0 + $0xb8] sm:$0xff] (%p37_p1)  ;;  %v1917_v46 = vmov (%p37_p1), 0.0  }
  0x5b   : > { %v249_v49 = vsub.f32 %v247_v34, %v248_v48  ;;  %39 = sbr.rel (!%p37_p1) target bundleno = 13 (0xd), region = 155  ;;  %300 = vst [vmem:[#allocation2 + $0x48] sm:$0xff] (%p37_p1), %v1804_v52  ;;  %v1101_v9 = vld [vmem:[%s2445_s0 + $0xa8] sm:$0xff] (%p37_p1)  ;;  %v277_v61 = vmul.f32 (%p37_p1), %v1103_v10, %v1804_v52 }
  0x5c   :  { %v257_v59 = vsub.f32 (%p37_p1), %v255_v11, %v256_v51  ;;  %302 = vst [vmem:[#allocation3 + $0x48] sm:$0xff] (%p37_p1), %v1809_v53  ;;  %v288_v30 = vmul.f32 (%p37_p1), %v1809_v53, %v1101_v9  ;;  %v285_v0 = vmul.f32 (%p37_p1), %v1831_v60, %v1101_v9 }
  0x5d   : > { %v250_v50 = vadd.f32 %v1411_v8, %v249_v49   ;;  %v279_v3 = vsub.f32 (%p37_p1), %v277_v61, %v278_v55  ;;  %310 = vst [vmem:[#allocation3 + $0x58] sm:$0xff] (%p37_p1), %v1831_v60 }
  0x5e   :  { %v290_v44 = vsub.f32 (%p37_p1), %v288_v30, %v289_v1 }
  0x5f   : > { %v2465_v8 = vmov %v250_v50  ;;  %v258_v2 = vadd.f32 (%p37_p1), %v257_v59, %v250_v50 }
  0x60   :  { %v1818_v8 = vld [vmem:[%s2445_s0 + $0xa0] sm:$0xff]  ;;  %s1919_s0 = smov 0  }
  0x61   :  { %v281_v13 = vmul.f32 %v1103_v10, %v1818_v8  ;;  %v284_v63 = vmul.f32 %v1105_v12, %v1818_v8  ;;  %308 = vst [vmem:[#allocation2 + $0x58] sm:$0xff] %v1818_v8  ;;  %v259_v14 = vand.u32 2147483647, %v258_v2 }
  0x63   :  { %v282_v4 = vsub.f32 %v280_v62, %v281_v13  ;;  %v286_v5 = vsub.f32 %v284_v63, %v285_v0  ;;  %v1845_v19 = vmul.f32 0.5, %v259_v14 }
  0x65   :  { %v283_v15 = vadd.f32 %v282_v4, %v279_v3 }
  0x67   :  { %v287_v20 = vadd.f32 %v286_v5, %v283_v15 }
  0x69   :  { %v291_v21 = vadd.f32 %v290_v44, %v287_v20 }
  0x6b   :  { %v292_v28 = vand.u32 2147483647, %v291_v21  ;;  %vm294_vm14 = vcmp.lt.f32.partialorder %v291_v21, 0.0 }
  0x6c   :  { %v1847_v22 = vsel %vm294_vm14, %v1101_v9, %v1099_v54  ;;  %v1849_v29 = vsel %vm294_vm14, %v1105_v12, %v1103_v10  ;;  %v1851_v58 = vsel %vm294_vm14, %v1099_v54, %v1101_v9  ;;  %v1853_v23 = vsel %vm294_vm14, %v1103_v10, %v1105_v12 }
  0x6d   :  { %v1855_v24 = vmul.f32 0.5, %v292_v28  ;;  %304 = vst [vmem:[#allocation2 + $0x50] sm:$0xff] %v1847_v22  ;;  %v1860_v25 = vsub.f32 %v1847_v22, %v1804_v52  ;;  %v1864_v26 = vsub.f32 %v1818_v8, %v1847_v22  ;;  %v1868_v27 = vsub.f32 %v1849_v29, %v1809_v53 }
  0x6e   :  { %306 = vst [vmem:[#allocation3 + $0x50] sm:$0xff] %v1849_v29  ;;  %v1873_v31 = vsub.f32 %v1831_v60, %v1849_v29  ;;  %v1877_v42 = vsub.f32 %v1851_v58, %v1818_v8  ;;  %v1881_v32 = vsub.f32 %v1804_v52, %v1851_v58  ;;  %v1885_v43 = vsub.f32 %v1853_v23, %v1831_v60 }
  0x6f   :  { %v317_v18 = vmul.f32 %v1809_v53, %v1860_v25  ;;  %v318_v36 = vmul.f32 %v1804_v52, %v1868_v27  ;;  %v322_v37 = vmul.f32 %v1864_v26, %v1849_v29  ;;  %312 = vst [vmem:[#allocation2 + $0x60] sm:$0xff] %v1851_v58  ;;  %v1896_v56 = vsub.f32 %v1809_v53, %v1853_v23 }
  0x70   :  { %v323_v38 = vmul.f32 %v1873_v31, %v1847_v22  ;;  %v327_v39 = vmul.f32 %v1831_v60, %v1877_v42  ;;  %314 = vst [vmem:[#allocation3 + $0x60] sm:$0xff] %v1853_v23  ;;  %v328_v35 = vmul.f32 %v1818_v8, %v1885_v43  ;;  %v332_v57 = vmul.f32 %v1881_v32, %v1853_v23 }
  0x71   :  { %v1907_v40 = vsub.f32 %v317_v18, %v318_v36  ;;  %v333_v16 = vmul.f32 %v1896_v56, %v1851_v58 }
  0x72   :  { %v1911_v17 = vsub.f32 %v322_v37, %v323_v38  ;;  %v1913_v41 = vsub.f32 %v327_v39, %v328_v35 }
  0x73   :  { %v1915_v45 = vsub.f32 %v332_v57, %v333_v16 }
  0x74 LB: > { %p342_p2 = scmp.eq.s32.totalorder %s1435_s0, 8  ;;  %s1925_s13 = sadd.s32 1, %s1435_s0   ;;  %vm1485_vm8 = vmmov 1   ;;  %s1435_s0 = sphi %s1919_s0, %s2485_s0   ;;  %v1431_v46 = vphi %v1917_v46, %v2484_v46  }
  0x75   : > { %s1106_s14 = sshll.u32 %s1435_s0, 3  ;;  %p337_p3 = scmp.ge.s32.totalorder %s1925_s13, 9  }
  0x76   : > { %s344_s16 = scalar_select %p342_p2, 0, %s1925_s13 }
  0x77   : > { %s346_s17 = scalar_lea.vmem [#allocation2], %s1106_s14  ;;  %s348_s18 = scalar_lea.vmem [#allocation3], %s1106_s14 }
  0x78   : > { %v1928_v33 = vld [vmem:[%s346_s17] sm:$0xff]  ;;  %s1107_s19 = sshll.u32 %s344_s16, 3  ;;  %s2485_s0 = smov %s1925_s13 }
  0x79   : > { %v1930_v47 = vld [vmem:[%s348_s18] sm:$0xff]  ;;  %v357_v48 = vmul.f32 %v1928_v33, %v1868_v27  ;;  %s351_s20 = scalar_lea.vmem [#allocation2], %s1107_s19  ;;  %s353_s21 = scalar_lea.vmem [#allocation3], %s1107_s19  ;;  %v380_v51 = vmul.f32 %v1928_v33, %v1873_v31  ;;  %v403_v9 = vmul.f32 %v1928_v33, %v1885_v43  ;;  %v426_v3 = vmul.f32 %v1928_v33, %v1896_v56 }
  0x7a   : > { %v356_v34 = vmul.f32 %v1930_v47, %v1860_v25  ;;  %v379_v49 = vmul.f32 %v1930_v47, %v1864_v26  ;;  %v1938_v50 = vld [vmem:[%s351_s20] sm:$0xff]  ;;  %v402_v54 = vmul.f32 %v1930_v47, %v1877_v42  ;;  %v425_v10 = vmul.f32 %v1930_v47, %v1881_v32  ;;  %s2075_s22 = smov (%p337_p3), 0  }
  0x7b   : > { %v1940_v11 = vld [vmem:[%s353_s21] sm:$0xff]  ;;  %v361_v12 = vmul.f32 %v1938_v50, %v1868_v27  ;;  %v384_v30 = vmul.f32 %v1938_v50, %v1873_v31  ;;  %v407_v2 = vmul.f32 %v1938_v50, %v1885_v43  ;;  %v430_v18 = vmul.f32 %v1938_v50, %v1896_v56 }
  0x7c   : > { %v358_v55 = vsub.f32 %v356_v34, %v357_v48  ;;  %v360_v59 = vmul.f32 %v1940_v11, %v1860_v25  ;;  %v383_v61 = vmul.f32 %v1940_v11, %v1864_v26  ;;  %v381_v13 = vsub.f32 %v379_v49, %v380_v51 }
  0x7d   : > { %v404_v62 = vsub.f32 %v402_v54, %v403_v9  ;;  %v406_v63 = vmul.f32 %v1940_v11, %v1877_v42  ;;  %v429_v15 = vmul.f32 %v1940_v11, %v1881_v32  ;;  %v427_v21 = vsub.f32 %v425_v10, %v426_v3 }
  0x7e   : > { %v359_v0 = vsub.f32 %v358_v55, %v1907_v40  ;;  %v362_v1 = vsub.f32 %v360_v59, %v361_v12  ;;  %v382_v4 = vsub.f32 %v381_v13, %v1911_v17  ;;  %v385_v5 = vsub.f32 %v383_v61, %v384_v30 }
  0x7f   : > { %v405_v14 = vsub.f32 %v404_v62, %v1913_v41  ;;  %v408_v20 = vsub.f32 %v406_v63, %v407_v2  ;;  %v428_v35 = vsub.f32 %v427_v21, %v1915_v45  ;;  %v431_v57 = vsub.f32 %v429_v15, %v430_v18 }
  0x80   : > { %v363_v44 = vsub.f32 %v362_v1, %v1907_v40  ;;  %vm364_vm10 = vcmp.ge.f32.partialorder %v359_v0, 0.0  ;;  %v386_v28 = vsub.f32 %v385_v5, %v1911_v17  ;;  %vm387_vm3 = vcmp.ge.f32.partialorder %v382_v4, 0.0 }
  0x81   : > { %vm369_vm12 = vmxor %vm364_vm10, %vm1485_vm8  ;;  %v409_v37 = vsub.f32 %v408_v20, %v1913_v41  ;;  %vm355_vm0 = vcmp.ge.f32.partialorder %v1928_v33, %v1928_v33  ;;  %v432_v48 = vsub.f32 %v431_v57, %v1915_v45  ;;  %vm410_vm14 = vcmp.ge.f32.partialorder %v405_v14, 0.0 }
  0x82   : > { %vm365_vm11 = vcmp.ge.f32.partialorder %v363_v44, 0.0  ;;  %v366_v36 = vsub.f32 %v359_v0, %v363_v44  ;;  %v389_v38 = vsub.f32 %v382_v4, %v386_v28  ;;  %vm1978_vm13 = vmxor %vm387_vm3, %vm1485_vm8  ;;  %vm388_vm4 = vcmp.ge.f32.partialorder %v386_v28, 0.0 }
  0x83   : > { %vm373_vm15 = vmxor %vm365_vm11, %vm1485_vm8  ;;  %v412_v16 = vsub.f32 %v405_v14, %v409_v37  ;;  %v435_v51 = vsub.f32 %v428_v35, %v432_v48 }
  0x84   : > { %1295 = vrcp.f32 %v366_v36  ;;  %vm1988_vm1 = vmand %vm365_vm11, %vm369_vm12  ;;  %vm411_vm12 = vcmp.ge.f32.partialorder %v409_v37, 0.0 }
  0x85   : > { %1297 = vrcp.f32 %v389_v38  ;;  %vm377_vm2 = vmor %vm364_vm10, %vm365_vm11  ;;  %v450_v38 = vsub.f32 %v1938_v50, %v1928_v33 }
  0x86   : > { %1299 = vrcp.f32 %v412_v16  ;;  %vm1996_vm5 = vmand %vm364_vm10, %vm373_vm15 }
  0x87   : > { %vm2000_vm9 = vmand %vm355_vm0, %vm377_vm2  ;;  %1301 = vrcp.f32 %v435_v51  ;;  %vm433_vm2 = vcmp.ge.f32.partialorder %v428_v35, 0.0 }
  0x88   : > { %vm396_vm6 = vmxor %vm388_vm4, %vm1485_vm8 }
  0x89   : > { %vm2007_vm7 = vmand %vm388_vm4, %vm1978_vm13 }
  0x8a   : > { %v1296_v9 = vpop.eup %1295  ;;  %vm2012_vm10 = vmor %vm387_vm3, %vm388_vm4 }
  0x8b   : > { %v1298_v55 = vpop.eup %1297  ;;  %v368_v59 = vmul.f32 %v1296_v9, %v359_v0  ;;  %vm2017_vm11 = vmand %vm387_vm3, %vm396_vm6  ;;  %vm434_vm6 = vcmp.ge.f32.partialorder %v432_v48, 0.0 }
  0x8c   : > { %v1300_v61 = vpop.eup %1299  ;;  %v391_v13 = vmul.f32 %v1298_v55, %v382_v4  ;;  %vm415_vm13 = vmxor %vm410_vm14, %vm1485_vm8 }
  0x8d   : > { %v371_v62 = vmax.f32 %v368_v59, 0.0  ;;  %v375_v63 = vmin.f32 %v368_v59, 1.0  ;;  %vm401_vm15 = vmand %vm2000_vm9, %vm2012_vm10  ;;  %v1302_v0 = vpop.eup %1301  ;;  %v414_v3 = vmul.f32 %v1300_v61, %v405_v14  ;;  %v451_v14 = vsub.f32 %v1940_v11, %v1930_v47 }
  0x8e   : > { %vm419_vm3 = vmxor %vm411_vm12, %vm1485_vm8  ;;  %v437_v20 = vmul.f32 %v1302_v0, %v428_v35 }
  0x8f   : > { %v372_v1 = vsel %vm1988_vm1, %v371_v62, 0.0  ;;  %v376_v2 = vsel %vm1996_vm5, %v375_v63, 1.0  ;;  %vm416_vm0 = vmand %vm411_vm12, %vm415_vm13 }
  0x90   : > { %v394_v4 = vmax.f32 %v372_v1, %v391_v13  ;;  %v398_v5 = vmin.f32 %v376_v2, %v391_v13  ;;  %vm420_vm4 = vmand %vm410_vm14, %vm419_vm3 }
  0x91   : > { %vm423_vm1 = vmor %vm410_vm14, %vm411_vm12 }
  0x92   : > { %v395_v15 = vsel %vm2007_vm7, %v394_v4, %v372_v1  ;;  %v399_v44 = vsel %vm2017_vm11, %v398_v5, %v376_v2  ;;  %vm438_vm5 = vmxor %vm433_vm2, %vm1485_vm8 }
  0x93   : > { %v417_v21 = vmax.f32 %v395_v15, %v414_v3  ;;  %v421_v28 = vmin.f32 %v399_v44, %v414_v3  ;;  %vm439_vm13 = vmand %vm434_vm6, %vm438_vm5 }
  0x94   : > { %vm442_vm3 = vmxor %vm434_vm6, %vm1485_vm8 }
  0x95   : > { %v418_v18 = vsel %vm416_vm0, %v417_v21, %v395_v15  ;;  %v422_v36 = vsel %vm420_vm4, %v421_v28, %v399_v44  ;;  %vm443_vm7 = vmand %vm433_vm2, %vm442_vm3 }
  0x96   : > { %v440_v37 = vmax.f32 %v418_v18, %v437_v20  ;;  %v444_v39 = vmin.f32 %v422_v36, %v437_v20  ;;  %vm2056_vm14 = vmand %vm401_vm15, %vm423_vm1 }
  0x97   : > { %vm446_vm8 = vmor %vm433_vm2, %vm434_vm6 }
  0x98   : > { %v441_v16 = vsel %vm439_vm13, %v440_v37, %v418_v18  ;;  %v445_v34 = vsel %vm443_vm7, %v444_v39, %v422_v36  ;;  %vm447_vm9 = vmand %vm2056_vm14, %vm446_vm8 }
  0x99   : > { %v452_v50 = vmul.f32 %v450_v38, %v441_v16  ;;  %v454_v11 = vmul.f32 %v451_v14, %v441_v16  ;;  %v456_v49 = vmul.f32 %v450_v38, %v445_v34  ;;  %v458_v51 = vmul.f32 %v451_v14, %v445_v34 }
  0x9a   : > { %vm448_vm10 = vcmp.le.f32.partialorder %v441_v16, %v445_v34 }
  0x9b   : > { %v453_v9 = vadd.f32 %v452_v50, %v1928_v33  ;;  %v455_v54 = vadd.f32 %v454_v11, %v1930_v47  ;;  %v457_v10 = vadd.f32 %v456_v49, %v1928_v33  ;;  %v459_v55 = vadd.f32 %v458_v51, %v1930_v47  ;;  %vm449_vm11 = vmand %vm447_vm9, %vm448_vm10 }
  0x9d   : > { %v461_v59 = vmul.f32 %v457_v10, %v455_v54  ;;  %v460_v48 = vmul.f32 %v459_v55, %v453_v9 }
  0x9f   : > { %v462_v35 = vsub.f32 %v460_v48, %v461_v59 }
  0xa0   :  { %339 = sbr.rel (!%p337_p3) target bundleno = 116 (0x74), region = 166 }
  0xa1   : > { %v463_v12 = vsel %vm449_vm11, %v462_v35, 0.0 }
  0xa2   : > { %v464_v61 = vadd.f32 %v1431_v46, %v463_v12  }
  0xa4   : > { %v2484_v46 = vmov %v464_v61 }
  0xa5 LB: > { %p471_p4 = scmp.eq.s32.totalorder %s1439_s22, 8  ;;  %s2078_s23 = sadd.s32 1, %s1439_s22   ;;  %v1486_v43 = vmov 0.0   ;;  %s1439_s22 = sphi %s2075_s22, %s2486_s22  }
  0xa6   : > { %s1108_s24 = sshll.u32 %s1439_s22, 3  ;;  %p467_p5 = scmp.ge.s32.totalorder %s2078_s23, 9  }
  0xa7   : > { %s473_s25 = scalar_select %p471_p4, 0, %s2078_s23 }
  0xa8   : > { %s475_s26 = scalar_lea.vmem [#allocation2], %s1108_s24  ;;  %s477_s28 = scalar_lea.vmem [#allocation3], %s1108_s24 }
  0xa9   : > { %v476_v46 = vld [vmem:[%s475_s26] sm:$0xff]  ;;  %s1109_s27 = sshll.u32 %s473_s25, 3  ;;  %s489_s2 = scalar_lea.vmem [#allocation4], %s1108_s24 }
  0xaa   : > { %v478_v33 = vld [vmem:[%s477_s28] sm:$0xff]  ;;  %s480_s29 = scalar_lea.vmem [#allocation2], %s1109_s27  ;;  %s483_s30 = scalar_lea.vmem [#allocation3], %s1109_s27 }
  0xab   : > { %v481_v47 = vld [vmem:[%s480_s29] sm:$0xff]  ;;  %s491_s3 = scalar_lea.vmem [#allocation5], %s1108_s24  ;;  %s498_s15 = scalar_lea.vmem [#allocation6], %s1108_s24 }
  0xac   : > { %v484_v25 = vld [vmem:[%s483_s30] sm:$0xff]  ;;  %v482_v26 = vsub.f32 %v481_v47, %v476_v46  ;;  %s2486_s22 = smov %s2078_s23  ;;  %s2087_s4 = smov (%p467_p5), 0  }
  0xad   : > { %v485_v27 = vsub.f32 %v484_v25, %v478_v33 }
  0xae   : > { %490 = vst [vmem:[%s489_s2] sm:$0xff] %v482_v26  ;;  %vm486_vm12 = vcmp.eq.f32.partialorder %v482_v26, 0.0  ;;  %v493_v31 = vmul.f32 %v482_v26, %v478_v33 }
  0xaf   : > { %vm487_vm15 = vcmp.eq.f32.partialorder %v485_v27, 0.0  ;;  %v494_v42 = vmul.f32 %v485_v27, %v476_v46  ;;  %492 = vst [vmem:[%s491_s3] sm:$0xff] %v485_v27 }
  0xb0   : > { %vm488_vm0 = vmand %vm486_vm12, %vm487_vm15 }
  0xb1   : > { %v495_v32 = vsub.f32 %v493_v31, %v494_v42  ;;  %v496_v56 = vsel %vm488_vm0, 1.0, %v1486_v43  ;;  %469 = sbr.rel (!%p467_p5) target bundleno = 165 (0xa5), region = 177 }
  0xb3   : > { %v497_v40 = vsub.f32 %v495_v32, %v496_v56 }
  0xb5   : > { %499 = vst [vmem:[%s498_s15] sm:$0xff] %v497_v40 }
  0xb6 LB: > { %p508_p6 = scmp.eq.s32.totalorder %s1447_s4, 3  ;;  %s509_s5 = sadd.s32 10, %s1447_s4  ;;  %v1449_v30 = vmov 1.0   ;;  %v1453_v62 = vmov 1.0   ;;  %v1457_v63 = vmov 0.0   ;;  %s1447_s4 = sphi %s2087_s4, %s505_s4   ;;  %v1443_v61 = vphi %v464_v61, %v2487_v61  }
  0xb7   : > { %s1110_s6 = sshll.u32 %s1447_s4, 3  ;;  %s2102_s12 = smov 0  }
  0xb8   : > { %s2513_s5 = smov (%p508_p6, %s509_s5), 9  ;;  %s978_s7 = scalar_lea.vmem [#allocation2], %s1110_s6 }
  0xb9   : > { %v2098_v17 = vld [vmem:[%s978_s7 + $0x48] sm:$0xff]  ;;  %s981_s8 = scalar_lea.vmem [#allocation3], %s1110_s6  ;;  %s1114_s9 = sshll.u32 %s2513_s5, 3 }
  0xba   : > { %v2100_v41 = vld [vmem:[%s981_s8 + $0x48] sm:$0xff]  ;;  %s517_s10 = scalar_lea.vmem [#allocation2], %s1114_s9  ;;  %s519_s11 = scalar_lea.vmem [#allocation3], %s1114_s9 }
  0xbb   : > { %v518_v45 = vld [vmem:[%s517_s10] sm:$0xff] }
  0xbc   : > { %v520_v13 = vld [vmem:[%s519_s11] sm:$0xff] }
  0xbd LB: >> { %s1115_s0 = sshll.u32 %s1463_s12, 3  ;;  %vm1487_vm1 = vmmov 1   ;;  %s526_s12 = sadd.s32 1, %s1463_s12   ;;  %s1463_s12 = sphi %s2102_s12, %s526_s12   ;;  %v1459_v63 = vphi %v1457_v63, %v1458_v63   ;;  %v1455_v62 = vphi %v1453_v62, %v1454_v62   ;;  %v1451_v30 = vphi %v1449_v30, %v1450_v30  }
  0xbe   : >> { %s531_s13 = scalar_lea.vmem [#allocation4], %s1115_s0  ;;  %s533_s14 = scalar_lea.vmem [#allocation5], %s1115_s0 }
  0xbf   : >> { %v532_v0 = vld [vmem:[%s531_s13] sm:$0xff]  ;;  %s535_s16 = scalar_lea.vmem [#allocation6], %s1115_s0  ;;  %p523_p7 = scmp.ge.s32.totalorder %s526_s12, 9  }
  0xc0   : >> { %v534_v1 = vld [vmem:[%s533_s14] sm:$0xff]  ;;  %v537_v2 = vmul.f32 %v2100_v41, %v532_v0  ;;  %v541_v4 = vmul.f32 %v532_v0, %v520_v13  ;;  %v563_v34 = vsub.f32 (%p523_p7), %v518_v45, %v2098_v17  ;;  %v564_v50 = vsub.f32 (%p523_p7), %v520_v13, %v2100_v41  ;;  %s505_s4 = sadd.s32 (%p523_p7), 1, %s1447_s4  }
  0xc1   : >> { %v538_v3 = vmul.f32 %v2098_v17, %v534_v1  ;;  %v542_v5 = vmul.f32 %v534_v1, %v518_v45  ;;  %v536_v15 = vld [vmem:[%s535_s16] sm:$0xff]  ;;  %p502_p8 = scmp.ge.s32.totalorder (%p523_p7), %s505_s4, 4  }
  0xc3   : >> { %v539_v44 = vsub.f32 %v537_v2, %v538_v3  ;;  %v543_v20 = vsub.f32 %v541_v4, %v542_v5 }
  0xc5   : >> { %v540_v21 = vsub.f32 %v539_v44, %v536_v15  ;;  %v544_v28 = vsub.f32 %v543_v20, %v536_v15 }
  0xc7   : >> { %v547_v18 = vsub.f32 %v540_v21, %v544_v28  ;;  %vm545_vm2 = vcmp.gt.f32.partialorder %v540_v21, 0.0  ;;  %vm546_vm4 = vcmp.gt.f32.partialorder %v544_v28, 0.0 }
  0xc8   : >> { %vm558_vm6 = vmor %vm545_vm2, %vm546_vm4 }
  0xc9   : >> { %1303 = vrcp.f32 %v547_v18  ;;  %vm550_vm5 = vmxor %vm545_vm2, %vm1487_vm1  ;;  %v559_v36 = vsel %vm558_vm6, %v1451_v30, 0.0  }
  0xca   : >> { %vm554_vm13 = vmxor %vm546_vm4, %vm1487_vm1  ;;  %v1450_v30 = vmov %v559_v36   ;;  %vm560_vm14 = vcmp.gt.f32.partialorder (%p523_p7), %v559_v36, 0.0 }
  0xcb   : >> { %vm551_vm3 = vmand %vm546_vm4, %vm550_vm5 }
  0xcc   : >> { %vm555_vm7 = vmand %vm545_vm2, %vm554_vm13 }
  0xcf   : >> { %v1304_v38 = vpop.eup %1303 }
  0xd0   : >> { %v549_v14 = vmul.f32 %v1304_v38, %v540_v21 }
  0xd1   : > { %525 = sbr.rel (!%p523_p7) target bundleno = 189 (0xbd), region = 188 }
  0xd2   : >> { %v552_v37 = vmax.f32 %v1459_v63, %v549_v14  ;;  %v556_v39 = vmin.f32 %v1455_v62, %v549_v14 }
  0xd4   : >> { %v553_v57 = vsel %vm551_vm3, %v552_v37, %v1459_v63   ;;  %v557_v16 = vsel %vm555_vm7, %v556_v39, %v1455_v62  }
  0xd5   : >> { %v1454_v62 = vmov %v557_v16   ;;  %v1458_v63 = vmov %v553_v57   ;;  %v565_v11 = vmul.f32 (%p523_p7), %v563_v34, %v553_v57  ;;  %v567_v49 = vmul.f32 (%p523_p7), %v564_v50, %v553_v57 }
  0xd6   : > { %v569_v51 = vmul.f32 %v563_v34, %v557_v16  ;;  %v571_v9 = vmul.f32 %v564_v50, %v557_v16  ;;  %vm561_vm8 = vcmp.le.f32.partialorder %v553_v57, %v557_v16  ;;  %vm580_vm10 = vcmp.lt.f32.partialorder (%p502_p8), %v1809_v53, %v2448_v7  ;;  %s2167_s17 = smov (%p502_p8), 0  }
  0xd7   : > { %v566_v54 = vadd.f32 %v2098_v17, %v565_v11  ;;  %v568_v10 = vadd.f32 %v2100_v41, %v567_v49  ;;  %vm562_vm9 = vmand %vm560_vm14, %vm561_vm8  ;;  %vm581_vm11 = vcmp.eq.f32.partialorder (%p502_p8), %v1809_v53, %v2448_v7  ;;  %vm582_vm12 = vcmp.lt.f32.partialorder (%p502_p8), %v1804_v52, %v2447_v6 }
  0xd8   : > { %v570_v55 = vadd.f32 %v2098_v17, %v569_v51  ;;  %v572_v59 = vadd.f32 %v2100_v41, %v571_v9  ;;  %vm583_vm15 = vmand (%p502_p8), %vm581_vm11, %vm582_vm12 }
  0xd9   :  { %vm584_vm0 = vmor (%p502_p8), %vm580_vm10, %vm583_vm15 }
  0xda   : > { %v573_v48 = vmul.f32 %v572_v59, %v566_v54  ;;  %v574_v35 = vmul.f32 %v570_v55, %v568_v10  ;;  %v585_v25 = vsel (%p502_p8), %vm584_vm0, %v1804_v52, %v2447_v6  ;;  %v586_v26 = vsel (%p502_p8), %vm584_vm0, %v1809_v53, %v2448_v7 }
  0xdb   :  { %vm587_vm2 = vcmp.lt.f32.partialorder (%p502_p8), %v1849_v29, %v586_v26  ;;  %vm588_vm4 = vcmp.eq.f32.partialorder (%p502_p8), %v1849_v29, %v586_v26  ;;  %vm589_vm6 = vcmp.lt.f32.partialorder (%p502_p8), %v1847_v22, %v585_v25 }
  0xdc   : > { %v575_v12 = vsub.f32 %v573_v48, %v574_v35  ;;  %vm590_vm1 = vmand (%p502_p8), %vm588_vm4, %vm589_vm6 }
  0xdd   :  { %504 = sbr.rel (!%p502_p8) target bundleno = 182 (0xb6), region = 199  ;;  %vm591_vm5 = vmor (%p502_p8), %vm587_vm2, %vm590_vm1 }
  0xde   : > { %v576_v46 = vsel %vm562_vm9, %v575_v12, 0.0  ;;  %v592_v27 = vsel (%p502_p8), %vm591_vm5, %v1847_v22, %v585_v25  ;;  %v593_v31 = vsel (%p502_p8), %vm591_vm5, %v1849_v29, %v586_v26  ;;  %v2157_v22 = vmov (%p502_p8), 0.0  }
  0xdf   : > { %v577_v33 = vadd.f32 %v1443_v61, %v576_v46   ;;  %vm594_vm13 = vcmp.lt.f32.partialorder (%p502_p8), %v1831_v60, %v593_v31  ;;  %vm595_vm3 = vcmp.eq.f32.partialorder (%p502_p8), %v1831_v60, %v593_v31  ;;  %vm596_vm7 = vcmp.lt.f32.partialorder (%p502_p8), %v1818_v8, %v592_v27 }
  0xe0   :  { %vm597_vm14 = vmand (%p502_p8), %vm595_vm3, %vm596_vm7  ;;  %v2159_v29 = vmov (%p502_p8), 1.0  }
  0xe1   : > { %v2487_v61 = vmov %v577_v33  ;;  %v2125_v47 = vmul.f32 (%p502_p8), 0.5, %v577_v33  ;;  %vm598_vm8 = vmor (%p502_p8), %vm594_vm13, %vm597_vm14 }
  0xe2   :  { %v599_v6 = vsel %vm598_vm8, %v1818_v8, %v592_v27  ;;  %v600_v7 = vsel %vm598_vm8, %v1831_v60, %v593_v31 }
  0xe3   :  { %v579_v61 = vmax.f32 %v2125_v47, 0.0  ;;  %vm601_vm9 = vcmp.lt.f32.partialorder %v1853_v23, %v600_v7  ;;  %vm602_vm10 = vcmp.eq.f32.partialorder %v1853_v23, %v600_v7  ;;  %vm603_vm11 = vcmp.lt.f32.partialorder %v1851_v58, %v599_v6 }
  0xe4   :  { %vm604_vm12 = vmand %vm602_vm10, %vm603_vm11 }
  0xe5   :  { %vm605_vm15 = vmor %vm601_vm9, %vm604_vm12 }
  0xe6   :  { %v2152_v52 = vsel %vm605_vm15, %v1851_v58, %v599_v6   ;;  %v2155_v53 = vsel %vm605_vm15, %v1853_v23, %v600_v7  }
  0xe7   :  { %v2488_v8 = vmov %v2155_v53  ;;  %v2489_v60 = vmov %v2152_v52 }
  0xe8 LB: > { %v618_v58 = vld [vmem:[#allocation2] sm:$0xff]  ;;  %v619_v23 = vld [vmem:[#allocation3] sm:$0xff]  ;;  %v641_v32 = vld [vmem:[#allocation3 + $0x8] sm:$0xff]  ;;  %s613_s17 = sadd.s32 1, %s1483_s17   ;;  %s1483_s17 = sphi %s2167_s17, %s613_s17   ;;  %v1479_v60 = vphi %v2489_v60, %v2511_v60   ;;  %v1475_v8 = vphi %v2488_v8, %v2510_v8   ;;  %v1471_v29 = vphi %v2159_v29, %v2509_v29   ;;  %v1467_v22 = vphi %v2157_v22, %v2508_v22  }
  0xe9   : > { %v639_v42 = vld [vmem:[#allocation2 + $0x8] sm:$0xff]  ;;  %v620_v43 = vsub.f32 %v618_v58, %v1479_v60  ;;  %v621_v56 = vsub.f32 %v619_v23, %v1475_v8  ;;  %v643_v17 = vsub.f32 %v641_v32, %v1475_v8  ;;  %v2188_v2 = vld [vmem:[#allocation2 + $0x10] sm:$0xff]  ;;  %v2190_v3 = vld [vmem:[#allocation3 + $0x10] sm:$0xff]  ;;  %p610_p9 = scmp.ge.s32.totalorder %s613_s17, 13  }
  0xea   : > { %v642_v40 = vsub.f32 %v639_v42, %v1479_v60  ;;  %v664_v15 = vsub.f32 %v2188_v2, %v1479_v60  ;;  %v665_v44 = vsub.f32 %v2190_v3, %v1475_v8  ;;  %v683_v16 = vld [vmem:[#allocation2 + $0x18] sm:$0xff]  ;;  %v685_v34 = vld [vmem:[#allocation3 + $0x18] sm:$0xff]  ;;  %v2216_v25 = vld [vmem:[#allocation3 + $0x20] sm:$0xff] }
  0xeb   : > { %v622_v41 = vmul.f32 0.0, %v621_v56  ;;  %v623_v45 = vmul.f32 0.0, %v620_v43  ;;  %v625_v13 = vmul.f32 %v620_v43, %v620_v43  ;;  %v626_v30 = vmul.f32 %v621_v56, %v621_v56  ;;  %v2214_v33 = vld [vmem:[#allocation2 + $0x20] sm:$0xff] }
  0xec   : > { %v647_v0 = vmul.f32 %v642_v40, %v642_v40  ;;  %v648_v1 = vmul.f32 %v643_v17, %v643_v17  ;;  %v669_v39 = vmul.f32 %v664_v15, %v664_v15  ;;  %v670_v57 = vmul.f32 %v665_v44, %v665_v44 }
  0xed   : > { %v624_v62 = vsub.f32 %v622_v41, %v623_v45  ;;  %v627_v63 = vadd.f32 %v626_v30, %v625_v13  ;;  %v686_v11 = vsub.f32 %v683_v16, %v1479_v60  ;;  %v687_v49 = vsub.f32 %v685_v34, %v1475_v8  ;;  %v2238_v45 = vld [vmem:[#allocation2 + $0x28] sm:$0xff]  ;;  %v2240_v13 = vld [vmem:[#allocation3 + $0x28] sm:$0xff] }
  0xee   : > { %v649_v5 = vadd.f32 %v648_v1, %v647_v0  ;;  %v671_v50 = vadd.f32 %v670_v57, %v669_v39  ;;  %v708_v31 = vsub.f32 %v2214_v33, %v1479_v60  ;;  %v709_v6 = vsub.f32 %v2216_v25, %v1475_v8 }
  0xef   : > { %vm628_vm0 = vcmp.lt.f32.partialorder %v624_v62, 0.0  ;;  %vm629_vm2 = vcmp.eq.f32.partialorder %v624_v62, 0.0  ;;  %vm630_vm4 = vcmp.gt.f32.partialorder %v627_v63, 0.0  ;;  %v691_v12 = vmul.f32 %v686_v11, %v686_v11 }
  0xf0   : > { %vm631_vm6 = vmand %vm629_vm2, %vm630_vm4  ;;  %v692_v46 = vmul.f32 %v687_v49, %v687_v49  ;;  %v714_v41 = vmul.f32 %v709_v6, %v709_v6  ;;  %v730_v62 = vsub.f32 %v2238_v45, %v1479_v60 }
  0xf1   : > { %vm2192_vm1 = vmor %vm628_vm0, %vm631_vm6 }
  0xf2   : > { %v633_v20 = vsel %vm2192_vm1, %v618_v58, %v1479_v60  ;;  %v634_v21 = vsel %vm2192_vm1, %v619_v23, %v1475_v8  ;;  %v635_v28 = vsel %vm2192_vm1, %v620_v43, 0.0  ;;  %v636_v18 = vsel %vm2192_vm1, %v621_v56, 0.0 }
  0xf3   : > { %v637_v36 = vsel %vm2192_vm1, %v627_v63, 0.0  ;;  %v644_v38 = vmul.f32 %v643_v17, %v635_v28  ;;  %v645_v14 = vmul.f32 %v642_v40, %v636_v18  ;;  %v693_v27 = vadd.f32 %v692_v46, %v691_v12 }
  0xf4   : > { %vm652_vm5 = vcmp.gt.f32.partialorder %v649_v5, %v637_v36  ;;  %v731_v63 = vsub.f32 %v2240_v13, %v1475_v8 }
  0xf5   : > { %v646_v37 = vsub.f32 %v644_v38, %v645_v14 }
  0xf7   : > { %vm650_vm13 = vcmp.lt.f32.partialorder %v646_v37, 0.0  ;;  %vm651_vm3 = vcmp.eq.f32.partialorder %v646_v37, 0.0 }
  0xf8   : > { %vm653_vm7 = vmand %vm651_vm3, %vm652_vm5 }
  0xf9   : > { %vm654_vm14 = vmor %vm650_vm13, %vm653_vm7 }
  0xfa   : > { %v655_v51 = vsel %vm654_vm14, %v639_v42, %v633_v20  ;;  %v656_v9 = vsel %vm654_vm14, %v641_v32, %v634_v21  ;;  %v657_v54 = vsel %vm654_vm14, %v642_v40, %v635_v28  ;;  %v658_v10 = vsel %vm654_vm14, %v643_v17, %v636_v18  ;;  %v2250_v28 = vld [vmem:[#allocation2 + $0x30] sm:$0xff]  ;;  %v2252_v18 = vld [vmem:[#allocation3 + $0x30] sm:$0xff] }
  0xfb   : > { %v659_v55 = vsel %vm654_vm14, %v649_v5, %v637_v36  ;;  %v666_v59 = vmul.f32 %v665_v44, %v657_v54  ;;  %v667_v48 = vmul.f32 %v664_v15, %v658_v10  ;;  %v713_v17 = vmul.f32 %v708_v31, %v708_v31 }
  0xfc   : > { %vm674_vm8 = vcmp.gt.f32.partialorder %v671_v50, %v659_v55  ;;  %v735_v20 = vmul.f32 %v730_v62, %v730_v62  ;;  %v736_v21 = vmul.f32 %v731_v63, %v731_v63  ;;  %v752_v14 = vsub.f32 %v2250_v28, %v1479_v60 }
  0xfd   : > { %v668_v35 = vsub.f32 %v666_v59, %v667_v48  ;;  %v715_v30 = vadd.f32 %v714_v41, %v713_v17  ;;  %v753_v37 = vsub.f32 %v2252_v18, %v1475_v8 }
  0xfe   : > { %v737_v38 = vadd.f32 %v736_v21, %v735_v20 }
  0xff   : > { %vm672_vm9 = vcmp.lt.f32.partialorder %v668_v35, 0.0  ;;  %vm673_vm10 = vcmp.eq.f32.partialorder %v668_v35, 0.0 }
 0x100   : > { %vm675_vm11 = vmand %vm673_vm10, %vm674_vm8 }
 0x101   : > { %vm2218_vm12 = vmor %vm672_vm9, %vm675_vm11 }
 0x102   : > { %v677_v7 = vsel %vm2218_vm12, %v2188_v2, %v655_v51  ;;  %v678_v58 = vsel %vm2218_vm12, %v2190_v3, %v656_v9  ;;  %v679_v23 = vsel %vm2218_vm12, %v664_v15, %v657_v54  ;;  %v680_v42 = vsel %vm2218_vm12, %v665_v44, %v658_v10  ;;  %v2276_v10 = vld [vmem:[#allocation2 + $0x38] sm:$0xff] }
 0x103   : > { %v681_v32 = vsel %vm2218_vm12, %v671_v50, %v659_v55  ;;  %v688_v43 = vmul.f32 %v687_v49, %v679_v23  ;;  %v689_v56 = vmul.f32 %v686_v11, %v680_v42  ;;  %v757_v9 = vmul.f32 %v752_v14, %v752_v14  ;;  %v2278_v55 = vld [vmem:[#allocation3 + $0x38] sm:$0xff] }
 0x104   : > { %vm696_vm15 = vcmp.gt.f32.partialorder %v693_v27, %v681_v32  ;;  %v758_v54 = vmul.f32 %v753_v37, %v753_v37  ;;  %v774_v35 = vsub.f32 %v2276_v10, %v1479_v60  ;;  %v775_v12 = vsub.f32 %v2278_v55, %v1475_v8 }
 0x105   : > { %v690_v40 = vsub.f32 %v688_v43, %v689_v56 }
 0x106   : > { %v759_v48 = vadd.f32 %v758_v54, %v757_v9  ;;  %v2330_v54 = vld [vmem:[#allocation2 + $0x50] sm:$0xff] }
 0x107   : > { %vm694_vm0 = vcmp.lt.f32.partialorder %v690_v40, 0.0  ;;  %vm695_vm2 = vcmp.eq.f32.partialorder %v690_v40, 0.0 }
 0x108   : > { %vm697_vm4 = vmand %vm695_vm2, %vm696_vm15 }
 0x109   : > { %vm698_vm6 = vmor %vm694_vm0, %vm697_vm4 }
 0x10a   : > { %v2246_v0 = vsel %vm698_vm6, %v683_v16, %v677_v7  ;;  %v2248_v1 = vsel %vm698_vm6, %v685_v34, %v678_v58  ;;  %v701_v2 = vsel %vm698_vm6, %v686_v11, %v679_v23  ;;  %v702_v3 = vsel %vm698_vm6, %v687_v49, %v680_v42  ;;  %v2294_v42 = vld [vmem:[#allocation2 + $0x40] sm:$0xff] }
 0x10b   : > { %v703_v4 = vsel %vm698_vm6, %v693_v27, %v681_v32  ;;  %v710_v5 = vmul.f32 %v709_v6, %v701_v2  ;;  %v711_v15 = vmul.f32 %v708_v31, %v702_v3  ;;  %v779_v58 = vmul.f32 %v774_v35, %v774_v35  ;;  %v2296_v32 = vld [vmem:[#allocation3 + $0x40] sm:$0xff] }
 0x10c   : > { %vm718_vm1 = vcmp.gt.f32.partialorder %v715_v30, %v703_v4  ;;  %v780_v23 = vmul.f32 %v775_v12, %v775_v12  ;;  %v796_v40 = vsub.f32 %v2294_v42, %v1479_v60  ;;  %v797_v17 = vsub.f32 %v2296_v32, %v1475_v8 }
 0x10d   : > { %v712_v44 = vsub.f32 %v710_v5, %v711_v15  ;;  %v2312_v15 = vld [vmem:[#allocation2 + $0x48] sm:$0xff] }
 0x10e   : > { %v781_v56 = vadd.f32 %v780_v23, %v779_v58  ;;  %v802_v5 = vmul.f32 %v797_v17, %v797_v17 }
 0x10f   : > { %vm716_vm5 = vcmp.lt.f32.partialorder %v712_v44, 0.0  ;;  %vm717_vm13 = vcmp.eq.f32.partialorder %v712_v44, 0.0  ;;  %v2314_v44 = vld [vmem:[#allocation3 + $0x48] sm:$0xff] }
 0x110   : > { %vm719_vm3 = vmand %vm717_vm13, %vm718_vm1 }
 0x111   : > { %vm2254_vm7 = vmor %vm716_vm5, %vm719_vm3 }
 0x112   : > { %v721_v39 = vsel %vm2254_vm7, %v2214_v33, %v2246_v0  ;;  %v722_v57 = vsel %vm2254_vm7, %v2216_v25, %v2248_v1  ;;  %v723_v16 = vsel %vm2254_vm7, %v708_v31, %v701_v2  ;;  %v724_v34 = vsel %vm2254_vm7, %v709_v6, %v702_v3 }
 0x113   : > { %v725_v50 = vsel %vm2254_vm7, %v715_v30, %v703_v4  ;;  %v732_v11 = vmul.f32 %v731_v63, %v723_v16  ;;  %v733_v49 = vmul.f32 %v730_v62, %v724_v34  ;;  %v801_v4 = vmul.f32 %v796_v40, %v796_v40 }
 0x114   : > { %vm740_vm14 = vcmp.gt.f32.partialorder %v737_v38, %v725_v50 }
 0x115   : > { %v734_v51 = vsub.f32 %v732_v11, %v733_v49  ;;  %v803_v21 = vadd.f32 %v802_v5, %v801_v4 }
 0x117   : > { %vm738_vm8 = vcmp.lt.f32.partialorder %v734_v51, 0.0  ;;  %vm739_vm9 = vcmp.eq.f32.partialorder %v734_v51, 0.0 }
 0x118   : > { %vm741_vm10 = vmand %vm739_vm9, %vm740_vm14 }
 0x119   : > { %vm2280_vm11 = vmor %vm738_vm8, %vm741_vm10 }
 0x11a   : > { %v745_v46 = vsel %vm2280_vm11, %v730_v62, %v723_v16  ;;  %v746_v26 = vsel %vm2280_vm11, %v731_v63, %v724_v34  ;;  %v747_v27 = vsel %vm2280_vm11, %v737_v38, %v725_v50  ;;  %v816_v38 = vsub.f32 %v2312_v15, %v1479_v60 }
 0x11b   : > { %v754_v31 = vmul.f32 %v753_v37, %v745_v46  ;;  %v755_v6 = vmul.f32 %v752_v14, %v746_v26  ;;  %vm762_vm12 = vcmp.gt.f32.partialorder %v759_v48, %v747_v27 }
 0x11c   : > { %v821_v51 = vmul.f32 %v816_v38, %v816_v38 }
 0x11d   : > { %v756_v7 = vsub.f32 %v754_v31, %v755_v6 }
 0x11f   : > { %vm760_vm15 = vcmp.lt.f32.partialorder %v756_v7, 0.0  ;;  %vm761_vm0 = vcmp.eq.f32.partialorder %v756_v7, 0.0 }
 0x120   : > { %vm763_vm2 = vmand %vm761_vm0, %vm762_vm12 }
 0x121   : > { %vm2298_vm4 = vmor %vm760_vm15, %vm763_vm2 }
 0x122   : > { %v767_v41 = vsel %vm2298_vm4, %v752_v14, %v745_v46  ;;  %v768_v30 = vsel %vm2298_vm4, %v753_v37, %v746_v26  ;;  %v769_v62 = vsel %vm2298_vm4, %v759_v48, %v747_v27  ;;  %v817_v14 = vsub.f32 %v2314_v44, %v1475_v8  ;;  %v2332_v48 = vld [vmem:[#allocation3 + $0x50] sm:$0xff] }
 0x123   : > { %v776_v63 = vmul.f32 %v775_v12, %v767_v41  ;;  %v777_v2 = vmul.f32 %v774_v35, %v768_v30  ;;  %vm784_vm6 = vcmp.gt.f32.partialorder %v781_v56, %v769_v62  ;;  %v836_v46 = vsub.f32 %v2330_v54, %v1479_v60 }
 0x124   : > { %v822_v9 = vmul.f32 %v817_v14, %v817_v14  ;;  %v837_v26 = vsub.f32 %v2332_v48, %v1475_v8 }
 0x125   : > { %v778_v3 = vsub.f32 %v776_v63, %v777_v2 }
 0x127   : > { %vm782_vm1 = vcmp.lt.f32.partialorder %v778_v3, 0.0  ;;  %vm783_vm5 = vcmp.eq.f32.partialorder %v778_v3, 0.0 }
 0x128   : > { %vm785_vm13 = vmand %vm783_vm5, %vm784_vm6 }
 0x129   : > { %vm2316_vm3 = vmor %vm782_vm1, %vm785_vm13 }
 0x12a   : > { %v789_v37 = vsel %vm2316_vm3, %v774_v35, %v767_v41  ;;  %v790_v16 = vsel %vm2316_vm3, %v775_v12, %v768_v30  ;;  %v791_v34 = vsel %vm2316_vm3, %v781_v56, %v769_v62  ;;  %v823_v12 = vadd.f32 %v822_v9, %v821_v51  ;;  %v854_v30 = vld [vmem:[#allocation2 + $0x58] sm:$0xff]  ;;  %v855_v62 = vld [vmem:[#allocation3 + $0x58] sm:$0xff] }
 0x12b   : > { %v798_v50 = vmul.f32 %v797_v17, %v789_v37  ;;  %v799_v11 = vmul.f32 %v796_v40, %v790_v16  ;;  %vm806_vm14 = vcmp.gt.f32.partialorder %v803_v21, %v791_v34  ;;  %v841_v56 = vmul.f32 %v836_v46, %v836_v46 }
 0x12c   : > { %v842_v41 = vmul.f32 %v837_v26, %v837_v26  ;;  %v857_v2 = vsub.f32 %v855_v62, %v1475_v8 }
 0x12d   : > { %v800_v49 = vsub.f32 %v798_v50, %v799_v11  ;;  %v874_v11 = vld [vmem:[#allocation2 + $0x60] sm:$0xff] }
 0x12e   : > { %v862_v50 = vmul.f32 %v857_v2, %v857_v2  ;;  %v876_v0 = vsub.f32 %v874_v11, %v1479_v60 }
 0x12f   : > { %vm804_vm8 = vcmp.lt.f32.partialorder %v800_v49, 0.0  ;;  %vm805_vm9 = vcmp.eq.f32.partialorder %v800_v49, 0.0  ;;  %v875_v49 = vld [vmem:[#allocation3 + $0x60] sm:$0xff] }
 0x130   : > { %vm807_vm10 = vmand %vm805_vm9, %vm806_vm14  ;;  %v877_v1 = vsub.f32 %v875_v49, %v1475_v8  ;;  %v881_v9 = vmul.f32 %v876_v0, %v876_v0 }
 0x131   : > { %vm2334_vm12 = vmor %vm804_vm8, %vm807_vm10 }
 0x132   : > { %v811_v27 = vsel %vm2334_vm12, %v796_v40, %v789_v37  ;;  %v812_v31 = vsel %vm2334_vm12, %v797_v17, %v790_v16  ;;  %v813_v6 = vsel %vm2334_vm12, %v803_v21, %v791_v34  ;;  %v843_v40 = vadd.f32 %v842_v41, %v841_v56 }
 0x133   : > { %v818_v7 = vmul.f32 %v817_v14, %v811_v27  ;;  %v819_v58 = vmul.f32 %v816_v38, %v812_v31  ;;  %vm826_vm15 = vcmp.gt.f32.partialorder %v823_v12, %v813_v6  ;;  %v856_v17 = vsub.f32 %v854_v30, %v1479_v60 }
 0x134   : > { %v743_v16 = vsel %vm2280_vm11, %v2238_v45, %v721_v39 }
 0x135   : > { %v820_v23 = vsub.f32 %v818_v7, %v819_v58  ;;  %v861_v34 = vmul.f32 %v856_v17, %v856_v17  ;;  %v765_v33 = vsel %vm2298_vm4, %v2250_v28, %v743_v16 }
 0x136   : > { %v787_v28 = vsel %vm2316_vm3, %v2276_v10, %v765_v33 }
 0x137   : > { %vm824_vm0 = vcmp.lt.f32.partialorder %v820_v23, 0.0  ;;  %vm825_vm2 = vcmp.eq.f32.partialorder %v820_v23, 0.0  ;;  %v809_v10 = vsel %vm2334_vm12, %v2294_v42, %v787_v28 }
 0x138   : > { %vm827_vm6 = vmand %vm825_vm2, %vm826_vm15 }
 0x139   : > { %vm2348_vm1 = vmor %vm824_vm0, %vm827_vm6 }
 0x13a   : > { %v831_v3 = vsel %vm2348_vm1, %v816_v38, %v811_v27  ;;  %v832_v4 = vsel %vm2348_vm1, %v817_v14, %v812_v31  ;;  %v833_v5 = vsel %vm2348_vm1, %v823_v12, %v813_v6  ;;  %v744_v38 = vsel %vm2280_vm11, %v2240_v13, %v722_v57 }
 0x13b   : > { %v838_v21 = vmul.f32 %v837_v26, %v831_v3  ;;  %v839_v37 = vmul.f32 %v836_v46, %v832_v4  ;;  %vm846_vm5 = vcmp.gt.f32.partialorder %v843_v40, %v833_v5  ;;  %v766_v25 = vsel %vm2298_vm4, %v2252_v18, %v744_v38 }
 0x13c   : > { %v863_v13 = vadd.f32 %v862_v50, %v861_v34  ;;  %v788_v39 = vsel %vm2316_vm3, %v2278_v55, %v766_v25  ;;  %v882_v12 = vmul.f32 %v877_v1, %v877_v1  ;;  %v829_v55 = vsel %vm2348_vm1, %v2312_v15, %v809_v10 }
 0x13d   : > { %v840_v14 = vsub.f32 %v838_v21, %v839_v37 }
 0x13f   : > { %vm844_vm13 = vcmp.lt.f32.partialorder %v840_v14, 0.0  ;;  %vm845_vm14 = vcmp.eq.f32.partialorder %v840_v14, 0.0 }
 0x140   : > { %vm847_vm7 = vmand %vm845_vm14, %vm846_vm5 }
 0x141   : > { %vm2382_vm8 = vmor %vm844_vm13, %vm847_vm7 }
 0x142   : > { %v851_v36 = vsel %vm2382_vm8, %v836_v46, %v831_v3  ;;  %v852_v18 = vsel %vm2382_vm8, %v837_v26, %v832_v4  ;;  %v853_v57 = vsel %vm2382_vm8, %v843_v40, %v833_v5  ;;  %v810_v46 = vsel %vm2334_vm12, %v2296_v32, %v788_v39 }
 0x143   : > { %v858_v59 = vmul.f32 %v857_v2, %v851_v36  ;;  %v859_v43 = vmul.f32 %v856_v17, %v852_v18  ;;  %vm866_vm11 = vcmp.gt.f32.partialorder %v863_v13, %v853_v57  ;;  %v830_v20 = vsel %vm2348_vm1, %v2314_v44, %v810_v46 }
 0x144   : > { %v883_v26 = vadd.f32 %v882_v12, %v881_v9  ;;  %v849_v32 = vsel %vm2382_vm8, %v2330_v54, %v829_v55  ;;  %v850_v35 = vsel %vm2382_vm8, %v2332_v48, %v830_v20  ;;  %v902_v40 = vadd.f32 (%p610_p9), %v1855_v24, %v1845_v19 }
 0x145   : > { %v860_v51 = vsub.f32 %v858_v59, %v859_v43 }
 0x147   : > { %vm864_vm4 = vcmp.lt.f32.partialorder %v860_v51, 0.0  ;;  %vm865_vm9 = vcmp.eq.f32.partialorder %v860_v51, 0.0 }
 0x148   : > { %vm867_vm3 = vmand %vm865_vm9, %vm866_vm11 }
 0x149   : > { %vm868_vm10 = vmor %vm864_vm4, %vm867_vm3 }
 0x14a   : > { %v871_v27 = vsel %vm868_vm10, %v856_v17, %v851_v36  ;;  %v872_v31 = vsel %vm868_vm10, %v857_v2, %v852_v18  ;;  %v873_v42 = vsel %vm868_vm10, %v863_v13, %v853_v57  ;;  %v869_v58 = vsel %vm868_vm10, %v854_v30, %v849_v32 }
 0x14b   : > { %v878_v6 = vmul.f32 %v877_v1, %v871_v27  ;;  %v879_v7 = vmul.f32 %v876_v0, %v872_v31  ;;  %vm886_vm12 = vcmp.gt.f32.partialorder %v883_v26, %v873_v42  ;;  %v870_v23 = vsel %vm868_vm10, %v855_v62, %v850_v35 }
 0x14c   :  { %v903_v2 = vsub.f32 (%p610_p9), %v902_v40, %v579_v61 }
 0x14d   : > { %v880_v15 = vsub.f32 %v878_v6, %v879_v7 }
 0x14e   :  { %v904_v3 = vmax.f32 (%p610_p9), %v903_v2, 1e-06 }
 0x14f   : > { %vm884_vm15 = vcmp.lt.f32.partialorder %v880_v15, 0.0  ;;  %vm885_vm0 = vcmp.eq.f32.partialorder %v880_v15, 0.0 }
 0x150   : > { %vm887_vm2 = vmand %vm885_vm0, %vm886_vm12  ;;  %1305 = vrcp.f32 (%p610_p9), %v904_v3  ;;  %vm910_vm14 = vweird.f32 (%p610_p9), %v904_v3  ;;  %v916_v16 = vand.u32 (%p610_p9), 2147483648, %v904_v3 }
 0x151   : > { %vm888_vm6 = vmor %vm884_vm15, %vm887_vm2 }
 0x152   : > { %v889_v44 = vsel %vm888_vm6, %v874_v11, %v869_v58   ;;  %v890_v56 = vsel %vm888_vm6, %v875_v49, %v870_v23  }
 0x153   : > { %v891_v41 = vmul.f32 %v1479_v60, %v890_v56  ;;  %v892_v63 = vmul.f32 %v1475_v8, %v889_v44  ;;  %vm896_vm1 = vcmp.eq.f32.partialorder %v889_v44, %v2152_v52  ;;  %vm897_vm5 = vcmp.eq.f32.partialorder %v890_v56, %v2155_v53 }
 0x154   : > { %vm898_vm13 = vmand %vm896_vm1, %vm897_vm5  ;;  %v2510_v8 = vmov %v890_v56  ;;  %v2511_v60 = vmov %v889_v44  ;;  %v914_v52 = vand.u32 (%p610_p9), 2147483647, %v904_v3 }
 0x155   : > { %v893_v54 = vsub.f32 %v891_v41, %v892_v63  ;;  %v899_v48 = vsel %vm898_vm13, 0.0, %v1471_v29  }
 0x156   :  { %v1306_v5 = vpop.eup (%p610_p9), %1305  ;;  %vm915_vm9 = vcmp.eq.f32.partialorder (%p610_p9), %v914_v52, 8.507059e+37 }
 0x157   : > { %v894_v30 = vmul.f32 %v1471_v29, %v893_v54  ;;  %v2509_v29 = vmov %v899_v48  ;;  %612 = sbr.rel (!%p610_p9) target bundleno = 232 (0xe8), region = 210  ;;  %v906_v37 = vmul.f32 (%p610_p9), %v1306_v5, %v904_v3  ;;  %vm911_vm7 = vweird.f32 (%p610_p9), %v1306_v5 }
 0x158   :  { %vm912_vm4 = vmor (%p610_p9), %vm910_vm14, %vm911_vm7  ;;  %v917_v29 = vor.u32 (%p610_p9), 1.1754944e-38, %v916_v16 }
 0x159   : > { %v895_v62 = vadd.f32 %v1467_v22, %v894_v30   ;;  %v907_v14 = vsub.f32 (%p610_p9), 1.0, %v906_v37 }
 0x15b   : > { %v2508_v22 = vmov %v895_v62  ;;  %v900_v60 = vand.u32 (%p610_p9), 2147483647, %v895_v62  ;;  %v908_v24 = vmul.f32 (%p610_p9), %v1306_v5, %v907_v14 }
 0x15d   :  { %v901_v17 = vmul.f32 0.5, %v900_v60  ;;  %v909_v34 = vadd.f32 %v1306_v5, %v908_v24 }
 0x15f   :  { %v920_v4 = vmax.f32 %v901_v17, 1e-06  ;;  %v913_v33 = vsel %vm912_vm4, %v1306_v5, %v909_v34 }
 0x160   :  { %v918_v25 = vsel %vm915_vm9, %v917_v29, %v913_v33 }
 0x161   :  { %1307 = vrcp.f32 %v920_v4  ;;  %v933_v53 = vand.u32 2147483648, %v920_v4  ;;  %vm927_vm8 = vweird.f32 %v920_v4  ;;  %v931_v19 = vand.u32 2147483647, %v920_v4 }
 0x162   :  { %v921_v11 = vsub.f32 %v920_v4, %v903_v2  ;;  %v919_v13 = vmul.f32 %v918_v25, %v579_v61 }
 0x163   :  { %v934_v50 = vor.u32 1.1754944e-38, %v933_v53  ;;  %vm932_vm10 = vcmp.eq.f32.partialorder %v931_v19, 8.507059e+37 }
 0x167   :  { %v1308_v21 = vpop.eup %1307 }
 0x168   :  { %v923_v38 = vmul.f32 %v1308_v21, %v920_v4  ;;  %vm928_vm11 = vweird.f32 %v1308_v21 }
 0x169   :  { %vm929_vm3 = vmor %vm927_vm8, %vm928_vm11 }
 0x16a   :  { %v924_v22 = vsub.f32 1.0, %v923_v38 }
 0x16c   :  { %v925_v8 = vmul.f32 %v1308_v21, %v924_v22 }
 0x16e   :  { %v926_v49 = vadd.f32 %v1308_v21, %v925_v8 }
 0x170   :  { %v930_v45 = vsel %vm929_vm3, %v1308_v21, %v926_v49 }
 0x171   :  { %v935_v0 = vsel %vm932_vm10, %v934_v50, %v930_v45 }
 0x172   :  { %v936_v1 = vmul.f32 %v935_v0, %v921_v11 }
 0x174   :  { %v937_v28 = vsub.f32 %v919_v13, %v936_v1 }
 0x176   :  { %v938_v36 = vsub.f32 1.0, %v937_v28 }
 0x178   :  { %939 = vst [vmem:[%s2446_s1] sm:$0xff] %v938_v36 }

</bundles_post_ra>
